<compile_context>
chip_gen: v7x
topology: tpu7x:2x2x1
jax: 0.10.0
libtpu: 0.0.40
codegen_flags: <defaults>
</compile_context>

<pallas_src>
import functools
import math

import jax
import jax.numpy as jnp
from jax import lax
from jax.experimental import pallas as pl
from jax.experimental.pallas import tpu as pltpu


_SQRT_HALF = 1.0 / math.sqrt(2.0)


def _layer_norm_f32(y, gamma, beta, eps):
    mu = jnp.mean(y, axis=-1, keepdims=True)
    d = y - mu
    var = jnp.mean(d * d, axis=-1, keepdims=True)
    return d * lax.rsqrt(var + eps) * gamma + beta


def _pick_q_tile(S, H, budget_bytes=4 << 20, max_tile=512):
    """Largest q-tile (multiple of 8, dividing S, <= max_tile) such that the
    f32 score block H*tq*S*4 stays under `budget_bytes`; falls back to S."""
    cap = max(8, budget_bytes // max(1, H * S * 4))
    cap = min(cap, max_tile, S)
    t = (cap // 8) * 8
    while t >= 8:
        if S % t == 0:
            return t
        t -= 8
    return S


def _vmem_limit_bytes():
    """~85% of physical per-core VMEM (chip-aware), conservative fallback."""
    try:
        cap = int(pltpu.get_tpu_info().vmem_capacity_bytes)
    except Exception:
        cap = 64 * 1024 * 1024  # fits every TPU generation (v7x has 64 MiB/TC)
    return max(32 * 1024 * 1024, int(cap * 0.85))


# ----------------------- fused encoder-layer kernel -------------------------
def _layer_kernel(
    # inputs
    xf_ref, xq_ref,
    wq_ref, bq_ref, wkv_ref, bkv_ref, wo_ref, bo_ref,
    g1_ref, be1_ref,
    w1_ref, fb1_ref, w2_ref, fb2_ref,
    g2_ref, be2_ref, gf_ref, bef_ref,
    # outputs
    o_ref,
    # scratch
    kv_scr, q_scr, kh_scr, vh_scr, qh_scr, oc_scr,
    *, nhead, head_dim, scale, eps, activation, apply_final_ln,
):
    f32 = jnp.float32
    mm = wq_ref.dtype                 # matmul operand dtype (bf16)
    H, Dh = nhead, head_dim
    S = xf_ref.shape[1]
    E = xf_ref.shape[2]
    i_q = pl.program_id(1)

    # ---- K/V projection: once per batch element (first q-tile), full width ----
    @pl.when(i_q == 0)
    def _():
        xk = xf_ref[0].astype(mm)                                        # (S, E)
        kv = jnp.dot(xk, wkv_ref[...], preferred_element_type=f32)       # (S, 2E)
        kv_scr[...] = (kv + bkv_ref[...]).astype(mm)
        for h in range(H):                   # head-major split (cheap VMEM copies)
            kh_scr[h] = kv_scr[:, h * Dh:(h + 1) * Dh]
            vh_scr[h] = kv_scr[:, E + h * Dh:E + (h + 1) * Dh]

    # ---- Q projection for this q-tile (1/sqrt(Dh) folded into Q) ----
    xq = xq_ref[0].astype(f32)                                           # (tq, E)
    q2d = jnp.dot(xq_ref[0].astype(mm), wq_ref[...],
                  preferred_element_type=f32) + bq_ref[...]
    q_scr[...] = (q2d * scale).astype(mm)
    for h in range(H):
        qh_scr[h] = q_scr[:, h * Dh:(h + 1) * Dh]

    # ---- attention core: single batched-over-heads QK^T -> softmax -> PV ----
    qh = qh_scr[...]                                                     # (H, tq, Dh)
    kh = kh_scr[...]                                                     # (H, S,  Dh)
    vh = vh_scr[...]                                                     # (H, S,  Dh)
    s = lax.dot_general(qh, kh, (((2,), (2,)), ((0,), (0,))),
                        preferred_element_type=f32)                      # (H, tq, S)
    s = s - jnp.max(s, axis=-1, keepdims=True)
    p = jnp.exp(s)
    p = p * pl.reciprocal(jnp.sum(p, axis=-1, keepdims=True), approx=True)
    oh = lax.dot_general(p.astype(mm), vh, (((2,), (1,)), ((0,), (0,))),
                         preferred_element_type=f32)                     # (H, tq, Dh)

    # ---- concat heads in VMEM, single full-width output projection ----
    for h in range(H):
        oc_scr[:, h * Dh:(h + 1) * Dh] = oh[h].astype(mm)
    attn = jnp.dot(oc_scr[...], wo_ref[...],
                   preferred_element_type=f32) + bo_ref[...]             # (tq, E)

    y1 = _layer_norm_f32(xq + attn, g1_ref[...], be1_ref[...], eps)

    # ---- feed-forward: (tq, dff) intermediate stays in VMEM ----
    h1 = jnp.dot(y1.astype(mm), w1_ref[...],
                 preferred_element_type=f32) + fb1_ref[...]
    if activation == "relu":
        h1 = jnp.maximum(h1, 0.0)
    else:  # exact erf-based gelu (torch default)
        h1 = 0.5 * h1 * (1.0 + lax.erf(h1 * _SQRT_HALF))
    ff = jnp.dot(h1.astype(mm), w2_ref[...],
                 preferred_element_type=f32) + fb2_ref[...]
    y2 = _layer_norm_f32(y1 + ff, g2_ref[...], be2_ref[...], eps)

    if apply_final_ln:                    # encoder-level LayerNorm folded in
        y2 = _layer_norm_f32(y2, gf_ref[...], bef_ref[...], eps)

    o_ref[0] = y2.astype(o_ref.dtype)


def _layer_call(xb, p, lnf_g, lnf_b, *, nhead, head_dim, activation, eps,
                apply_final_ln, out_dtype, q_tile, vmem_limit):
    N, S, E = xb.shape
    H, Dh, tq = nhead, head_dim, q_tile
    nq = S // tq
    dff = p["w1_t"].shape[1]
    mm_dt = p["wq_t"].dtype

    kern = functools.partial(
        _layer_kernel, nhead=H, head_dim=Dh, scale=1.0 / math.sqrt(Dh),
        eps=eps, activation=activation, apply_final_ln=apply_final_ln)

    res = lambda n, q: (0, 0)             # resident (constant-index) operands
    return pl.pallas_call(
        kern,
        out_shape=jax.ShapeDtypeStruct((N, S, E), out_dtype),
        grid=(N, nq),
        in_specs=[
            pl.BlockSpec((1, S, E), lambda n, q: (n, 0, 0)),    # x full seq (for K/V)
            pl.BlockSpec((1, tq, E), lambda n, q: (n, q, 0)),   # x q-tile
            pl.BlockSpec((E, E), res),        # Wq^T
            pl.BlockSpec((1, E), res),        # bq
            pl.BlockSpec((E, 2 * E), res),    # [Wk^T | Wv^T]
            pl.BlockSpec((1, 2 * E), res),    # [bk | bv]
            pl.BlockSpec((E, E), res),        # Wo^T
            pl.BlockSpec((1, E), res),        # bo
            pl.BlockSpec((1, E), res),        # ln1 gamma
            pl.BlockSpec((1, E), res),        # ln1 beta
            pl.BlockSpec((E, dff), res),      # W1^T
            pl.BlockSpec((1, dff), res),      # b1
            pl.BlockSpec((dff, E), res),      # W2^T
            pl.BlockSpec((1, E), res),        # b2
            pl.BlockSpec((1, E), res),        # ln2 gamma
            pl.BlockSpec((1, E), res),        # ln2 beta
            pl.BlockSpec((1, E), res),        # final-norm gamma (used on last layer)
            pl.BlockSpec((1, E), res),        # final-norm beta
        ],
        out_specs=pl.BlockSpec((1, tq, E), lambda n, q: (n, q, 0)),
        scratch_shapes=[
            pltpu.VMEM((S, 2 * E), mm_dt),    # fused K|V projection
            pltpu.VMEM((tq, E), mm_dt),       # Q projection (current tile)
            pltpu.VMEM((H, S, Dh), mm_dt),    # K head-major (persists across q-tiles)
            pltpu.VMEM((H, S, Dh), mm_dt),    # V head-major
            pltpu.VMEM((H, tq, Dh), mm_dt),   # Q head-major
            pltpu.VMEM((tq, E), mm_dt),       # concatenated attention output
        ],
        compiler_params=pltpu.CompilerParams(
            dimension_semantics=("parallel", "arbitrary"),
            vmem_limit_bytes=vmem_limit),
    )(xb, xb, p["wq_t"], p["bq"], p["wkv_t"], p["bkv"], p["wo_t"], p["bo"],
      p["ln1_g"], p["ln1_b"], p["w1_t"], p["fb1"], p["w2_t"], p["fb2"],
      p["ln2_g"], p["ln2_b"], lnf_g, lnf_b)


# ------------------------------- jitted forward ------------------------------
def _encoder_forward(layers, lnf_g, lnf_b, x, *, nhead, head_dim, activation,
                     eps, inter_dtype, vmem_limit):
    # x: (S, N, E) — PyTorch batch_first=False layout.
    xb = jnp.transpose(x, (1, 0, 2))                      # (N, S, E)
    S = xb.shape[1]
    tq = _pick_q_tile(S, nhead)
    L = len(layers)
    for i, p in enumerate(layers):                        # unrolled under jit
        last = i == L - 1
        xb = _layer_call(
            xb, p, lnf_g, lnf_b, nhead=nhead, head_dim=head_dim,
            activation=activation, eps=eps, apply_final_ln=last,
            out_dtype=(x.dtype if last else inter_dtype),  # bf16 between layers
            q_tile=tq, vmem_limit=vmem_limit)
    return jnp.transpose(xb, (1, 0, 2))


# --------------------------- Encoder (wrapper class) --------------------------
class EncoderPallas:
    """JAX/Pallas port of the PyTorch `Encoder` (post-norm TransformerEncoder)."""

    def __init__(self, d_model, nhead, activation, num_layers,
                 layer_norm_eps=1e-5, dim_feedforward=2048,
                 mm_dtype=jnp.bfloat16, inter_dtype=jnp.bfloat16, key=None):
        assert num_layers > 0, "invalid num layers"
        assert d_model % nhead == 0
        assert activation in ("relu", "gelu")
        self.d_model, self.nhead = d_model, nhead
        self.head_dim = d_model // nhead
        self.activation, self.num_layers, self.eps = activation, num_layers, layer_norm_eps
        self.dim_ff = dim_feedforward

        if key is None:
            key = jax.random.PRNGKey(42)
        E, dff = d_model, dim_feedforward

        def u(k, shape, fan_in):
            bound = 1.0 / math.sqrt(fan_in)
            return jax.random.uniform(k, shape, jnp.float32, -bound, bound)

        # Weights stored pre-transposed / fused / cast to the matmul dtype so
        # the forward pass does zero layout work on them.
        # TODO(synk): torch uses xavier_uniform_ for in_proj; numerically
        #             different init, irrelevant for kernel behaviour.
        self.layers = []
        for _ in range(num_layers):
            key, *ks = jax.random.split(key, 9)
            in_w = u(ks[0], (3 * E, E), E)
            in_b = u(ks[1], (3 * E,), E)
            out_w = u(ks[2], (E, E), E)
            out_b = u(ks[3], (E,), E)
            l1_w = u(ks[4], (dff, E), E)
            l1_b = u(ks[5], (dff,), E)
            l2_w = u(ks[6], (E, dff), dff)
            l2_b = u(ks[7], (E,), dff)

            wq, wk, wv = in_w[:E], in_w[E:2 * E], in_w[2 * E:]
            bq, bk, bv = in_b[:E], in_b[E:2 * E], in_b[2 * E:]
            self.layers.append(dict(
                wq_t=wq.T.astype(mm_dtype),
                bq=bq.reshape(1, E),
                wkv_t=jnp.concatenate([wk.T, wv.T], axis=1).astype(mm_dtype),
                bkv=jnp.concatenate([bk, bv]).reshape(1, 2 * E),
                wo_t=out_w.T.astype(mm_dtype),
                bo=out_b.reshape(1, E),
                ln1_g=jnp.ones((1, E), jnp.float32),
                ln1_b=jnp.zeros((1, E), jnp.float32),
                w1_t=l1_w.T.astype(mm_dtype), fb1=l1_b.reshape(1, dff),
                w2_t=l2_w.T.astype(mm_dtype), fb2=l2_b.reshape(1, E),
                ln2_g=jnp.ones((1, E), jnp.float32),
                ln2_b=jnp.zeros((1, E), jnp.float32),
            ))
        self.lnf_g = jnp.ones((1, E), jnp.float32)
        self.lnf_b = jnp.zeros((1, E), jnp.float32)

        self._forward = jax.jit(functools.partial(
            _encoder_forward, nhead=nhead, head_dim=self.head_dim,
            activation=activation, eps=layer_norm_eps,
            inter_dtype=inter_dtype, vmem_limit=_vmem_limit_bytes()))

    def __call__(self, x, src_key_padding_mask=None):
        assert src_key_padding_mask is None  # TODO(synk): padding mask not supported
        return self._forward(self.layers, self.lnf_g, self.lnf_b, x)


# ------------------------------------ main ------------------------------------
if __name__ == "__main__":
    S, N, E, H = 8, 2, 32, 4          # seq=8, batch=2, d_model=32, nhead=4
    NUM_LAYERS = 2

    root = jax.random.PRNGKey(0)
    k_model, k_input = jax.random.split(root)

    enc = EncoderPallas(d_model=E, nhead=H, activation="relu",
                        num_layers=NUM_LAYERS, layer_norm_eps=1e-5,
                        key=k_model)

    x = jax.random.normal(k_input, (S, N, E), jnp.float32)
    out = enc(x, src_key_padding_mask=None)
    out = jax.block_until_ready(out)
    assert out.shape == (S, N, E) and out.dtype == jnp.float32
    assert bool(jnp.all(jnp.isfinite(out)))
    print("KERNEL_OK")
</pallas_src>

<mosaic_0001>
module attributes {stable_mosaic.version = 11 : i64} {
  func.func @_layer_kernel(%arg0: i32, %arg1: i32, %arg2: memref<1x8x32xf32, #tpu.memory_space<vmem>>, %arg3: memref<1x8x32xf32, #tpu.memory_space<vmem>>, %arg4: memref<32x32xbf16, #tpu.memory_space<vmem>>, %arg5: memref<1x32xf32, #tpu.memory_space<vmem>>, %arg6: memref<32x64xbf16, #tpu.memory_space<vmem>>, %arg7: memref<1x64xf32, #tpu.memory_space<vmem>>, %arg8: memref<32x32xbf16, #tpu.memory_space<vmem>>, %arg9: memref<1x32xf32, #tpu.memory_space<vmem>>, %arg10: memref<1x32xf32, #tpu.memory_space<vmem>>, %arg11: memref<1x32xf32, #tpu.memory_space<vmem>>, %arg12: memref<32x2048xbf16, #tpu.memory_space<vmem>>, %arg13: memref<1x2048xf32, #tpu.memory_space<vmem>>, %arg14: memref<2048x32xbf16, #tpu.memory_space<vmem>>, %arg15: memref<1x32xf32, #tpu.memory_space<vmem>>, %arg16: memref<1x32xf32, #tpu.memory_space<vmem>>, %arg17: memref<1x32xf32, #tpu.memory_space<vmem>>, %arg18: memref<1x32xf32, #tpu.memory_space<vmem>>, %arg19: memref<1x32xf32, #tpu.memory_space<vmem>>, %arg20: memref<1x8x32xbf16, #tpu.memory_space<vmem>>, %arg21: memref<8x64xbf16, #tpu.memory_space<vmem>>, %arg22: memref<8x32xbf16, #tpu.memory_space<vmem>>, %arg23: memref<4x8x8xbf16, #tpu.memory_space<vmem>>, %arg24: memref<4x8x8xbf16, #tpu.memory_space<vmem>>, %arg25: memref<4x8x8xbf16, #tpu.memory_space<vmem>>, %arg26: memref<8x32xbf16, #tpu.memory_space<vmem>>) attributes {dimension_semantics = [#tpu.dimension_semantics<parallel>, #tpu.dimension_semantics<arbitrary>], iteration_bounds = array<i64: 2, 1>, scalar_prefetch = 0 : i64, scratch_operands = 6 : i64, tpu.core_type = #tpu.core_type<tc>, window_params = [{transform_indices = @transform_0, window_bounds = array<i64: 1, 8, 32>}, {transform_indices = @transform_1, window_bounds = array<i64: 1, 8, 32>}, {pipeline_mode = #tpu.pipeline_mode<synchronous>, transform_indices = @transform_2, window_bounds = array<i64: 32, 32>}, {pipeline_mode = #tpu.pipeline_mode<synchronous>, transform_indices = @transform_3, window_bounds = array<i64: 1, 32>}, {pipeline_mode = #tpu.pipeline_mode<synchronous>, transform_indices = @transform_4, window_bounds = array<i64: 32, 64>}, {pipeline_mode = #tpu.pipeline_mode<synchronous>, transform_indices = @transform_5, window_bounds = array<i64: 1, 64>}, {pipeline_mode = #tpu.pipeline_mode<synchronous>, transform_indices = @transform_6, window_bounds = array<i64: 32, 32>}, {pipeline_mode = #tpu.pipeline_mode<synchronous>, transform_indices = @transform_7, window_bounds = array<i64: 1, 32>}, {pipeline_mode = #tpu.pipeline_mode<synchronous>, transform_indices = @transform_8, window_bounds = array<i64: 1, 32>}, {pipeline_mode = #tpu.pipeline_mode<synchronous>, transform_indices = @transform_9, window_bounds = array<i64: 1, 32>}, {pipeline_mode = #tpu.pipeline_mode<synchronous>, transform_indices = @transform_10, window_bounds = array<i64: 32, 2048>}, {pipeline_mode = #tpu.pipeline_mode<synchronous>, transform_indices = @transform_11, window_bounds = array<i64: 1, 2048>}, {pipeline_mode = #tpu.pipeline_mode<synchronous>, transform_indices = @transform_12, window_bounds = array<i64: 2048, 32>}, {pipeline_mode = #tpu.pipeline_mode<synchronous>, transform_indices = @transform_13, window_bounds = array<i64: 1, 32>}, {pipeline_mode = #tpu.pipeline_mode<synchronous>, transform_indices = @transform_14, window_bounds = array<i64: 1, 32>}, {pipeline_mode = #tpu.pipeline_mode<synchronous>, transform_indices = @transform_15, window_bounds = array<i64: 1, 32>}, {pipeline_mode = #tpu.pipeline_mode<synchronous>, transform_indices = @transform_16, window_bounds = array<i64: 1, 32>}, {pipeline_mode = #tpu.pipeline_mode<synchronous>, transform_indices = @transform_17, window_bounds = array<i64: 1, 32>}, {transform_indices = @transform_18, window_bounds = array<i64: 1, 8, 32>}]} {
    %c0_i32 = arith.constant 0 : i32
    %0 = arith.cmpi eq, %arg1, %c0_i32 : i32
    %1 = arith.extui %0 : i1 to i32
    %c0_i32_0 = arith.constant 0 : i32
    %2 = arith.cmpi ne, %1, %c0_i32_0 : i32
    scf.if %2 {
      %c0_87 = arith.constant 0 : index
      %c0_88 = arith.constant 0 : index
      %c0_89 = arith.constant 0 : index
      %135 = vector.load %arg2[%c0_87, %c0_88, %c0_89] : memref<1x8x32xf32, #tpu.memory_space<vmem>>, vector<1x8x32xf32>
      %136 = vector.shape_cast %135 : vector<1x8x32xf32> to vector<8x32xf32>
      %137 = arith.truncf %136 : vector<8x32xf32> to vector<8x32xbf16>
      %c0_90 = arith.constant 0 : index
      %c0_91 = arith.constant 0 : index
      %138 = vector.load %arg6[%c0_90, %c0_91] : memref<32x64xbf16, #tpu.memory_space<vmem>>, vector<32x64xbf16>
      %cst_92 = arith.constant dense<0.000000e+00> : vector<8x64xf32>
      %139 = tpu.matmul %137, %138, %cst_92 {dimension_numbers = #tpu.dot_dimension_numbers<[1], [0], [0], [1], [0, 0, 1, 1], [], []>} : vector<8x32xbf16>, vector<32x64xbf16>, vector<8x64xf32> -> vector<8x64xf32>
      %c0_93 = arith.constant 0 : index
      %c0_94 = arith.constant 0 : index
      %140 = vector.load %arg7[%c0_93, %c0_94] : memref<1x64xf32, #tpu.memory_space<vmem>>, vector<1x64xf32>
      %141 = vector.broadcast %140 : vector<1x64xf32> to vector<8x64xf32>
      %142 = arith.addf %139, %141 : vector<8x64xf32>
      %143 = arith.truncf %142 : vector<8x64xf32> to vector<8x64xbf16>
      %c0_95 = arith.constant 0 : index
      %c0_96 = arith.constant 0 : index
      %144 = vector.load %arg21[%c0_95, %c0_96] : memref<8x64xbf16, #tpu.memory_space<vmem>>, vector<8x64xbf16>
      tpu.vector_store %arg21[%c0_95, %c0_96], %143 {strides = array<i32>} : memref<8x64xbf16, #tpu.memory_space<vmem>>, vector<8x64xbf16>,
      %c0_97 = arith.constant 0 : index
      %c0_98 = arith.constant 0 : index
      %145 = vector.load %arg21[%c0_97, %c0_98] : memref<8x64xbf16, #tpu.memory_space<vmem>>, vector<8x8xbf16>
      %c0_99 = arith.constant 0 : index
      %c0_100 = arith.constant 0 : index
      %c0_101 = arith.constant 0 : index
      %146 = vector.load %arg23[%c0_99, %c0_100, %c0_101] : memref<4x8x8xbf16, #tpu.memory_space<vmem>>, vector<1x8x8xbf16>
      %147 = vector.shape_cast %146 : vector<1x8x8xbf16> to vector<8x8xbf16>
      %148 = vector.shape_cast %145 : vector<8x8xbf16> to vector<1x8x8xbf16>
      tpu.vector_store %arg23[%c0_99, %c0_100, %c0_101], %148 {strides = array<i32>} : memref<4x8x8xbf16, #tpu.memory_space<vmem>>, vector<1x8x8xbf16>,
      %c0_102 = arith.constant 0 : index
      %c32 = arith.constant 32 : index
      %149 = vector.load %arg21[%c0_102, %c32] : memref<8x64xbf16, #tpu.memory_space<vmem>>, vector<8x8xbf16>
      %c0_103 = arith.constant 0 : index
      %c0_104 = arith.constant 0 : index
      %c0_105 = arith.constant 0 : index
      %150 = vector.load %arg24[%c0_103, %c0_104, %c0_105] : memref<4x8x8xbf16, #tpu.memory_space<vmem>>, vector<1x8x8xbf16>
      %151 = vector.shape_cast %150 : vector<1x8x8xbf16> to vector<8x8xbf16>
      %152 = vector.shape_cast %149 : vector<8x8xbf16> to vector<1x8x8xbf16>
      tpu.vector_store %arg24[%c0_103, %c0_104, %c0_105], %152 {strides = array<i32>} : memref<4x8x8xbf16, #tpu.memory_space<vmem>>, vector<1x8x8xbf16>,
      %c0_106 = arith.constant 0 : index
      %c8_107 = arith.constant 8 : index
      %153 = vector.load %arg21[%c0_106, %c8_107] : memref<8x64xbf16, #tpu.memory_space<vmem>>, vector<8x8xbf16>
      %c1_108 = arith.constant 1 : index
      %c0_109 = arith.constant 0 : index
      %c0_110 = arith.constant 0 : index
      %154 = vector.load %arg23[%c1_108, %c0_109, %c0_110] : memref<4x8x8xbf16, #tpu.memory_space<vmem>>, vector<1x8x8xbf16>
      %155 = vector.shape_cast %154 : vector<1x8x8xbf16> to vector<8x8xbf16>
      %156 = vector.shape_cast %153 : vector<8x8xbf16> to vector<1x8x8xbf16>
      tpu.vector_store %arg23[%c1_108, %c0_109, %c0_110], %156 {strides = array<i32>} : memref<4x8x8xbf16, #tpu.memory_space<vmem>>, vector<1x8x8xbf16>,
      %c0_111 = arith.constant 0 : index
      %c40 = arith.constant 40 : index
      %157 = vector.load %arg21[%c0_111, %c40] : memref<8x64xbf16, #tpu.memory_space<vmem>>, vector<8x8xbf16>
      %c1_112 = arith.constant 1 : index
      %c0_113 = arith.constant 0 : index
      %c0_114 = arith.constant 0 : index
      %158 = vector.load %arg24[%c1_112, %c0_113, %c0_114] : memref<4x8x8xbf16, #tpu.memory_space<vmem>>, vector<1x8x8xbf16>
      %159 = vector.shape_cast %158 : vector<1x8x8xbf16> to vector<8x8xbf16>
      %160 = vector.shape_cast %157 : vector<8x8xbf16> to vector<1x8x8xbf16>
      tpu.vector_store %arg24[%c1_112, %c0_113, %c0_114], %160 {strides = array<i32>} : memref<4x8x8xbf16, #tpu.memory_space<vmem>>, vector<1x8x8xbf16>,
      %c0_115 = arith.constant 0 : index
      %c16_116 = arith.constant 16 : index
      %161 = vector.load %arg21[%c0_115, %c16_116] : memref<8x64xbf16, #tpu.memory_space<vmem>>, vector<8x8xbf16>
      %c2_117 = arith.constant 2 : index
      %c0_118 = arith.constant 0 : index
      %c0_119 = arith.constant 0 : index
      %162 = vector.load %arg23[%c2_117, %c0_118, %c0_119] : memref<4x8x8xbf16, #tpu.memory_space<vmem>>, vector<1x8x8xbf16>
      %163 = vector.shape_cast %162 : vector<1x8x8xbf16> to vector<8x8xbf16>
      %164 = vector.shape_cast %161 : vector<8x8xbf16> to vector<1x8x8xbf16>
      tpu.vector_store %arg23[%c2_117, %c0_118, %c0_119], %164 {strides = array<i32>} : memref<4x8x8xbf16, #tpu.memory_space<vmem>>, vector<1x8x8xbf16>,
      %c0_120 = arith.constant 0 : index
      %c48 = arith.constant 48 : index
      %165 = vector.load %arg21[%c0_120, %c48] : memref<8x64xbf16, #tpu.memory_space<vmem>>, vector<8x8xbf16>
      %c2_121 = arith.constant 2 : index
      %c0_122 = arith.constant 0 : index
      %c0_123 = arith.constant 0 : index
      %166 = vector.load %arg24[%c2_121, %c0_122, %c0_123] : memref<4x8x8xbf16, #tpu.memory_space<vmem>>, vector<1x8x8xbf16>
      %167 = vector.shape_cast %166 : vector<1x8x8xbf16> to vector<8x8xbf16>
      %168 = vector.shape_cast %165 : vector<8x8xbf16> to vector<1x8x8xbf16>
      tpu.vector_store %arg24[%c2_121, %c0_122, %c0_123], %168 {strides = array<i32>} : memref<4x8x8xbf16, #tpu.memory_space<vmem>>, vector<1x8x8xbf16>,
      %c0_124 = arith.constant 0 : index
      %c24_125 = arith.constant 24 : index
      %169 = vector.load %arg21[%c0_124, %c24_125] : memref<8x64xbf16, #tpu.memory_space<vmem>>, vector<8x8xbf16>
      %c3_126 = arith.constant 3 : index
      %c0_127 = arith.constant 0 : index
      %c0_128 = arith.constant 0 : index
      %170 = vector.load %arg23[%c3_126, %c0_127, %c0_128] : memref<4x8x8xbf16, #tpu.memory_space<vmem>>, vector<1x8x8xbf16>
      %171 = vector.shape_cast %170 : vector<1x8x8xbf16> to vector<8x8xbf16>
      %172 = vector.shape_cast %169 : vector<8x8xbf16> to vector<1x8x8xbf16>
      tpu.vector_store %arg23[%c3_126, %c0_127, %c0_128], %172 {strides = array<i32>} : memref<4x8x8xbf16, #tpu.memory_space<vmem>>, vector<1x8x8xbf16>,
      %c0_129 = arith.constant 0 : index
      %c56 = arith.constant 56 : index
      %173 = vector.load %arg21[%c0_129, %c56] : memref<8x64xbf16, #tpu.memory_space<vmem>>, vector<8x8xbf16>
      %c3_130 = arith.constant 3 : index
      %c0_131 = arith.constant 0 : index
      %c0_132 = arith.constant 0 : index
      %174 = vector.load %arg24[%c3_130, %c0_131, %c0_132] : memref<4x8x8xbf16, #tpu.memory_space<vmem>>, vector<1x8x8xbf16>
      %175 = vector.shape_cast %174 : vector<1x8x8xbf16> to vector<8x8xbf16>
      %176 = vector.shape_cast %173 : vector<8x8xbf16> to vector<1x8x8xbf16>
      tpu.vector_store %arg24[%c3_130, %c0_131, %c0_132], %176 {strides = array<i32>} : memref<4x8x8xbf16, #tpu.memory_space<vmem>>, vector<1x8x8xbf16>,
    } else {
    }
    %c0 = arith.constant 0 : index
    %c0_1 = arith.constant 0 : index
    %c0_2 = arith.constant 0 : index
    %3 = vector.load %arg3[%c0, %c0_1, %c0_2] : memref<1x8x32xf32, #tpu.memory_space<vmem>>, vector<1x8x32xf32>
    %4 = vector.shape_cast %3 : vector<1x8x32xf32> to vector<8x32xf32>
    %c0_3 = arith.constant 0 : index
    %c0_4 = arith.constant 0 : index
    %c0_5 = arith.constant 0 : index
    %5 = vector.load %arg3[%c0_3, %c0_4, %c0_5] : memref<1x8x32xf32, #tpu.memory_space<vmem>>, vector<1x8x32xf32>
    %6 = vector.shape_cast %5 : vector<1x8x32xf32> to vector<8x32xf32>
    %7 = arith.truncf %6 : vector<8x32xf32> to vector<8x32xbf16>
    %c0_6 = arith.constant 0 : index
    %c0_7 = arith.constant 0 : index
    %8 = vector.load %arg4[%c0_6, %c0_7] : memref<32x32xbf16, #tpu.memory_space<vmem>>, vector<32x32xbf16>
    %cst = arith.constant dense<0.000000e+00> : vector<8x32xf32>
    %9 = tpu.matmul %7, %8, %cst {dimension_numbers = #tpu.dot_dimension_numbers<[1], [0], [0], [1], [0, 0, 1, 1], [], []>} : vector<8x32xbf16>, vector<32x32xbf16>, vector<8x32xf32> -> vector<8x32xf32>
    %c0_8 = arith.constant 0 : index
    %c0_9 = arith.constant 0 : index
    %10 = vector.load %arg5[%c0_8, %c0_9] : memref<1x32xf32, #tpu.memory_space<vmem>>, vector<1x32xf32>
    %11 = vector.broadcast %10 : vector<1x32xf32> to vector<8x32xf32>
    %12 = arith.addf %9, %11 : vector<8x32xf32>
    %cst_10 = arith.constant 0.353553385 : f32
    %13 = vector.broadcast %cst_10 : f32 to vector<8x32xf32>
    %14 = arith.mulf %12, %13 : vector<8x32xf32>
    %15 = arith.truncf %14 : vector<8x32xf32> to vector<8x32xbf16>
    %c0_11 = arith.constant 0 : index
    %c0_12 = arith.constant 0 : index
    %16 = vector.load %arg22[%c0_11, %c0_12] : memref<8x32xbf16, #tpu.memory_space<vmem>>, vector<8x32xbf16>
    tpu.vector_store %arg22[%c0_11, %c0_12], %15 {strides = array<i32>} : memref<8x32xbf16, #tpu.memory_space<vmem>>, vector<8x32xbf16>,
    %c0_13 = arith.constant 0 : index
    %c0_14 = arith.constant 0 : index
    %17 = vector.load %arg22[%c0_13, %c0_14] : memref<8x32xbf16, #tpu.memory_space<vmem>>, vector<8x8xbf16>
    %c0_15 = arith.constant 0 : index
    %c0_16 = arith.constant 0 : index
    %c0_17 = arith.constant 0 : index
    %18 = vector.load %arg25[%c0_15, %c0_16, %c0_17] : memref<4x8x8xbf16, #tpu.memory_space<vmem>>, vector<1x8x8xbf16>
    %19 = vector.shape_cast %18 : vector<1x8x8xbf16> to vector<8x8xbf16>
    %20 = vector.shape_cast %17 : vector<8x8xbf16> to vector<1x8x8xbf16>
    tpu.vector_store %arg25[%c0_15, %c0_16, %c0_17], %20 {strides = array<i32>} : memref<4x8x8xbf16, #tpu.memory_space<vmem>>, vector<1x8x8xbf16>,
    %c0_18 = arith.constant 0 : index
    %c8 = arith.constant 8 : index
    %21 = vector.load %arg22[%c0_18, %c8] : memref<8x32xbf16, #tpu.memory_space<vmem>>, vector<8x8xbf16>
    %c1 = arith.constant 1 : index
    %c0_19 = arith.constant 0 : index
    %c0_20 = arith.constant 0 : index
    %22 = vector.load %arg25[%c1, %c0_19, %c0_20] : memref<4x8x8xbf16, #tpu.memory_space<vmem>>, vector<1x8x8xbf16>
    %23 = vector.shape_cast %22 : vector<1x8x8xbf16> to vector<8x8xbf16>
    %24 = vector.shape_cast %21 : vector<8x8xbf16> to vector<1x8x8xbf16>
    tpu.vector_store %arg25[%c1, %c0_19, %c0_20], %24 {strides = array<i32>} : memref<4x8x8xbf16, #tpu.memory_space<vmem>>, vector<1x8x8xbf16>,
    %c0_21 = arith.constant 0 : index
    %c16 = arith.constant 16 : index
    %25 = vector.load %arg22[%c0_21, %c16] : memref<8x32xbf16, #tpu.memory_space<vmem>>, vector<8x8xbf16>
    %c2 = arith.constant 2 : index
    %c0_22 = arith.constant 0 : index
    %c0_23 = arith.constant 0 : index
    %26 = vector.load %arg25[%c2, %c0_22, %c0_23] : memref<4x8x8xbf16, #tpu.memory_space<vmem>>, vector<1x8x8xbf16>
    %27 = vector.shape_cast %26 : vector<1x8x8xbf16> to vector<8x8xbf16>
    %28 = vector.shape_cast %25 : vector<8x8xbf16> to vector<1x8x8xbf16>
    tpu.vector_store %arg25[%c2, %c0_22, %c0_23], %28 {strides = array<i32>} : memref<4x8x8xbf16, #tpu.memory_space<vmem>>, vector<1x8x8xbf16>,
    %c0_24 = arith.constant 0 : index
    %c24 = arith.constant 24 : index
    %29 = vector.load %arg22[%c0_24, %c24] : memref<8x32xbf16, #tpu.memory_space<vmem>>, vector<8x8xbf16>
    %c3 = arith.constant 3 : index
    %c0_25 = arith.constant 0 : index
    %c0_26 = arith.constant 0 : index
    %30 = vector.load %arg25[%c3, %c0_25, %c0_26] : memref<4x8x8xbf16, #tpu.memory_space<vmem>>, vector<1x8x8xbf16>
    %31 = vector.shape_cast %30 : vector<1x8x8xbf16> to vector<8x8xbf16>
    %32 = vector.shape_cast %29 : vector<8x8xbf16> to vector<1x8x8xbf16>
    tpu.vector_store %arg25[%c3, %c0_25, %c0_26], %32 {strides = array<i32>} : memref<4x8x8xbf16, #tpu.memory_space<vmem>>, vector<1x8x8xbf16>,
    %c0_27 = arith.constant 0 : index
    %c0_28 = arith.constant 0 : index
    %c0_29 = arith.constant 0 : index
    %33 = vector.load %arg25[%c0_27, %c0_28, %c0_29] : memref<4x8x8xbf16, #tpu.memory_space<vmem>>, vector<4x8x8xbf16>
    %c0_30 = arith.constant 0 : index
    %c0_31 = arith.constant 0 : index
    %c0_32 = arith.constant 0 : index
    %34 = vector.load %arg23[%c0_30, %c0_31, %c0_32] : memref<4x8x8xbf16, #tpu.memory_space<vmem>>, vector<4x8x8xbf16>
    %c0_33 = arith.constant 0 : index
    %c0_34 = arith.constant 0 : index
    %c0_35 = arith.constant 0 : index
    %35 = vector.load %arg24[%c0_33, %c0_34, %c0_35] : memref<4x8x8xbf16, #tpu.memory_space<vmem>>, vector<4x8x8xbf16>
    %cst_36 = arith.constant dense<0.000000e+00> : vector<4x8x8xf32>
    %36 = tpu.matmul %33, %34, %cst_36 {dimension_numbers = #tpu.dot_dimension_numbers<[2], [2], [1], [1], [0, 0, 0, 1, 1, 1], [0], [0]>} : vector<4x8x8xbf16>, vector<4x8x8xbf16>, vector<4x8x8xf32> -> vector<4x8x8xf32>
    %cst_37 = arith.constant dense<0xFF800000> : vector<4x8xf32>
    %37 = vector.multi_reduction <maximumf>, %36, %cst_37 [2] : vector<4x8x8xf32> to vector<4x8xf32>
    %38 = vector.shape_cast %37 : vector<4x8xf32> to vector<4x8x1xf32>
    %39 = vector.broadcast %38 : vector<4x8x1xf32> to vector<4x8x8xf32>
    %40 = arith.subf %36, %39 : vector<4x8x8xf32>
    %41 = math.exp %40 : vector<4x8x8xf32>
    %cst_38 = arith.constant dense<0.000000e+00> : vector<4x8xf32>
    %42 = vector.multi_reduction <add>, %41, %cst_38 [2] : vector<4x8x8xf32> to vector<4x8xf32>
    %43 = vector.shape_cast %42 : vector<4x8xf32> to vector<4x8x1xf32>
    %44 = tpu.reciprocal %43 {approx = true} : vector<4x8x1xf32> -> vector<4x8x1xf32>
    %45 = vector.broadcast %44 : vector<4x8x1xf32> to vector<4x8x8xf32>
    %46 = arith.mulf %41, %45 : vector<4x8x8xf32>
    %47 = arith.truncf %46 : vector<4x8x8xf32> to vector<4x8x8xbf16>
    %cst_39 = arith.constant dense<0.000000e+00> : vector<4x8x8xf32>
    %48 = tpu.matmul %47, %35, %cst_39 {dimension_numbers = #tpu.dot_dimension_numbers<[2], [1], [1], [2], [0, 0, 0, 1, 1, 2], [0], [0]>} : vector<4x8x8xbf16>, vector<4x8x8xbf16>, vector<4x8x8xf32> -> vector<4x8x8xf32>
    %49 = vector.extract_strided_slice %48 {offsets = [0, 0, 0], sizes = [1, 8, 8], strides = [1, 1, 1]} : vector<4x8x8xf32> to vector<1x8x8xf32>
    %50 = vector.shape_cast %49 : vector<1x8x8xf32> to vector<8x8xf32>
    %51 = arith.truncf %50 : vector<8x8xf32> to vector<8x8xbf16>
    %c0_40 = arith.constant 0 : index
    %c0_41 = arith.constant 0 : index
    %52 = vector.load %arg26[%c0_40, %c0_41] : memref<8x32xbf16, #tpu.memory_space<vmem>>, vector<8x8xbf16>
    tpu.vector_store %arg26[%c0_40, %c0_41], %51 {strides = array<i32>} : memref<8x32xbf16, #tpu.memory_space<vmem>>, vector<8x8xbf16>,
    %53 = vector.extract_strided_slice %48 {offsets = [1, 0, 0], sizes = [1, 8, 8], strides = [1, 1, 1]} : vector<4x8x8xf32> to vector<1x8x8xf32>
    %54 = vector.shape_cast %53 : vector<1x8x8xf32> to vector<8x8xf32>
    %55 = arith.truncf %54 : vector<8x8xf32> to vector<8x8xbf16>
    %c0_42 = arith.constant 0 : index
    %c8_43 = arith.constant 8 : index
    %56 = vector.load %arg26[%c0_42, %c8_43] : memref<8x32xbf16, #tpu.memory_space<vmem>>, vector<8x8xbf16>
    tpu.vector_store %arg26[%c0_42, %c8_43], %55 {strides = array<i32>} : memref<8x32xbf16, #tpu.memory_space<vmem>>, vector<8x8xbf16>,
    %57 = vector.extract_strided_slice %48 {offsets = [2, 0, 0], sizes = [1, 8, 8], strides = [1, 1, 1]} : vector<4x8x8xf32> to vector<1x8x8xf32>
    %58 = vector.shape_cast %57 : vector<1x8x8xf32> to vector<8x8xf32>
    %59 = arith.truncf %58 : vector<8x8xf32> to vector<8x8xbf16>
    %c0_44 = arith.constant 0 : index
    %c16_45 = arith.constant 16 : index
    %60 = vector.load %arg26[%c0_44, %c16_45] : memref<8x32xbf16, #tpu.memory_space<vmem>>, vector<8x8xbf16>
    tpu.vector_store %arg26[%c0_44, %c16_45], %59 {strides = array<i32>} : memref<8x32xbf16, #tpu.memory_space<vmem>>, vector<8x8xbf16>,
    %61 = vector.extract_strided_slice %48 {offsets = [3, 0, 0], sizes = [1, 8, 8], strides = [1, 1, 1]} : vector<4x8x8xf32> to vector<1x8x8xf32>
    %62 = vector.shape_cast %61 : vector<1x8x8xf32> to vector<8x8xf32>
    %63 = arith.truncf %62 : vector<8x8xf32> to vector<8x8xbf16>
    %c0_46 = arith.constant 0 : index
    %c24_47 = arith.constant 24 : index
    %64 = vector.load %arg26[%c0_46, %c24_47] : memref<8x32xbf16, #tpu.memory_space<vmem>>, vector<8x8xbf16>
    tpu.vector_store %arg26[%c0_46, %c24_47], %63 {strides = array<i32>} : memref<8x32xbf16, #tpu.memory_space<vmem>>, vector<8x8xbf16>,
    %c0_48 = arith.constant 0 : index
    %c0_49 = arith.constant 0 : index
    %65 = vector.load %arg26[%c0_48, %c0_49] : memref<8x32xbf16, #tpu.memory_space<vmem>>, vector<8x32xbf16>
    %c0_50 = arith.constant 0 : index
    %c0_51 = arith.constant 0 : index
    %66 = vector.load %arg8[%c0_50, %c0_51] : memref<32x32xbf16, #tpu.memory_space<vmem>>, vector<32x32xbf16>
    %cst_52 = arith.constant dense<0.000000e+00> : vector<8x32xf32>
    %67 = tpu.matmul %65, %66, %cst_52 {dimension_numbers = #tpu.dot_dimension_numbers<[1], [0], [0], [1], [0, 0, 1, 1], [], []>} : vector<8x32xbf16>, vector<32x32xbf16>, vector<8x32xf32> -> vector<8x32xf32>
    %c0_53 = arith.constant 0 : index
    %c0_54 = arith.constant 0 : index
    %68 = vector.load %arg9[%c0_53, %c0_54] : memref<1x32xf32, #tpu.memory_space<vmem>>, vector<1x32xf32>
    %69 = vector.broadcast %68 : vector<1x32xf32> to vector<8x32xf32>
    %70 = arith.addf %67, %69 : vector<8x32xf32>
    %71 = arith.addf %4, %70 : vector<8x32xf32>
    %c0_55 = arith.constant 0 : index
    %c0_56 = arith.constant 0 : index
    %72 = vector.load %arg10[%c0_55, %c0_56] : memref<1x32xf32, #tpu.memory_space<vmem>>, vector<1x32xf32>
    %c0_57 = arith.constant 0 : index
    %c0_58 = arith.constant 0 : index
    %73 = vector.load %arg11[%c0_57, %c0_58] : memref<1x32xf32, #tpu.memory_space<vmem>>, vector<1x32xf32>
    %cst_59 = arith.constant dense<0.000000e+00> : vector<8xf32>
    %74 = vector.multi_reduction <add>, %71, %cst_59 [1] : vector<8x32xf32> to vector<8xf32>
    %75 = vector.shape_cast %74 : vector<8xf32> to vector<8x1xf32>
    %cst_60 = arith.constant 3.200000e+01 : f32
    %76 = vector.broadcast %cst_60 : f32 to vector<8x1xf32>
    %77 = arith.divf %75, %76 : vector<8x1xf32>
    %78 = vector.broadcast %77 : vector<8x1xf32> to vector<8x32xf32>
    %79 = arith.subf %71, %78 : vector<8x32xf32>
    %80 = arith.mulf %79, %79 : vector<8x32xf32>
    %cst_61 = arith.constant dense<0.000000e+00> : vector<8xf32>
    %81 = vector.multi_reduction <add>, %80, %cst_61 [1] : vector<8x32xf32> to vector<8xf32>
    %82 = vector.shape_cast %81 : vector<8xf32> to vector<8x1xf32>
    %cst_62 = arith.constant 3.200000e+01 : f32
    %83 = vector.broadcast %cst_62 : f32 to vector<8x1xf32>
    %84 = arith.divf %82, %83 : vector<8x1xf32>
    %cst_63 = arith.constant 9.99999974E-6 : f32
    %85 = vector.broadcast %cst_63 : f32 to vector<8x1xf32>
    %86 = arith.addf %84, %85 : vector<8x1xf32>
    %87 = math.rsqrt %86 : vector<8x1xf32>
    %88 = vector.broadcast %87 : vector<8x1xf32> to vector<8x32xf32>
    %89 = arith.mulf %79, %88 : vector<8x32xf32>
    %90 = vector.broadcast %72 : vector<1x32xf32> to vector<8x32xf32>
    %91 = arith.mulf %89, %90 : vector<8x32xf32>
    %92 = vector.broadcast %73 : vector<1x32xf32> to vector<8x32xf32>
    %93 = arith.addf %91, %92 : vector<8x32xf32>
    %94 = arith.truncf %93 : vector<8x32xf32> to vector<8x32xbf16>
    %c0_64 = arith.constant 0 : index
    %c0_65 = arith.constant 0 : index
    %95 = vector.load %arg12[%c0_64, %c0_65] : memref<32x2048xbf16, #tpu.memory_space<vmem>>, vector<32x2048xbf16>
    %cst_66 = arith.constant dense<0.000000e+00> : vector<8x2048xf32>
    %96 = tpu.matmul %94, %95, %cst_66 {dimension_numbers = #tpu.dot_dimension_numbers<[1], [0], [0], [1], [0, 0, 1, 1], [], []>} : vector<8x32xbf16>, vector<32x2048xbf16>, vector<8x2048xf32> -> vector<8x2048xf32>
    %c0_67 = arith.constant 0 : index
    %c0_68 = arith.constant 0 : index
    %97 = vector.load %arg13[%c0_67, %c0_68] : memref<1x2048xf32, #tpu.memory_space<vmem>>, vector<1x2048xf32>
    %98 = vector.broadcast %97 : vector<1x2048xf32> to vector<8x2048xf32>
    %99 = arith.addf %96, %98 : vector<8x2048xf32>
    %cst_69 = arith.constant 0.000000e+00 : f32
    %100 = vector.broadcast %cst_69 : f32 to vector<8x2048xf32>
    %101 = arith.maximumf %99, %100 : vector<8x2048xf32>
    %102 = arith.truncf %101 : vector<8x2048xf32> to vector<8x2048xbf16>
    %c0_70 = arith.constant 0 : index
    %c0_71 = arith.constant 0 : index
    %103 = vector.load %arg14[%c0_70, %c0_71] : memref<2048x32xbf16, #tpu.memory_space<vmem>>, vector<2048x32xbf16>
    %cst_72 = arith.constant dense<0.000000e+00> : vector<8x32xf32>
    %104 = tpu.matmul %102, %103, %cst_72 {dimension_numbers = #tpu.dot_dimension_numbers<[1], [0], [0], [1], [0, 0, 1, 1], [], []>} : vector<8x2048xbf16>, vector<2048x32xbf16>, vector<8x32xf32> -> vector<8x32xf32>
    %c0_73 = arith.constant 0 : index
    %c0_74 = arith.constant 0 : index
    %105 = vector.load %arg15[%c0_73, %c0_74] : memref<1x32xf32, #tpu.memory_space<vmem>>, vector<1x32xf32>
    %106 = vector.broadcast %105 : vector<1x32xf32> to vector<8x32xf32>
    %107 = arith.addf %104, %106 : vector<8x32xf32>
    %108 = arith.addf %93, %107 : vector<8x32xf32>
    %c0_75 = arith.constant 0 : index
    %c0_76 = arith.constant 0 : index
    %109 = vector.load %arg16[%c0_75, %c0_76] : memref<1x32xf32, #tpu.memory_space<vmem>>, vector<1x32xf32>
    %c0_77 = arith.constant 0 : index
    %c0_78 = arith.constant 0 : index
    %110 = vector.load %arg17[%c0_77, %c0_78] : memref<1x32xf32, #tpu.memory_space<vmem>>, vector<1x32xf32>
    %cst_79 = arith.constant dense<0.000000e+00> : vector<8xf32>
    %111 = vector.multi_reduction <add>, %108, %cst_79 [1] : vector<8x32xf32> to vector<8xf32>
    %112 = vector.shape_cast %111 : vector<8xf32> to vector<8x1xf32>
    %cst_80 = arith.constant 3.200000e+01 : f32
    %113 = vector.broadcast %cst_80 : f32 to vector<8x1xf32>
    %114 = arith.divf %112, %113 : vector<8x1xf32>
    %115 = vector.broadcast %114 : vector<8x1xf32> to vector<8x32xf32>
    %116 = arith.subf %108, %115 : vector<8x32xf32>
    %117 = arith.mulf %116, %116 : vector<8x32xf32>
    %cst_81 = arith.constant dense<0.000000e+00> : vector<8xf32>
    %118 = vector.multi_reduction <add>, %117, %cst_81 [1] : vector<8x32xf32> to vector<8xf32>
    %119 = vector.shape_cast %118 : vector<8xf32> to vector<8x1xf32>
    %cst_82 = arith.constant 3.200000e+01 : f32
    %120 = vector.broadcast %cst_82 : f32 to vector<8x1xf32>
    %121 = arith.divf %119, %120 : vector<8x1xf32>
    %cst_83 = arith.constant 9.99999974E-6 : f32
    %122 = vector.broadcast %cst_83 : f32 to vector<8x1xf32>
    %123 = arith.addf %121, %122 : vector<8x1xf32>
    %124 = math.rsqrt %123 : vector<8x1xf32>
    %125 = vector.broadcast %124 : vector<8x1xf32> to vector<8x32xf32>
    %126 = arith.mulf %116, %125 : vector<8x32xf32>
    %127 = vector.broadcast %109 : vector<1x32xf32> to vector<8x32xf32>
    %128 = arith.mulf %126, %127 : vector<8x32xf32>
    %129 = vector.broadcast %110 : vector<1x32xf32> to vector<8x32xf32>
    %130 = arith.addf %128, %129 : vector<8x32xf32>
    %131 = arith.truncf %130 : vector<8x32xf32> to vector<8x32xbf16>
    %c0_84 = arith.constant 0 : index
    %c0_85 = arith.constant 0 : index
    %c0_86 = arith.constant 0 : index
    %132 = vector.load %arg20[%c0_84, %c0_85, %c0_86] : memref<1x8x32xbf16, #tpu.memory_space<vmem>>, vector<1x8x32xbf16>
    %133 = vector.shape_cast %132 : vector<1x8x32xbf16> to vector<8x32xbf16>
    %134 = vector.shape_cast %131 : vector<8x32xbf16> to vector<1x8x32xbf16>
    tpu.vector_store %arg20[%c0_84, %c0_85, %c0_86], %134 {strides = array<i32>} : memref<1x8x32xbf16, #tpu.memory_space<vmem>>, vector<1x8x32xbf16>,
    return
  }
  func.func @transform_0(%arg0: i32, %arg1: i32) -> (i32, i32, i32) {
    %c0_i32 = arith.constant 0 : i32
    %c0_i32_0 = arith.constant 0 : i32
    %c0_i32_1 = arith.constant 0 : i32
    return %arg0, %c0_i32, %c0_i32_0 : i32, i32, i32
  }
  func.func @transform_1(%arg0: i32, %arg1: i32) -> (i32, i32, i32) {
    %c0_i32 = arith.constant 0 : i32
    %c0_i32_0 = arith.constant 0 : i32
    return %arg0, %arg1, %c0_i32 : i32, i32, i32
  }
  func.func @transform_2(%arg0: i32, %arg1: i32) -> (i32, i32) {
    %c0_i32 = arith.constant 0 : i32
    %c0_i32_0 = arith.constant 0 : i32
    %c0_i32_1 = arith.constant 0 : i32
    return %c0_i32, %c0_i32_0 : i32, i32
  }
  func.func @transform_3(%arg0: i32, %arg1: i32) -> (i32, i32) {
    %c0_i32 = arith.constant 0 : i32
    %c0_i32_0 = arith.constant 0 : i32
    %c0_i32_1 = arith.constant 0 : i32
    return %c0_i32, %c0_i32_0 : i32, i32
  }
  func.func @transform_4(%arg0: i32, %arg1: i32) -> (i32, i32) {
    %c0_i32 = arith.constant 0 : i32
    %c0_i32_0 = arith.constant 0 : i32
    %c0_i32_1 = arith.constant 0 : i32
    return %c0_i32, %c0_i32_0 : i32, i32
  }
  func.func @transform_5(%arg0: i32, %arg1: i32) -> (i32, i32) {
    %c0_i32 = arith.constant 0 : i32
    %c0_i32_0 = arith.constant 0 : i32
    %c0_i32_1 = arith.constant 0 : i32
    return %c0_i32, %c0_i32_0 : i32, i32
  }
  func.func @transform_6(%arg0: i32, %arg1: i32) -> (i32, i32) {
    %c0_i32 = arith.constant 0 : i32
    %c0_i32_0 = arith.constant 0 : i32
    %c0_i32_1 = arith.constant 0 : i32
    return %c0_i32, %c0_i32_0 : i32, i32
  }
  func.func @transform_7(%arg0: i32, %arg1: i32) -> (i32, i32) {
    %c0_i32 = arith.constant 0 : i32
    %c0_i32_0 = arith.constant 0 : i32
    %c0_i32_1 = arith.constant 0 : i32
    return %c0_i32, %c0_i32_0 : i32, i32
  }
  func.func @transform_8(%arg0: i32, %arg1: i32) -> (i32, i32) {
    %c0_i32 = arith.constant 0 : i32
    %c0_i32_0 = arith.constant 0 : i32
    %c0_i32_1 = arith.constant 0 : i32
    return %c0_i32, %c0_i32_0 : i32, i32
  }
  func.func @transform_9(%arg0: i32, %arg1: i32) -> (i32, i32) {
    %c0_i32 = arith.constant 0 : i32
    %c0_i32_0 = arith.constant 0 : i32
    %c0_i32_1 = arith.constant 0 : i32
    return %c0_i32, %c0_i32_0 : i32, i32
  }
  func.func @transform_10(%arg0: i32, %arg1: i32) -> (i32, i32) {
    %c0_i32 = arith.constant 0 : i32
    %c0_i32_0 = arith.constant 0 : i32
    %c0_i32_1 = arith.constant 0 : i32
    return %c0_i32, %c0_i32_0 : i32, i32
  }
  func.func @transform_11(%arg0: i32, %arg1: i32) -> (i32, i32) {
    %c0_i32 = arith.constant 0 : i32
    %c0_i32_0 = arith.constant 0 : i32
    %c0_i32_1 = arith.constant 0 : i32
    return %c0_i32, %c0_i32_0 : i32, i32
  }
  func.func @transform_12(%arg0: i32, %arg1: i32) -> (i32, i32) {
    %c0_i32 = arith.constant 0 : i32
    %c0_i32_0 = arith.constant 0 : i32
    %c0_i32_1 = arith.constant 0 : i32
    return %c0_i32, %c0_i32_0 : i32, i32
  }
  func.func @transform_13(%arg0: i32, %arg1: i32) -> (i32, i32) {
    %c0_i32 = arith.constant 0 : i32
    %c0_i32_0 = arith.constant 0 : i32
    %c0_i32_1 = arith.constant 0 : i32
    return %c0_i32, %c0_i32_0 : i32, i32
  }
  func.func @transform_14(%arg0: i32, %arg1: i32) -> (i32, i32) {
    %c0_i32 = arith.constant 0 : i32
    %c0_i32_0 = arith.constant 0 : i32
    %c0_i32_1 = arith.constant 0 : i32
    return %c0_i32, %c0_i32_0 : i32, i32
  }
  func.func @transform_15(%arg0: i32, %arg1: i32) -> (i32, i32) {
    %c0_i32 = arith.constant 0 : i32
    %c0_i32_0 = arith.constant 0 : i32
    %c0_i32_1 = arith.constant 0 : i32
    return %c0_i32, %c0_i32_0 : i32, i32
  }
  func.func @transform_16(%arg0: i32, %arg1: i32) -> (i32, i32) {
    %c0_i32 = arith.constant 0 : i32
    %c0_i32_0 = arith.constant 0 : i32
    %c0_i32_1 = arith.constant 0 : i32
    return %c0_i32, %c0_i32_0 : i32, i32
  }
  func.func @transform_17(%arg0: i32, %arg1: i32) -> (i32, i32) {
    %c0_i32 = arith.constant 0 : i32
    %c0_i32_0 = arith.constant 0 : i32
    %c0_i32_1 = arith.constant 0 : i32
    return %c0_i32, %c0_i32_0 : i32, i32
  }
  func.func @transform_18(%arg0: i32, %arg1: i32) -> (i32, i32, i32) {
    %c0_i32 = arith.constant 0 : i32
    %c0_i32_0 = arith.constant 0 : i32
    return %arg0, %arg1, %c0_i32 : i32, i32, i32
  }
}

module attributes {stable_mosaic.version = 11 : i64} {
  func.func @_layer_kernel(%arg0: i32, %arg1: i32, %arg2: memref<1x8x32xbf16, #tpu.memory_space<vmem>>, %arg3: memref<1x8x32xbf16, #tpu.memory_space<vmem>>, %arg4: memref<32x32xbf16, #tpu.memory_space<vmem>>, %arg5: memref<1x32xf32, #tpu.memory_space<vmem>>, %arg6: memref<32x64xbf16, #tpu.memory_space<vmem>>, %arg7: memref<1x64xf32, #tpu.memory_space<vmem>>, %arg8: memref<32x32xbf16, #tpu.memory_space<vmem>>, %arg9: memref<1x32xf32, #tpu.memory_space<vmem>>, %arg10: memref<1x32xf32, #tpu.memory_space<vmem>>, %arg11: memref<1x32xf32, #tpu.memory_space<vmem>>, %arg12: memref<32x2048xbf16, #tpu.memory_space<vmem>>, %arg13: memref<1x2048xf32, #tpu.memory_space<vmem>>, %arg14: memref<2048x32xbf16, #tpu.memory_space<vmem>>, %arg15: memref<1x32xf32, #tpu.memory_space<vmem>>, %arg16: memref<1x32xf32, #tpu.memory_space<vmem>>, %arg17: memref<1x32xf32, #tpu.memory_space<vmem>>, %arg18: memref<1x32xf32, #tpu.memory_space<vmem>>, %arg19: memref<1x32xf32, #tpu.memory_space<vmem>>, %arg20: memref<1x8x32xf32, #tpu.memory_space<vmem>>, %arg21: memref<8x64xbf16, #tpu.memory_space<vmem>>, %arg22: memref<8x32xbf16, #tpu.memory_space<vmem>>, %arg23: memref<4x8x8xbf16, #tpu.memory_space<vmem>>, %arg24: memref<4x8x8xbf16, #tpu.memory_space<vmem>>, %arg25: memref<4x8x8xbf16, #tpu.memory_space<vmem>>, %arg26: memref<8x32xbf16, #tpu.memory_space<vmem>>) attributes {dimension_semantics = [#tpu.dimension_semantics<parallel>, #tpu.dimension_semantics<arbitrary>], iteration_bounds = array<i64: 2, 1>, scalar_prefetch = 0 : i64, scratch_operands = 6 : i64, tpu.core_type = #tpu.core_type<tc>, window_params = [{transform_indices = @transform_0, window_bounds = array<i64: 1, 8, 32>}, {transform_indices = @transform_1, window_bounds = array<i64: 1, 8, 32>}, {pipeline_mode = #tpu.pipeline_mode<synchronous>, transform_indices = @transform_2, window_bounds = array<i64: 32, 32>}, {pipeline_mode = #tpu.pipeline_mode<synchronous>, transform_indices = @transform_3, window_bounds = array<i64: 1, 32>}, {pipeline_mode = #tpu.pipeline_mode<synchronous>, transform_indices = @transform_4, window_bounds = array<i64: 32, 64>}, {pipeline_mode = #tpu.pipeline_mode<synchronous>, transform_indices = @transform_5, window_bounds = array<i64: 1, 64>}, {pipeline_mode = #tpu.pipeline_mode<synchronous>, transform_indices = @transform_6, window_bounds = array<i64: 32, 32>}, {pipeline_mode = #tpu.pipeline_mode<synchronous>, transform_indices = @transform_7, window_bounds = array<i64: 1, 32>}, {pipeline_mode = #tpu.pipeline_mode<synchronous>, transform_indices = @transform_8, window_bounds = array<i64: 1, 32>}, {pipeline_mode = #tpu.pipeline_mode<synchronous>, transform_indices = @transform_9, window_bounds = array<i64: 1, 32>}, {pipeline_mode = #tpu.pipeline_mode<synchronous>, transform_indices = @transform_10, window_bounds = array<i64: 32, 2048>}, {pipeline_mode = #tpu.pipeline_mode<synchronous>, transform_indices = @transform_11, window_bounds = array<i64: 1, 2048>}, {pipeline_mode = #tpu.pipeline_mode<synchronous>, transform_indices = @transform_12, window_bounds = array<i64: 2048, 32>}, {pipeline_mode = #tpu.pipeline_mode<synchronous>, transform_indices = @transform_13, window_bounds = array<i64: 1, 32>}, {pipeline_mode = #tpu.pipeline_mode<synchronous>, transform_indices = @transform_14, window_bounds = array<i64: 1, 32>}, {pipeline_mode = #tpu.pipeline_mode<synchronous>, transform_indices = @transform_15, window_bounds = array<i64: 1, 32>}, {pipeline_mode = #tpu.pipeline_mode<synchronous>, transform_indices = @transform_16, window_bounds = array<i64: 1, 32>}, {pipeline_mode = #tpu.pipeline_mode<synchronous>, transform_indices = @transform_17, window_bounds = array<i64: 1, 32>}, {transform_indices = @transform_18, window_bounds = array<i64: 1, 8, 32>}]} {
    %c0_i32 = arith.constant 0 : i32
    %0 = arith.cmpi eq, %arg1, %c0_i32 : i32
    %1 = arith.extui %0 : i1 to i32
    %c0_i32_0 = arith.constant 0 : i32
    %2 = arith.cmpi ne, %1, %c0_i32_0 : i32
    scf.if %2 {
      %c0_96 = arith.constant 0 : index
      %c0_97 = arith.constant 0 : index
      %c0_98 = arith.constant 0 : index
      %156 = vector.load %arg2[%c0_96, %c0_97, %c0_98] : memref<1x8x32xbf16, #tpu.memory_space<vmem>>, vector<1x8x32xbf16>
      %157 = vector.shape_cast %156 : vector<1x8x32xbf16> to vector<8x32xbf16>
      %c0_99 = arith.constant 0 : index
      %c0_100 = arith.constant 0 : index
      %158 = vector.load %arg6[%c0_99, %c0_100] : memref<32x64xbf16, #tpu.memory_space<vmem>>, vector<32x64xbf16>
      %cst_101 = arith.constant dense<0.000000e+00> : vector<8x64xf32>
      %159 = tpu.matmul %157, %158, %cst_101 {dimension_numbers = #tpu.dot_dimension_numbers<[1], [0], [0], [1], [0, 0, 1, 1], [], []>} : vector<8x32xbf16>, vector<32x64xbf16>, vector<8x64xf32> -> vector<8x64xf32>
      %c0_102 = arith.constant 0 : index
      %c0_103 = arith.constant 0 : index
      %160 = vector.load %arg7[%c0_102, %c0_103] : memref<1x64xf32, #tpu.memory_space<vmem>>, vector<1x64xf32>
      %161 = vector.broadcast %160 : vector<1x64xf32> to vector<8x64xf32>
      %162 = arith.addf %159, %161 : vector<8x64xf32>
      %163 = arith.truncf %162 : vector<8x64xf32> to vector<8x64xbf16>
      %c0_104 = arith.constant 0 : index
      %c0_105 = arith.constant 0 : index
      %164 = vector.load %arg21[%c0_104, %c0_105] : memref<8x64xbf16, #tpu.memory_space<vmem>>, vector<8x64xbf16>
      tpu.vector_store %arg21[%c0_104, %c0_105], %163 {strides = array<i32>} : memref<8x64xbf16, #tpu.memory_space<vmem>>, vector<8x64xbf16>,
      %c0_106 = arith.constant 0 : index
      %c0_107 = arith.constant 0 : index
      %165 = vector.load %arg21[%c0_106, %c0_107] : memref<8x64xbf16, #tpu.memory_space<vmem>>, vector<8x8xbf16>
      %c0_108 = arith.constant 0 : index
      %c0_109 = arith.constant 0 : index
      %c0_110 = arith.constant 0 : index
      %166 = vector.load %arg23[%c0_108, %c0_109, %c0_110] : memref<4x8x8xbf16, #tpu.memory_space<vmem>>, vector<1x8x8xbf16>
      %167 = vector.shape_cast %166 : vector<1x8x8xbf16> to vector<8x8xbf16>
      %168 = vector.shape_cast %165 : vector<8x8xbf16> to vector<1x8x8xbf16>
      tpu.vector_store %arg23[%c0_108, %c0_109, %c0_110], %168 {strides = array<i32>} : memref<4x8x8xbf16, #tpu.memory_space<vmem>>, vector<1x8x8xbf16>,
      %c0_111 = arith.constant 0 : index
      %c32 = arith.constant 32 : index
      %169 = vector.load %arg21[%c0_111, %c32] : memref<8x64xbf16, #tpu.memory_space<vmem>>, vector<8x8xbf16>
      %c0_112 = arith.constant 0 : index
      %c0_113 = arith.constant 0 : index
      %c0_114 = arith.constant 0 : index
      %170 = vector.load %arg24[%c0_112, %c0_113, %c0_114] : memref<4x8x8xbf16, #tpu.memory_space<vmem>>, vector<1x8x8xbf16>
      %171 = vector.shape_cast %170 : vector<1x8x8xbf16> to vector<8x8xbf16>
      %172 = vector.shape_cast %169 : vector<8x8xbf16> to vector<1x8x8xbf16>
      tpu.vector_store %arg24[%c0_112, %c0_113, %c0_114], %172 {strides = array<i32>} : memref<4x8x8xbf16, #tpu.memory_space<vmem>>, vector<1x8x8xbf16>,
      %c0_115 = arith.constant 0 : index
      %c8_116 = arith.constant 8 : index
      %173 = vector.load %arg21[%c0_115, %c8_116] : memref<8x64xbf16, #tpu.memory_space<vmem>>, vector<8x8xbf16>
      %c1_117 = arith.constant 1 : index
      %c0_118 = arith.constant 0 : index
      %c0_119 = arith.constant 0 : index
      %174 = vector.load %arg23[%c1_117, %c0_118, %c0_119] : memref<4x8x8xbf16, #tpu.memory_space<vmem>>, vector<1x8x8xbf16>
      %175 = vector.shape_cast %174 : vector<1x8x8xbf16> to vector<8x8xbf16>
      %176 = vector.shape_cast %173 : vector<8x8xbf16> to vector<1x8x8xbf16>
      tpu.vector_store %arg23[%c1_117, %c0_118, %c0_119], %176 {strides = array<i32>} : memref<4x8x8xbf16, #tpu.memory_space<vmem>>, vector<1x8x8xbf16>,
      %c0_120 = arith.constant 0 : index
      %c40 = arith.constant 40 : index
      %177 = vector.load %arg21[%c0_120, %c40] : memref<8x64xbf16, #tpu.memory_space<vmem>>, vector<8x8xbf16>
      %c1_121 = arith.constant 1 : index
      %c0_122 = arith.constant 0 : index
      %c0_123 = arith.constant 0 : index
      %178 = vector.load %arg24[%c1_121, %c0_122, %c0_123] : memref<4x8x8xbf16, #tpu.memory_space<vmem>>, vector<1x8x8xbf16>
      %179 = vector.shape_cast %178 : vector<1x8x8xbf16> to vector<8x8xbf16>
      %180 = vector.shape_cast %177 : vector<8x8xbf16> to vector<1x8x8xbf16>
      tpu.vector_store %arg24[%c1_121, %c0_122, %c0_123], %180 {strides = array<i32>} : memref<4x8x8xbf16, #tpu.memory_space<vmem>>, vector<1x8x8xbf16>,
      %c0_124 = arith.constant 0 : index
      %c16_125 = arith.constant 16 : index
      %181 = vector.load %arg21[%c0_124, %c16_125] : memref<8x64xbf16, #tpu.memory_space<vmem>>, vector<8x8xbf16>
      %c2_126 = arith.constant 2 : index
      %c0_127 = arith.constant 0 : index
      %c0_128 = arith.constant 0 : index
      %182 = vector.load %arg23[%c2_126, %c0_127, %c0_128] : memref<4x8x8xbf16, #tpu.memory_space<vmem>>, vector<1x8x8xbf16>
      %183 = vector.shape_cast %182 : vector<1x8x8xbf16> to vector<8x8xbf16>
      %184 = vector.shape_cast %181 : vector<8x8xbf16> to vector<1x8x8xbf16>
      tpu.vector_store %arg23[%c2_126, %c0_127, %c0_128], %184 {strides = array<i32>} : memref<4x8x8xbf16, #tpu.memory_space<vmem>>, vector<1x8x8xbf16>,
      %c0_129 = arith.constant 0 : index
      %c48 = arith.constant 48 : index
      %185 = vector.load %arg21[%c0_129, %c48] : memref<8x64xbf16, #tpu.memory_space<vmem>>, vector<8x8xbf16>
      %c2_130 = arith.constant 2 : index
      %c0_131 = arith.constant 0 : index
      %c0_132 = arith.constant 0 : index
      %186 = vector.load %arg24[%c2_130, %c0_131, %c0_132] : memref<4x8x8xbf16, #tpu.memory_space<vmem>>, vector<1x8x8xbf16>
      %187 = vector.shape_cast %186 : vector<1x8x8xbf16> to vector<8x8xbf16>
      %188 = vector.shape_cast %185 : vector<8x8xbf16> to vector<1x8x8xbf16>
      tpu.vector_store %arg24[%c2_130, %c0_131, %c0_132], %188 {strides = array<i32>} : memref<4x8x8xbf16, #tpu.memory_space<vmem>>, vector<1x8x8xbf16>,
      %c0_133 = arith.constant 0 : index
      %c24_134 = arith.constant 24 : index
      %189 = vector.load %arg21[%c0_133, %c24_134] : memref<8x64xbf16, #tpu.memory_space<vmem>>, vector<8x8xbf16>
      %c3_135 = arith.constant 3 : index
      %c0_136 = arith.constant 0 : index
      %c0_137 = arith.constant 0 : index
      %190 = vector.load %arg23[%c3_135, %c0_136, %c0_137] : memref<4x8x8xbf16, #tpu.memory_space<vmem>>, vector<1x8x8xbf16>
      %191 = vector.shape_cast %190 : vector<1x8x8xbf16> to vector<8x8xbf16>
      %192 = vector.shape_cast %189 : vector<8x8xbf16> to vector<1x8x8xbf16>
      tpu.vector_store %arg23[%c3_135, %c0_136, %c0_137], %192 {strides = array<i32>} : memref<4x8x8xbf16, #tpu.memory_space<vmem>>, vector<1x8x8xbf16>,
      %c0_138 = arith.constant 0 : index
      %c56 = arith.constant 56 : index
      %193 = vector.load %arg21[%c0_138, %c56] : memref<8x64xbf16, #tpu.memory_space<vmem>>, vector<8x8xbf16>
      %c3_139 = arith.constant 3 : index
      %c0_140 = arith.constant 0 : index
      %c0_141 = arith.constant 0 : index
      %194 = vector.load %arg24[%c3_139, %c0_140, %c0_141] : memref<4x8x8xbf16, #tpu.memory_space<vmem>>, vector<1x8x8xbf16>
      %195 = vector.shape_cast %194 : vector<1x8x8xbf16> to vector<8x8xbf16>
      %196 = vector.shape_cast %193 : vector<8x8xbf16> to vector<1x8x8xbf16>
      tpu.vector_store %arg24[%c3_139, %c0_140, %c0_141], %196 {strides = array<i32>} : memref<4x8x8xbf16, #tpu.memory_space<vmem>>, vector<1x8x8xbf16>,
    } else {
    }
    %c0 = arith.constant 0 : index
    %c0_1 = arith.constant 0 : index
    %c0_2 = arith.constant 0 : index
    %3 = vector.load %arg3[%c0, %c0_1, %c0_2] : memref<1x8x32xbf16, #tpu.memory_space<vmem>>, vector<1x8x32xbf16>
    %4 = vector.shape_cast %3 : vector<1x8x32xbf16> to vector<8x32xbf16>
    %5 = arith.extf %4 : vector<8x32xbf16> to vector<8x32xf32>
    %c0_3 = arith.constant 0 : index
    %c0_4 = arith.constant 0 : index
    %c0_5 = arith.constant 0 : index
    %6 = vector.load %arg3[%c0_3, %c0_4, %c0_5] : memref<1x8x32xbf16, #tpu.memory_space<vmem>>, vector<1x8x32xbf16>
    %7 = vector.shape_cast %6 : vector<1x8x32xbf16> to vector<8x32xbf16>
    %c0_6 = arith.constant 0 : index
    %c0_7 = arith.constant 0 : index
    %8 = vector.load %arg4[%c0_6, %c0_7] : memref<32x32xbf16, #tpu.memory_space<vmem>>, vector<32x32xbf16>
    %cst = arith.constant dense<0.000000e+00> : vector<8x32xf32>
    %9 = tpu.matmul %7, %8, %cst {dimension_numbers = #tpu.dot_dimension_numbers<[1], [0], [0], [1], [0, 0, 1, 1], [], []>} : vector<8x32xbf16>, vector<32x32xbf16>, vector<8x32xf32> -> vector<8x32xf32>
    %c0_8 = arith.constant 0 : index
    %c0_9 = arith.constant 0 : index
    %10 = vector.load %arg5[%c0_8, %c0_9] : memref<1x32xf32, #tpu.memory_space<vmem>>, vector<1x32xf32>
    %11 = vector.broadcast %10 : vector<1x32xf32> to vector<8x32xf32>
    %12 = arith.addf %9, %11 : vector<8x32xf32>
    %cst_10 = arith.constant 0.353553385 : f32
    %13 = vector.broadcast %cst_10 : f32 to vector<8x32xf32>
    %14 = arith.mulf %12, %13 : vector<8x32xf32>
    %15 = arith.truncf %14 : vector<8x32xf32> to vector<8x32xbf16>
    %c0_11 = arith.constant 0 : index
    %c0_12 = arith.constant 0 : index
    %16 = vector.load %arg22[%c0_11, %c0_12] : memref<8x32xbf16, #tpu.memory_space<vmem>>, vector<8x32xbf16>
    tpu.vector_store %arg22[%c0_11, %c0_12], %15 {strides = array<i32>} : memref<8x32xbf16, #tpu.memory_space<vmem>>, vector<8x32xbf16>,
    %c0_13 = arith.constant 0 : index
    %c0_14 = arith.constant 0 : index
    %17 = vector.load %arg22[%c0_13, %c0_14] : memref<8x32xbf16, #tpu.memory_space<vmem>>, vector<8x8xbf16>
    %c0_15 = arith.constant 0 : index
    %c0_16 = arith.constant 0 : index
    %c0_17 = arith.constant 0 : index
    %18 = vector.load %arg25[%c0_15, %c0_16, %c0_17] : memref<4x8x8xbf16, #tpu.memory_space<vmem>>, vector<1x8x8xbf16>
    %19 = vector.shape_cast %18 : vector<1x8x8xbf16> to vector<8x8xbf16>
    %20 = vector.shape_cast %17 : vector<8x8xbf16> to vector<1x8x8xbf16>
    tpu.vector_store %arg25[%c0_15, %c0_16, %c0_17], %20 {strides = array<i32>} : memref<4x8x8xbf16, #tpu.memory_space<vmem>>, vector<1x8x8xbf16>,
    %c0_18 = arith.constant 0 : index
    %c8 = arith.constant 8 : index
    %21 = vector.load %arg22[%c0_18, %c8] : memref<8x32xbf16, #tpu.memory_space<vmem>>, vector<8x8xbf16>
    %c1 = arith.constant 1 : index
    %c0_19 = arith.constant 0 : index
    %c0_20 = arith.constant 0 : index
    %22 = vector.load %arg25[%c1, %c0_19, %c0_20] : memref<4x8x8xbf16, #tpu.memory_space<vmem>>, vector<1x8x8xbf16>
    %23 = vector.shape_cast %22 : vector<1x8x8xbf16> to vector<8x8xbf16>
    %24 = vector.shape_cast %21 : vector<8x8xbf16> to vector<1x8x8xbf16>
    tpu.vector_store %arg25[%c1, %c0_19, %c0_20], %24 {strides = array<i32>} : memref<4x8x8xbf16, #tpu.memory_space<vmem>>, vector<1x8x8xbf16>,
    %c0_21 = arith.constant 0 : index
    %c16 = arith.constant 16 : index
    %25 = vector.load %arg22[%c0_21, %c16] : memref<8x32xbf16, #tpu.memory_space<vmem>>, vector<8x8xbf16>
    %c2 = arith.constant 2 : index
    %c0_22 = arith.constant 0 : index
    %c0_23 = arith.constant 0 : index
    %26 = vector.load %arg25[%c2, %c0_22, %c0_23] : memref<4x8x8xbf16, #tpu.memory_space<vmem>>, vector<1x8x8xbf16>
    %27 = vector.shape_cast %26 : vector<1x8x8xbf16> to vector<8x8xbf16>
    %28 = vector.shape_cast %25 : vector<8x8xbf16> to vector<1x8x8xbf16>
    tpu.vector_store %arg25[%c2, %c0_22, %c0_23], %28 {strides = array<i32>} : memref<4x8x8xbf16, #tpu.memory_space<vmem>>, vector<1x8x8xbf16>,
    %c0_24 = arith.constant 0 : index
    %c24 = arith.constant 24 : index
    %29 = vector.load %arg22[%c0_24, %c24] : memref<8x32xbf16, #tpu.memory_space<vmem>>, vector<8x8xbf16>
    %c3 = arith.constant 3 : index
    %c0_25 = arith.constant 0 : index
    %c0_26 = arith.constant 0 : index
    %30 = vector.load %arg25[%c3, %c0_25, %c0_26] : memref<4x8x8xbf16, #tpu.memory_space<vmem>>, vector<1x8x8xbf16>
    %31 = vector.shape_cast %30 : vector<1x8x8xbf16> to vector<8x8xbf16>
    %32 = vector.shape_cast %29 : vector<8x8xbf16> to vector<1x8x8xbf16>
    tpu.vector_store %arg25[%c3, %c0_25, %c0_26], %32 {strides = array<i32>} : memref<4x8x8xbf16, #tpu.memory_space<vmem>>, vector<1x8x8xbf16>,
    %c0_27 = arith.constant 0 : index
    %c0_28 = arith.constant 0 : index
    %c0_29 = arith.constant 0 : index
    %33 = vector.load %arg25[%c0_27, %c0_28, %c0_29] : memref<4x8x8xbf16, #tpu.memory_space<vmem>>, vector<4x8x8xbf16>
    %c0_30 = arith.constant 0 : index
    %c0_31 = arith.constant 0 : index
    %c0_32 = arith.constant 0 : index
    %34 = vector.load %arg23[%c0_30, %c0_31, %c0_32] : memref<4x8x8xbf16, #tpu.memory_space<vmem>>, vector<4x8x8xbf16>
    %c0_33 = arith.constant 0 : index
    %c0_34 = arith.constant 0 : index
    %c0_35 = arith.constant 0 : index
    %35 = vector.load %arg24[%c0_33, %c0_34, %c0_35] : memref<4x8x8xbf16, #tpu.memory_space<vmem>>, vector<4x8x8xbf16>
    %cst_36 = arith.constant dense<0.000000e+00> : vector<4x8x8xf32>
    %36 = tpu.matmul %33, %34, %cst_36 {dimension_numbers = #tpu.dot_dimension_numbers<[2], [2], [1], [1], [0, 0, 0, 1, 1, 1], [0], [0]>} : vector<4x8x8xbf16>, vector<4x8x8xbf16>, vector<4x8x8xf32> -> vector<4x8x8xf32>
    %cst_37 = arith.constant dense<0xFF800000> : vector<4x8xf32>
    %37 = vector.multi_reduction <maximumf>, %36, %cst_37 [2] : vector<4x8x8xf32> to vector<4x8xf32>
    %38 = vector.shape_cast %37 : vector<4x8xf32> to vector<4x8x1xf32>
    %39 = vector.broadcast %38 : vector<4x8x1xf32> to vector<4x8x8xf32>
    %40 = arith.subf %36, %39 : vector<4x8x8xf32>
    %41 = math.exp %40 : vector<4x8x8xf32>
    %cst_38 = arith.constant dense<0.000000e+00> : vector<4x8xf32>
    %42 = vector.multi_reduction <add>, %41, %cst_38 [2] : vector<4x8x8xf32> to vector<4x8xf32>
    %43 = vector.shape_cast %42 : vector<4x8xf32> to vector<4x8x1xf32>
    %44 = tpu.reciprocal %43 {approx = true} : vector<4x8x1xf32> -> vector<4x8x1xf32>
    %45 = vector.broadcast %44 : vector<4x8x1xf32> to vector<4x8x8xf32>
    %46 = arith.mulf %41, %45 : vector<4x8x8xf32>
    %47 = arith.truncf %46 : vector<4x8x8xf32> to vector<4x8x8xbf16>
    %cst_39 = arith.constant dense<0.000000e+00> : vector<4x8x8xf32>
    %48 = tpu.matmul %47, %35, %cst_39 {dimension_numbers = #tpu.dot_dimension_numbers<[2], [1], [1], [2], [0, 0, 0, 1, 1, 2], [0], [0]>} : vector<4x8x8xbf16>, vector<4x8x8xbf16>, vector<4x8x8xf32> -> vector<4x8x8xf32>
    %49 = vector.extract_strided_slice %48 {offsets = [0, 0, 0], sizes = [1, 8, 8], strides = [1, 1, 1]} : vector<4x8x8xf32> to vector<1x8x8xf32>
    %50 = vector.shape_cast %49 : vector<1x8x8xf32> to vector<8x8xf32>
    %51 = arith.truncf %50 : vector<8x8xf32> to vector<8x8xbf16>
    %c0_40 = arith.constant 0 : index
    %c0_41 = arith.constant 0 : index
    %52 = vector.load %arg26[%c0_40, %c0_41] : memref<8x32xbf16, #tpu.memory_space<vmem>>, vector<8x8xbf16>
    tpu.vector_store %arg26[%c0_40, %c0_41], %51 {strides = array<i32>} : memref<8x32xbf16, #tpu.memory_space<vmem>>, vector<8x8xbf16>,
    %53 = vector.extract_strided_slice %48 {offsets = [1, 0, 0], sizes = [1, 8, 8], strides = [1, 1, 1]} : vector<4x8x8xf32> to vector<1x8x8xf32>
    %54 = vector.shape_cast %53 : vector<1x8x8xf32> to vector<8x8xf32>
    %55 = arith.truncf %54 : vector<8x8xf32> to vector<8x8xbf16>
    %c0_42 = arith.constant 0 : index
    %c8_43 = arith.constant 8 : index
    %56 = vector.load %arg26[%c0_42, %c8_43] : memref<8x32xbf16, #tpu.memory_space<vmem>>, vector<8x8xbf16>
    tpu.vector_store %arg26[%c0_42, %c8_43], %55 {strides = array<i32>} : memref<8x32xbf16, #tpu.memory_space<vmem>>, vector<8x8xbf16>,
    %57 = vector.extract_strided_slice %48 {offsets = [2, 0, 0], sizes = [1, 8, 8], strides = [1, 1, 1]} : vector<4x8x8xf32> to vector<1x8x8xf32>
    %58 = vector.shape_cast %57 : vector<1x8x8xf32> to vector<8x8xf32>
    %59 = arith.truncf %58 : vector<8x8xf32> to vector<8x8xbf16>
    %c0_44 = arith.constant 0 : index
    %c16_45 = arith.constant 16 : index
    %60 = vector.load %arg26[%c0_44, %c16_45] : memref<8x32xbf16, #tpu.memory_space<vmem>>, vector<8x8xbf16>
    tpu.vector_store %arg26[%c0_44, %c16_45], %59 {strides = array<i32>} : memref<8x32xbf16, #tpu.memory_space<vmem>>, vector<8x8xbf16>,
    %61 = vector.extract_strided_slice %48 {offsets = [3, 0, 0], sizes = [1, 8, 8], strides = [1, 1, 1]} : vector<4x8x8xf32> to vector<1x8x8xf32>
    %62 = vector.shape_cast %61 : vector<1x8x8xf32> to vector<8x8xf32>
    %63 = arith.truncf %62 : vector<8x8xf32> to vector<8x8xbf16>
    %c0_46 = arith.constant 0 : index
    %c24_47 = arith.constant 24 : index
    %64 = vector.load %arg26[%c0_46, %c24_47] : memref<8x32xbf16, #tpu.memory_space<vmem>>, vector<8x8xbf16>
    tpu.vector_store %arg26[%c0_46, %c24_47], %63 {strides = array<i32>} : memref<8x32xbf16, #tpu.memory_space<vmem>>, vector<8x8xbf16>,
    %c0_48 = arith.constant 0 : index
    %c0_49 = arith.constant 0 : index
    %65 = vector.load %arg26[%c0_48, %c0_49] : memref<8x32xbf16, #tpu.memory_space<vmem>>, vector<8x32xbf16>
    %c0_50 = arith.constant 0 : index
    %c0_51 = arith.constant 0 : index
    %66 = vector.load %arg8[%c0_50, %c0_51] : memref<32x32xbf16, #tpu.memory_space<vmem>>, vector<32x32xbf16>
    %cst_52 = arith.constant dense<0.000000e+00> : vector<8x32xf32>
    %67 = tpu.matmul %65, %66, %cst_52 {dimension_numbers = #tpu.dot_dimension_numbers<[1], [0], [0], [1], [0, 0, 1, 1], [], []>} : vector<8x32xbf16>, vector<32x32xbf16>, vector<8x32xf32> -> vector<8x32xf32>
    %c0_53 = arith.constant 0 : index
    %c0_54 = arith.constant 0 : index
    %68 = vector.load %arg9[%c0_53, %c0_54] : memref<1x32xf32, #tpu.memory_space<vmem>>, vector<1x32xf32>
    %69 = vector.broadcast %68 : vector<1x32xf32> to vector<8x32xf32>
    %70 = arith.addf %67, %69 : vector<8x32xf32>
    %71 = arith.addf %5, %70 : vector<8x32xf32>
    %c0_55 = arith.constant 0 : index
    %c0_56 = arith.constant 0 : index
    %72 = vector.load %arg10[%c0_55, %c0_56] : memref<1x32xf32, #tpu.memory_space<vmem>>, vector<1x32xf32>
    %c0_57 = arith.constant 0 : index
    %c0_58 = arith.constant 0 : index
    %73 = vector.load %arg11[%c0_57, %c0_58] : memref<1x32xf32, #tpu.memory_space<vmem>>, vector<1x32xf32>
    %cst_59 = arith.constant dense<0.000000e+00> : vector<8xf32>
    %74 = vector.multi_reduction <add>, %71, %cst_59 [1] : vector<8x32xf32> to vector<8xf32>
    %75 = vector.shape_cast %74 : vector<8xf32> to vector<8x1xf32>
    %cst_60 = arith.constant 3.200000e+01 : f32
    %76 = vector.broadcast %cst_60 : f32 to vector<8x1xf32>
    %77 = arith.divf %75, %76 : vector<8x1xf32>
    %78 = vector.broadcast %77 : vector<8x1xf32> to vector<8x32xf32>
    %79 = arith.subf %71, %78 : vector<8x32xf32>
    %80 = arith.mulf %79, %79 : vector<8x32xf32>
    %cst_61 = arith.constant dense<0.000000e+00> : vector<8xf32>
    %81 = vector.multi_reduction <add>, %80, %cst_61 [1] : vector<8x32xf32> to vector<8xf32>
    %82 = vector.shape_cast %81 : vector<8xf32> to vector<8x1xf32>
    %cst_62 = arith.constant 3.200000e+01 : f32
    %83 = vector.broadcast %cst_62 : f32 to vector<8x1xf32>
    %84 = arith.divf %82, %83 : vector<8x1xf32>
    %cst_63 = arith.constant 9.99999974E-6 : f32
    %85 = vector.broadcast %cst_63 : f32 to vector<8x1xf32>
    %86 = arith.addf %84, %85 : vector<8x1xf32>
    %87 = math.rsqrt %86 : vector<8x1xf32>
    %88 = vector.broadcast %87 : vector<8x1xf32> to vector<8x32xf32>
    %89 = arith.mulf %79, %88 : vector<8x32xf32>
    %90 = vector.broadcast %72 : vector<1x32xf32> to vector<8x32xf32>
    %91 = arith.mulf %89, %90 : vector<8x32xf32>
    %92 = vector.broadcast %73 : vector<1x32xf32> to vector<8x32xf32>
    %93 = arith.addf %91, %92 : vector<8x32xf32>
    %94 = arith.truncf %93 : vector<8x32xf32> to vector<8x32xbf16>
    %c0_64 = arith.constant 0 : index
    %c0_65 = arith.constant 0 : index
    %95 = vector.load %arg12[%c0_64, %c0_65] : memref<32x2048xbf16, #tpu.memory_space<vmem>>, vector<32x2048xbf16>
    %cst_66 = arith.constant dense<0.000000e+00> : vector<8x2048xf32>
    %96 = tpu.matmul %94, %95, %cst_66 {dimension_numbers = #tpu.dot_dimension_numbers<[1], [0], [0], [1], [0, 0, 1, 1], [], []>} : vector<8x32xbf16>, vector<32x2048xbf16>, vector<8x2048xf32> -> vector<8x2048xf32>
    %c0_67 = arith.constant 0 : index
    %c0_68 = arith.constant 0 : index
    %97 = vector.load %arg13[%c0_67, %c0_68] : memref<1x2048xf32, #tpu.memory_space<vmem>>, vector<1x2048xf32>
    %98 = vector.broadcast %97 : vector<1x2048xf32> to vector<8x2048xf32>
    %99 = arith.addf %96, %98 : vector<8x2048xf32>
    %cst_69 = arith.constant 0.000000e+00 : f32
    %100 = vector.broadcast %cst_69 : f32 to vector<8x2048xf32>
    %101 = arith.maximumf %99, %100 : vector<8x2048xf32>
    %102 = arith.truncf %101 : vector<8x2048xf32> to vector<8x2048xbf16>
    %c0_70 = arith.constant 0 : index
    %c0_71 = arith.constant 0 : index
    %103 = vector.load %arg14[%c0_70, %c0_71] : memref<2048x32xbf16, #tpu.memory_space<vmem>>, vector<2048x32xbf16>
    %cst_72 = arith.constant dense<0.000000e+00> : vector<8x32xf32>
    %104 = tpu.matmul %102, %103, %cst_72 {dimension_numbers = #tpu.dot_dimension_numbers<[1], [0], [0], [1], [0, 0, 1, 1], [], []>} : vector<8x2048xbf16>, vector<2048x32xbf16>, vector<8x32xf32> -> vector<8x32xf32>
    %c0_73 = arith.constant 0 : index
    %c0_74 = arith.constant 0 : index
    %105 = vector.load %arg15[%c0_73, %c0_74] : memref<1x32xf32, #tpu.memory_space<vmem>>, vector<1x32xf32>
    %106 = vector.broadcast %105 : vector<1x32xf32> to vector<8x32xf32>
    %107 = arith.addf %104, %106 : vector<8x32xf32>
    %108 = arith.addf %93, %107 : vector<8x32xf32>
    %c0_75 = arith.constant 0 : index
    %c0_76 = arith.constant 0 : index
    %109 = vector.load %arg16[%c0_75, %c0_76] : memref<1x32xf32, #tpu.memory_space<vmem>>, vector<1x32xf32>
    %c0_77 = arith.constant 0 : index
    %c0_78 = arith.constant 0 : index
    %110 = vector.load %arg17[%c0_77, %c0_78] : memref<1x32xf32, #tpu.memory_space<vmem>>, vector<1x32xf32>
    %cst_79 = arith.constant dense<0.000000e+00> : vector<8xf32>
    %111 = vector.multi_reduction <add>, %108, %cst_79 [1] : vector<8x32xf32> to vector<8xf32>
    %112 = vector.shape_cast %111 : vector<8xf32> to vector<8x1xf32>
    %cst_80 = arith.constant 3.200000e+01 : f32
    %113 = vector.broadcast %cst_80 : f32 to vector<8x1xf32>
    %114 = arith.divf %112, %113 : vector<8x1xf32>
    %115 = vector.broadcast %114 : vector<8x1xf32> to vector<8x32xf32>
    %116 = arith.subf %108, %115 : vector<8x32xf32>
    %117 = arith.mulf %116, %116 : vector<8x32xf32>
    %cst_81 = arith.constant dense<0.000000e+00> : vector<8xf32>
    %118 = vector.multi_reduction <add>, %117, %cst_81 [1] : vector<8x32xf32> to vector<8xf32>
    %119 = vector.shape_cast %118 : vector<8xf32> to vector<8x1xf32>
    %cst_82 = arith.constant 3.200000e+01 : f32
    %120 = vector.broadcast %cst_82 : f32 to vector<8x1xf32>
    %121 = arith.divf %119, %120 : vector<8x1xf32>
    %cst_83 = arith.constant 9.99999974E-6 : f32
    %122 = vector.broadcast %cst_83 : f32 to vector<8x1xf32>
    %123 = arith.addf %121, %122 : vector<8x1xf32>
    %124 = math.rsqrt %123 : vector<8x1xf32>
    %125 = vector.broadcast %124 : vector<8x1xf32> to vector<8x32xf32>
    %126 = arith.mulf %116, %125 : vector<8x32xf32>
    %127 = vector.broadcast %109 : vector<1x32xf32> to vector<8x32xf32>
    %128 = arith.mulf %126, %127 : vector<8x32xf32>
    %129 = vector.broadcast %110 : vector<1x32xf32> to vector<8x32xf32>
    %130 = arith.addf %128, %129 : vector<8x32xf32>
    %c0_84 = arith.constant 0 : index
    %c0_85 = arith.constant 0 : index
    %131 = vector.load %arg18[%c0_84, %c0_85] : memref<1x32xf32, #tpu.memory_space<vmem>>, vector<1x32xf32>
    %c0_86 = arith.constant 0 : index
    %c0_87 = arith.constant 0 : index
    %132 = vector.load %arg19[%c0_86, %c0_87] : memref<1x32xf32, #tpu.memory_space<vmem>>, vector<1x32xf32>
    %cst_88 = arith.constant dense<0.000000e+00> : vector<8xf32>
    %133 = vector.multi_reduction <add>, %130, %cst_88 [1] : vector<8x32xf32> to vector<8xf32>
    %134 = vector.shape_cast %133 : vector<8xf32> to vector<8x1xf32>
    %cst_89 = arith.constant 3.200000e+01 : f32
    %135 = vector.broadcast %cst_89 : f32 to vector<8x1xf32>
    %136 = arith.divf %134, %135 : vector<8x1xf32>
    %137 = vector.broadcast %136 : vector<8x1xf32> to vector<8x32xf32>
    %138 = arith.subf %130, %137 : vector<8x32xf32>
    %139 = arith.mulf %138, %138 : vector<8x32xf32>
    %cst_90 = arith.constant dense<0.000000e+00> : vector<8xf32>
    %140 = vector.multi_reduction <add>, %139, %cst_90 [1] : vector<8x32xf32> to vector<8xf32>
    %141 = vector.shape_cast %140 : vector<8xf32> to vector<8x1xf32>
    %cst_91 = arith.constant 3.200000e+01 : f32
    %142 = vector.broadcast %cst_91 : f32 to vector<8x1xf32>
    %143 = arith.divf %141, %142 : vector<8x1xf32>
    %cst_92 = arith.constant 9.99999974E-6 : f32
    %144 = vector.broadcast %cst_92 : f32 to vector<8x1xf32>
    %145 = arith.addf %143, %144 : vector<8x1xf32>
    %146 = math.rsqrt %145 : vector<8x1xf32>
    %147 = vector.broadcast %146 : vector<8x1xf32> to vector<8x32xf32>
    %148 = arith.mulf %138, %147 : vector<8x32xf32>
    %149 = vector.broadcast %131 : vector<1x32xf32> to vector<8x32xf32>
    %150 = arith.mulf %148, %149 : vector<8x32xf32>
    %151 = vector.broadcast %132 : vector<1x32xf32> to vector<8x32xf32>
    %152 = arith.addf %150, %151 : vector<8x32xf32>
    %c0_93 = arith.constant 0 : index
    %c0_94 = arith.constant 0 : index
    %c0_95 = arith.constant 0 : index
    %153 = vector.load %arg20[%c0_93, %c0_94, %c0_95] : memref<1x8x32xf32, #tpu.memory_space<vmem>>, vector<1x8x32xf32>
    %154 = vector.shape_cast %153 : vector<1x8x32xf32> to vector<8x32xf32>
    %155 = vector.shape_cast %152 : vector<8x32xf32> to vector<1x8x32xf32>
    tpu.vector_store %arg20[%c0_93, %c0_94, %c0_95], %155 {strides = array<i32>} : memref<1x8x32xf32, #tpu.memory_space<vmem>>, vector<1x8x32xf32>,
    return
  }
  func.func @transform_0(%arg0: i32, %arg1: i32) -> (i32, i32, i32) {
    %c0_i32 = arith.constant 0 : i32
    %c0_i32_0 = arith.constant 0 : i32
    %c0_i32_1 = arith.constant 0 : i32
    return %arg0, %c0_i32, %c0_i32_0 : i32, i32, i32
  }
  func.func @transform_1(%arg0: i32, %arg1: i32) -> (i32, i32, i32) {
    %c0_i32 = arith.constant 0 : i32
    %c0_i32_0 = arith.constant 0 : i32
    return %arg0, %arg1, %c0_i32 : i32, i32, i32
  }
  func.func @transform_2(%arg0: i32, %arg1: i32) -> (i32, i32) {
    %c0_i32 = arith.constant 0 : i32
    %c0_i32_0 = arith.constant 0 : i32
    %c0_i32_1 = arith.constant 0 : i32
    return %c0_i32, %c0_i32_0 : i32, i32
  }
  func.func @transform_3(%arg0: i32, %arg1: i32) -> (i32, i32) {
    %c0_i32 = arith.constant 0 : i32
    %c0_i32_0 = arith.constant 0 : i32
    %c0_i32_1 = arith.constant 0 : i32
    return %c0_i32, %c0_i32_0 : i32, i32
  }
  func.func @transform_4(%arg0: i32, %arg1: i32) -> (i32, i32) {
    %c0_i32 = arith.constant 0 : i32
    %c0_i32_0 = arith.constant 0 : i32
    %c0_i32_1 = arith.constant 0 : i32
    return %c0_i32, %c0_i32_0 : i32, i32
  }
  func.func @transform_5(%arg0: i32, %arg1: i32) -> (i32, i32) {
    %c0_i32 = arith.constant 0 : i32
    %c0_i32_0 = arith.constant 0 : i32
    %c0_i32_1 = arith.constant 0 : i32
    return %c0_i32, %c0_i32_0 : i32, i32
  }
  func.func @transform_6(%arg0: i32, %arg1: i32) -> (i32, i32) {
    %c0_i32 = arith.constant 0 : i32
    %c0_i32_0 = arith.constant 0 : i32
    %c0_i32_1 = arith.constant 0 : i32
    return %c0_i32, %c0_i32_0 : i32, i32
  }
  func.func @transform_7(%arg0: i32, %arg1: i32) -> (i32, i32) {
    %c0_i32 = arith.constant 0 : i32
    %c0_i32_0 = arith.constant 0 : i32
    %c0_i32_1 = arith.constant 0 : i32
    return %c0_i32, %c0_i32_0 : i32, i32
  }
  func.func @transform_8(%arg0: i32, %arg1: i32) -> (i32, i32) {
    %c0_i32 = arith.constant 0 : i32
    %c0_i32_0 = arith.constant 0 : i32
    %c0_i32_1 = arith.constant 0 : i32
    return %c0_i32, %c0_i32_0 : i32, i32
  }
  func.func @transform_9(%arg0: i32, %arg1: i32) -> (i32, i32) {
    %c0_i32 = arith.constant 0 : i32
    %c0_i32_0 = arith.constant 0 : i32
    %c0_i32_1 = arith.constant 0 : i32
    return %c0_i32, %c0_i32_0 : i32, i32
  }
  func.func @transform_10(%arg0: i32, %arg1: i32) -> (i32, i32) {
    %c0_i32 = arith.constant 0 : i32
    %c0_i32_0 = arith.constant 0 : i32
    %c0_i32_1 = arith.constant 0 : i32
    return %c0_i32, %c0_i32_0 : i32, i32
  }
  func.func @transform_11(%arg0: i32, %arg1: i32) -> (i32, i32) {
    %c0_i32 = arith.constant 0 : i32
    %c0_i32_0 = arith.constant 0 : i32
    %c0_i32_1 = arith.constant 0 : i32
    return %c0_i32, %c0_i32_0 : i32, i32
  }
  func.func @transform_12(%arg0: i32, %arg1: i32) -> (i32, i32) {
    %c0_i32 = arith.constant 0 : i32
    %c0_i32_0 = arith.constant 0 : i32
    %c0_i32_1 = arith.constant 0 : i32
    return %c0_i32, %c0_i32_0 : i32, i32
  }
  func.func @transform_13(%arg0: i32, %arg1: i32) -> (i32, i32) {
    %c0_i32 = arith.constant 0 : i32
    %c0_i32_0 = arith.constant 0 : i32
    %c0_i32_1 = arith.constant 0 : i32
    return %c0_i32, %c0_i32_0 : i32, i32
  }
  func.func @transform_14(%arg0: i32, %arg1: i32) -> (i32, i32) {
    %c0_i32 = arith.constant 0 : i32
    %c0_i32_0 = arith.constant 0 : i32
    %c0_i32_1 = arith.constant 0 : i32
    return %c0_i32, %c0_i32_0 : i32, i32
  }
  func.func @transform_15(%arg0: i32, %arg1: i32) -> (i32, i32) {
    %c0_i32 = arith.constant 0 : i32
    %c0_i32_0 = arith.constant 0 : i32
    %c0_i32_1 = arith.constant 0 : i32
    return %c0_i32, %c0_i32_0 : i32, i32
  }
  func.func @transform_16(%arg0: i32, %arg1: i32) -> (i32, i32) {
    %c0_i32 = arith.constant 0 : i32
    %c0_i32_0 = arith.constant 0 : i32
    %c0_i32_1 = arith.constant 0 : i32
    return %c0_i32, %c0_i32_0 : i32, i32
  }
  func.func @transform_17(%arg0: i32, %arg1: i32) -> (i32, i32) {
    %c0_i32 = arith.constant 0 : i32
    %c0_i32_0 = arith.constant 0 : i32
    %c0_i32_1 = arith.constant 0 : i32
    return %c0_i32, %c0_i32_0 : i32, i32
  }
  func.func @transform_18(%arg0: i32, %arg1: i32) -> (i32, i32, i32) {
    %c0_i32 = arith.constant 0 : i32
    %c0_i32_0 = arith.constant 0 : i32
    return %arg0, %arg1, %c0_i32 : i32, i32, i32
  }
}

</mosaic_0001>

<bundles_post_ra>
// kernel: _encoder_forward.2
= control target key start
LH: loop header
LB: loop body
LE: loop exit
PB: predicated region body
PF: predicated region fallthrough
CT: control target
= control target key end

     0   :  { %s4315_s27 = smov 0   ;;  %s4317_s28 = smov 0   ;;  %s5078_s0 = inlined_call_operand.vmem [shape: f32[2,8,32], index: 0, kind: input, shape index: {}, may-alias: {0,1}]   ;;  %s5079_s1 = inlined_call_operand.vmem [shape: f32[2,8,32], index: 1, kind: input, shape index: {}, may-alias: {0,1}]   ;;  %s5080_s2 = inlined_call_operand.vmem [shape: bf16[32,32], index: 2, kind: input, shape index: {}]   ;;  %s5081_s3 = inlined_call_operand.vmem [shape: f32[1,32], index: 3, kind: input, shape index: {}]   ;;  %s5082_s4 = inlined_call_operand.vmem [shape: bf16[32,64], index: 4, kind: input, shape index: {}]   ;;  %s5083_s5 = inlined_call_operand.vmem [shape: f32[1,64], index: 5, kind: input, shape index: {}]   ;;  %s5084_s6 = inlined_call_operand.vmem [shape: bf16[32,32], index: 6, kind: input, shape index: {}]   ;;  %s5085_s7 = inlined_call_operand.vmem [shape: f32[1,32], index: 7, kind: input, shape index: {}]   ;;  %s5086_s8 = inlined_call_operand.vmem [shape: f32[1,32], index: 8, kind: input, shape index: {}]   ;;  %s5087_s9 = inlined_call_operand.vmem [shape: f32[1,32], index: 9, kind: input, shape index: {}]   ;;  %s5088_s10 = inlined_call_operand.vmem [shape: bf16[32,2048], index: 10, kind: input, shape index: {}]   ;;  %s5089_s11 = inlined_call_operand.vmem [shape: f32[1,2048], index: 11, kind: input, shape index: {}]   ;;  %s5090_s12 = inlined_call_operand.vmem [shape: bf16[2048,32], index: 12, kind: input, shape index: {}]   ;;  %s5091_s13 = inlined_call_operand.vmem [shape: f32[1,32], index: 13, kind: input, shape index: {}]   ;;  %s5092_s14 = inlined_call_operand.vmem [shape: f32[1,32], index: 14, kind: input, shape index: {}]   ;;  %s5093_s15 = inlined_call_operand.vmem [shape: f32[1,32], index: 15, kind: input, shape index: {}]   ;;  %s5094_s16 = inlined_call_operand.vmem [shape: f32[1,32], index: 16, kind: input, shape index: {}]   ;;  %s5095_s17 = inlined_call_operand.vmem [shape: f32[1,32], index: 17, kind: input, shape index: {}]   ;;  %s5096_s18 = inlined_call_operand.vmem [shape: bf16[2,8,32], index: 18, kind: output, shape index: {}]  }
   0x1   :  { %5098 = sst [smem:[#allocation8_spill]] %s5078_s0  ;;  %s4319_s29 = smov 0  }
   0x2   :  { %5099 = sst [smem:[#allocation9_spill]] %s5079_s1 }
   0x3   :  { %5100 = sst [smem:[#allocation10_spill]] %s5080_s2 }
   0x4 LB: > { %s40_s16 = sadd.s32 1, %s4201_s28  ;;  %p3514_p0 = scmp.ge.s32.totalorder %s4205_s29, 1  ;;  %s4205_s29 = sphi %s4319_s29, %s28_s29   ;;  %s4201_s28 = sphi %s4317_s28, %s5105_s28   ;;  %s4197_s27 = sphi %s4315_s27, %s5104_s27  }
   0x5   : > { %p42_p1 = scmp.ge.s32.totalorder %s40_s16, 2  ;;  %p539_p2 = scmp.lt.s32.totalorder %s4205_s29, 3 }
   0x7   : > { %s5107_s16 = smov (%p42_p1, %s40_s16), 0  ;;  %p540_p3 = pnand %p3514_p0, %p539_p2 }
   0x8   : > { %v4029_v0 = vld [vmem:[%s5082_s4] sm:$0xff] (!%p540_p3)   ;;  %v4207_v1 = vmov (!%p540_p3), 0.0   ;;  %s5101_s1 = sld [smem:[#allocation10_spill]] (!%p540_p3)  ;;  %v4031_v3 = vld [vmem:[%s5082_s4 + $0x8] sm:$0xff] (!%p540_p3)   ;;  %vm4208_vm0 = vmmov (!%p540_p3), 0   ;;  %p601_p4 = scmp.lt.s32.totalorder (!%p540_p3), %s4197_s27, 1 }
   0x9   : > { %543 = sbr.rel (%p540_p3) target bundleno = 2645 (0xa55), region = 92  ;;  %3920 = vmatprep.subr.bf16.mxu0 (!%p540_p3), %v4207_v1  ;;  %3928 = vmatprep.subr.bf16.mxu1 (!%p540_p3), %v4207_v1  ;;  %s5102_s26 = sld [smem:[#allocation8_spill]] (!%p540_p3)  ;;  %vm649_vm1 = vcmask (!%p540_p3), 261120   ;;  %v3518_v9 = vld [vmem:[%s5083_s5] ss:$0 sm:$0xff] (!%p540_p3)  ;;  %vm694_vm2 = vcmask (!%p540_p3), 519168  }
   0xa   : > { %3921 = vmatpush3.bf16.msra.mxu0 (!%p540_p3), %v4029_v0  ;;  %3924 = vmatprep.mubr.msk.bf16.mxu0 (!%p540_p3), %vm4208_vm0, %v4207_v1  ;;  %s5103_s19 = sld [smem:[#allocation9_spill]] (!%p540_p3)  ;;  %v3522_v10 = vld [vmem:[%s5081_s3] ss:$0 sm:$0xff] (!%p540_p3)  ;;  %vm818_vm3 = vcmask (!%p540_p3), 257024   ;;  %vm697_vm4 = vcmask (!%p540_p3), 60416   ;;  %s4209_s24 = smov (!%p540_p3), 104  }
   0xb   : > { %3922 = vmatprep.subr.bf16.mxu0 (!%p540_p3), %v4207_v1  ;;  %3932 = vmatprep.mubr.msk.bf16.mxu1 (!%p540_p3), %vm4208_vm0, %v4207_v1  ;;  %s4210_s25 = smov (!%p540_p3), 120   ;;  %vm856_vm5 = vcmask (!%p540_p3), 64512   ;;  %vm1092_vm6 = vcmask (!%p540_p3), 1043456   ;;  %s4213_s30 = smov (!%p540_p3), 80   ;;  %vm1283_vm7 = vcmask (!%p540_p3), 126016   ;;  %vm1292_vm8 = vcmask (!%p540_p3), 191616  }
   0xc   : > { %s4214_s0 = smov (!%p540_p3), 72   ;;  %s4216_s22 = smov (!%p540_p3), 16   ;;  %vm1301_vm9 = vcmask (!%p540_p3), 257216  }
   0xe   : > { %v4030_v2 = vld [vmem:[%s5101_s1] sm:$0xff] (!%p540_p3)   ;;  %v4032_v4 = vld [vmem:[%s5101_s1 + $0x8] sm:$0xff] (!%p540_p3)   ;;  %3923 = vmatpush3.bf16.msra.mxu0 (!%p540_p3), %v4031_v3 }
   0xf   : > { %3929 = vmatpush3.bf16.msra.mxu1 (!%p540_p3), %v4030_v2  ;;  %3936 = vmatprep.subr.bf16.mxu0 (!%p540_p3), %v4207_v1 }
  0x10   : > { %3930 = vmatprep.subr.bf16.mxu1 %v4207_v1  ;;  %s5109_s27 = smov (!%p601_p4, %s4197_s27), 1 }
  0x11   : > { %s3515_s23 = sshll.u32 %s5109_s27, 3 }
  0x12   : > { %s604_s17 = scalar_lea.vmem %s5102_s26, %s3515_s23  ;;  %s611_s20 = scalar_lea.vmem %s5103_s19, %s3515_s23 }
  0x13   : > { %3931 = vmatpush3.bf16.msra.mxu1 %v4032_v4  ;;  %v624_v5 = vld [vmem:[%s604_s17] sm:$0xff]  ;;  %s4211_s26 = smov 112   ;;  %s4212_s17 = smov 96  }
  0x14   : > { %3942 = vmatprep.subr.bf16.mxu1 %v4207_v1  ;;  %v625_v6 = vpack.c.bf16 %v624_v5, %v624_v5  ;;  %v4364_v7 = vld [vmem:[%s611_s20] sm:$0xff]  ;;  %s4215_s19 = smov 88  }
  0x15   : > { %v748_v8 = vpack.c.bf16 %v4364_v7, %v4364_v7 }
  0x16   : > { %3925 = vmatmul.mubr.msk.bf16.vlgmr.msra.gmra.mrb[0].mxu0 %vm649_vm1, %v625_v6 }
  0x17   : > { %3933 = vmatmul.mubr.msk.bf16.vlgmr.msra.gmra.mrb[0].mxu1 %vm649_vm1, %v748_v8  ;;  %3938 = vmatprep.mubr.msk.bf16.mxu0 %vm4208_vm0, %v4207_v1 }
  0x18   : > { %3944 = vmatprep.mubr.msk.bf16.mxu1 %vm4208_vm0, %v4207_v1 }
  0xe9   : > { %v687_v11 = vpop.f32.mrb[0].mxu0 }
  0xea   : > { %v688_v12 = vadd.f32 %v3518_v9, %v687_v11  ;;  %v3926_v13 = vpop.f32.mrb[1].mxu0  ;;  %v810_v14 = vpop.f32.mrb[0].mxu1 }
  0xeb   : > { %v690_v15 = vpop.f32.mrb[2].mxu0  ;;  %v811_v16 = vadd.f32 %v3522_v10, %v810_v14  ;;  %v3934_v17 = vpop.f32.mrb[1].mxu1 }
  0xec   : > { %v693_v18 = vpack.c.bf16 %v688_v12, %v688_v12  ;;  %v3927_v19 = vpop.f32.mrb[3].mxu0  ;;  %v813_v20 = vpop.f32.mrb[2].mxu1 }
  0xed   : > { %v816_v21 = vmul.f32 0.35355338, %v811_v16  ;;  %v3935_v22 = vpop.f32.mrb[3].mxu1 }
  0xee   : > { %695 = vst.msk [vmem:[#allocation2] sm:$0xf] %vm694_vm2, %v693_v18 }
  0xef   : > { %v817_v23 = vpack.c.bf16 %v816_v21, %v816_v21 }
  0xf1   : > { %819 = vst.msk [vmem:[#allocation3] sm:$0xf] %vm818_vm3, %v817_v23 }
  0xf5   : > { %v696_v24 = vld [vmem:[#allocation2] sm:$0xf] }
  0xf6   : > { %v733_v25 = vld [vmem:[#allocation2] sm:$0xf]  ;;  %698 = vst.msk [vmem:[#allocation4] sm:$0xf] %vm697_vm4, %v696_v24 }
  0xf7   : > { %v705_v26 = vld [vmem:[#allocation2] sm:$0xf]  ;;  %735 = vrot.lane.b32.xlu1 %v733_v25, %s4209_s24 }
  0xf8   : > { %707 = vrot.lane.b32.xlu0 %v705_v26, %s4210_s25  ;;  %v820_v27 = vld [vmem:[#allocation3] sm:$0xf]  ;;  %v719_v29 = vld [vmem:[#allocation2] sm:$0xf] }
  0xf9   : > { %v823_v28 = vld [vmem:[#allocation3] sm:$0xf]  ;;  %822 = vst.msk [vmem:[#allocation6] sm:$0xf] %vm697_vm4, %v820_v27  ;;  %v699_v8 = vld [vmem:[#allocation2] sm:$0xf] }
  0xfa   : > { %v837_v30 = vld [vmem:[#allocation3] sm:$0xf] }
  0xfb   : > { %825 = vrot.lane.b32.xlu1 %v823_v28, %s4210_s25  ;;  %v830_v31 = vld [vmem:[#allocation3] sm:$0xf]  ;;  %s4218_s25 = smov 24  }
  0xfc   : > { %721 = vrot.lane.b32.xlu0 %v719_v29, %s4211_s26 }
  0xfd   : > { %v848_v32 = vld [vmem:[#allocation4] sm:$0xf] }
  0xfe   : > { %v861_v33 = vsel %vm856_vm5, %v848_v32, 0  ;;  %v726_v32 = vld [vmem:[#allocation2] sm:$0xf] }
  0xff   : > { %839 = vrot.lane.b32.xlu1 %v837_v30, %s4209_s24  ;;  %3937 = vmatpush3.bf16.xpose.msra.mxu0 %v861_v33  ;;  %v740_v33 = vld [vmem:[#allocation2] sm:$0xf]  ;;  %s4217_s24 = smov 8  }
 0x100   : > { %832 = vrot.lane.b32.xlu0 %v830_v31, %s4211_s26  ;;  %3948 = vmatprep.subr.bf16.mxu0 %v4207_v1  ;;  %v844_v34 = vld [vmem:[#allocation6] sm:$0xf]  ;;  %s3517_s26 = sshll.u32 %s5109_s27, 2 }
 0x106   : > { %3939 = vmatmul.mubr.msk.bf16.vlgmr.msra.gmra.mrb[4].mxu0 %vm856_vm5, %v844_v34  ;;  %v712_v34 = vld [vmem:[#allocation2] sm:$0xf] }
 0x107   : > { %3950 = vmatprep.mubr.msk.bf16.mxu0 %vm4208_vm0, %v4207_v1 }
 0x169   : > { %v736_v35 = vpop.permute.xlu1 %735 }
 0x16a   : > { %v708_v36 = vpop.permute.xlu0 %707  ;;  %739 = vst.msk [vmem:[#allocation4 + $0xc] sm:$0xf] %vm697_vm4, %v736_v35 }
 0x16b   : > { %711 = vst.msk [vmem:[#allocation4 + $0x4] sm:$0xf] %vm697_vm4, %v708_v36 }
 0x16d   : > { %v826_v37 = vpop.permute.xlu1 %825 }
 0x16e   : > { %v722_v38 = vpop.permute.xlu0 %721  ;;  %829 = vst.msk [vmem:[#allocation6 + $0x4] sm:$0xf] %vm697_vm4, %v826_v37 }
 0x16f   : > { %725 = vst.msk [vmem:[#allocation4 + $0x8] sm:$0xf] %vm697_vm4, %v722_v38 }
 0x171   : > { %v840_v39 = vpop.permute.xlu1 %839  ;;  %v851_v46 = vld [vmem:[#allocation4 + $0xc] sm:$0xf] }
 0x172   : > { %v833_v40 = vpop.permute.xlu0 %832  ;;  %v849_v41 = vld [vmem:[#allocation4 + $0x4] sm:$0xf]  ;;  %843 = vst.msk [vmem:[#allocation6 + $0xc] sm:$0xf] %vm697_vm4, %v840_v39  ;;  %v999_v47 = vsel %vm856_vm5, %v851_v46, 0 }
 0x173   : > { %836 = vst.msk [vmem:[#allocation6 + $0x8] sm:$0xf] %vm697_vm4, %v833_v40  ;;  %v907_v42 = vsel %vm856_vm5, %v849_v41, 0 }
 0x174   : > { %3943 = vmatpush3.bf16.xpose.msra.mxu1 %v907_v42 }
 0x175   : > { %3954 = vmatprep.subr.bf16.mxu1 %v4207_v1  ;;  %v845_v45 = vld [vmem:[#allocation6 + $0x4] sm:$0xf] }
 0x176   : > { %v850_v43 = vld [vmem:[#allocation4 + $0x8] sm:$0xf] }
 0x177   : > { %v953_v44 = vsel %vm856_vm5, %v850_v43, 0 }
 0x178   : > { %3949 = vmatpush3.bf16.xpose.msra.mxu0 %v953_v44 }
 0x179   : > { %3960 = vmatprep.subr.bf16.mxu0 %v4207_v1  ;;  %v847_v49 = vld [vmem:[#allocation6 + $0xc] sm:$0xf] }
 0x17a   : > { %v846_v48 = vld [vmem:[#allocation6 + $0x8] sm:$0xf] }
 0x17b   : > { %3945 = vmatmul.mubr.msk.bf16.vlgmr.msra.gmra.mrb[4].mxu1 %vm856_vm5, %v845_v45 }
 0x17c   : > { %3955 = vmatpush3.bf16.xpose.msra.mxu1 %v999_v47  ;;  %3956 = vmatprep.mubr.msk.bf16.mxu1 %vm4208_vm0, %v4207_v1 }
 0x17d   : > { %3966 = vmatprep.subr.bf16.mxu1 %v4207_v1 }
 0x17f   : > { %3951 = vmatmul.mubr.msk.bf16.vlgmr.msra.gmra.mrb[8].mxu0 %vm856_vm5, %v846_v48 }
 0x180   : > { %3962 = vmatprep.mubr.msk.bf16.mxu0 %vm4208_vm0, %v4207_v1 }
 0x183   : > { %3957 = vmatmul.mubr.msk.bf16.vlgmr.msra.gmra.mrb[8].mxu1 %vm856_vm5, %v847_v49 }
 0x184   : > { %3968 = vmatprep.mubr.msk.bf16.mxu1 %vm4208_vm0, %v4207_v1 }
 0x1d9   : > { %v897_v50 = vpop.f32.mrb[4].mxu0 }
 0x1da   : > { %v3940_v51 = vpop.f32.mrb[5].mxu0  ;;  %v1041_v52 = vsel %vm856_vm5, %v897_v50, -inf }
 0x1db   : > { %1042 = vmax.xlane.f32.xlu0 %v1041_v52  ;;  %v900_v53 = vpop.f32.mrb[6].mxu0 }
 0x1dc   : > { %v3941_v54 = vpop.f32.mrb[7].mxu0 }
 0x24e   : > { %v943_v55 = vpop.f32.mrb[4].mxu1 }
 0x24f   : > { %v3946_v56 = vpop.f32.mrb[5].mxu1  ;;  %v1044_v57 = vsel %vm856_vm5, %v943_v55, -inf }
 0x250   : > { %1045 = vmax.xlane.f32.xlu1 %v1044_v57  ;;  %v946_v58 = vpop.f32.mrb[6].mxu1 }
 0x251   : > { %v3947_v59 = vpop.f32.mrb[7].mxu1 }
 0x252   : > { %v989_v60 = vpop.f32.mrb[8].mxu0 }
 0x253   : > { %v3952_v61 = vpop.f32.mrb[9].mxu0  ;;  %v1047_v62 = vsel %vm856_vm5, %v989_v60, -inf }
 0x254   : > { %1048 = vmax.xlane.f32.xlu0 %v1047_v62  ;;  %v992_v63 = vpop.f32.mrb[10].mxu0 }
 0x255   : > { %v3953_v0 = vpop.f32.mrb[11].mxu0 }
 0x256   : > { %v1035_v2 = vpop.f32.mrb[8].mxu1 }
 0x257   : > { %v3958_v3 = vpop.f32.mrb[9].mxu1  ;;  %v1050_v4 = vsel %vm856_vm5, %v1035_v2, -inf }
 0x258   : > { %v1038_v5 = vpop.f32.mrb[10].mxu1  ;;  %1051 = vmax.xlane.f32.xlu0 %v1050_v4 }
 0x259   : > { %v3959_v6 = vpop.f32.mrb[11].mxu1 }
 0x25a   : > { %v4033_v6 = vld [vmem:[%s5084_s6] sm:$0xff]  }
 0x261   : > { %701 = vrot.lane.b32.xlu1 %v699_v8, %s4212_s17 }
 0x268   : > { %v1043_v9 = vpop.xlane.xlu0 %1042 }
 0x269   : > { %v1053_v10 = vsub.f32 %v897_v50, %v1043_v9 }
 0x26b   : > { %v1057_v11 = vmul.f32 1.442695, %v1053_v10  ;;  %v4034_v10 = vld [vmem:[%s5084_s6 + $0x8] sm:$0xff]  }
 0x26d   : > { %4163 = vpow2.f32 %v1057_v11 }
 0x277   : > { %v4164_v12 = vpop.eup %4163 }
 0x278   : > { %v1065_v13 = vsel %vm856_vm5, %v4164_v12, 0.0 }
 0x285   : > { %1066 = vadd.xlane.f32.xlu1 %v1065_v13 }
 0x2dd   : > { %v1046_v14 = vpop.xlane.xlu1 %1045 }
 0x2de   : > { %v1054_v15 = vsub.f32 %v943_v55, %v1046_v14 }
 0x2e0   : > { %v1059_v16 = vmul.f32 1.442695, %v1054_v15 }
 0x2e1   : > { %v702_v17 = vpop.permute.xlu1 %701  ;;  %v1049_v18 = vpop.xlane.xlu0 %1048 }
 0x2e2   : > { %4165 = vpow2.f32 %v1059_v16  ;;  %704 = vst.msk [vmem:[#allocation5] sm:$0xf] %vm697_vm4, %v702_v17  ;;  %v1055_v19 = vsub.f32 %v989_v60, %v1049_v18 }
 0x2e4   : > { %v1061_v20 = vmul.f32 1.442695, %v1055_v19 }
 0x2e5   : > { %v1052_v21 = vpop.xlane.xlu0 %1051 }
 0x2e6   : > { %4167 = vpow2.f32 %v1061_v20  ;;  %v1056_v22 = vsub.f32 %v1035_v2, %v1052_v21 }
 0x2e8   : > { %v1063_v23 = vmul.f32 1.442695, %v1056_v22 }
 0x2e9   : > { %v852_v24 = vld [vmem:[#allocation5] sm:$0xf] }
 0x2ea   : > { %4169 = vpow2.f32 %v1063_v23  ;;  %v1094_v25 = vsel %vm1092_vm6, %v852_v24, 0  ;;  %v3537_v23 = vld [vmem:[%s5085_s7] ss:$0 sm:$0xff] }
 0x2eb   : > { %3961 = vmatpush3.bf16.msra.mxu0 %v1094_v25 }
 0x2ec   : > { %v4166_v26 = vpop.eup %4165  ;;  %3972 = vmatprep.subr.bf16.mxu0 %v4207_v1 }
 0x2ed   : > { %v1068_v27 = vsel %vm856_vm5, %v4166_v26, 0.0 }
 0x2ee   : > { %1069 = vadd.xlane.f32.xlu0 %v1068_v27 }
 0x2f0   : > { %v4168_v28 = vpop.eup %4167 }
 0x2f1   : > { %v1071_v29 = vsel %vm856_vm5, %v4168_v28, 0.0 }
 0x2f2   : > { %1072 = vadd.xlane.f32.xlu1 %v1071_v29 }
 0x2f4   : > { %v4170_v30 = vpop.eup %4169 }
 0x2f5   : > { %v1074_v31 = vsel %vm856_vm5, %v4170_v30, 0.0 }
 0x2f6   : > { %1075 = vadd.xlane.f32.xlu0 %v1074_v31 }
 0x303   : > { %728 = vrot.lane.b32.xlu1 %v726_v32, %s4213_s30 }
 0x307   : > { %742 = vrot.lane.b32.xlu1 %v740_v33, %s4214_s0  ;;  %s618_s0 = scalar_lea.vmem %s5096_s18, %s3517_s26 }
 0x30c   : > { %714 = vrot.lane.b32.xlu0 %v712_v34, %s4215_s19 }
 0x312   : > { %v1067_v35 = vpop.xlane.xlu1 %1066 }
 0x313   : > { %4171 = vrcp.f32 %v1067_v35 }
 0x31d   : > { %v4172_v36 = vpop.eup %4171 }
 0x31e   : > { %v1081_v37 = vmul.f32 %v4172_v36, %v4164_v12  ;;  %v1402_v36 = vld [vmem:[%s5088_s10] sm:$0xff] }
 0x320   : > { %v1085_v38 = vpack.c.bf16 %v1081_v37, %v1081_v37  ;;  %v1410_v37 = vld [vmem:[%s5088_s10 + $0x40] sm:$0xff] }
 0x322   : > { %3963 = vmatmul.mubr.msk.bf16.vlgmr.msra.gmra.mrb[12].mxu0 %vm856_vm5, %v1085_v38  ;;  %v3544_v38 = vcombine.high %v1402_v36, %v1410_v37 }
 0x323   : > { %3974 = vmatprep.mubr.msk.bf16.mxu0 %vm4208_vm0, %v4207_v1 }
 0x37b   : > { %v1070_v39 = vpop.xlane.xlu0 %1069 }
 0x37f   : > { %v1073_v40 = vpop.xlane.xlu1 %1072 }
 0x380   : > { %4173 = vrcp.f32 %v1073_v40  ;;  %v3543_v40 = vcombine.low %v1402_v36, %v1410_v37  ;;  %v1424_v37 = vld [vmem:[%s5088_s10 + $0xb0] sm:$0xff] }
 0x381   : > { %4175 = vrcp.f32 %v1070_v39  ;;  %v1411_v39 = vld [vmem:[%s5088_s10 + $0x48] sm:$0xff] }
 0x383   : > { %v729_v41 = vpop.permute.xlu1 %728  ;;  %v1076_v42 = vpop.xlane.xlu0 %1075 }
 0x384   : > { %732 = vst.msk [vmem:[#allocation5 + $0x8] sm:$0xf] %vm697_vm4, %v729_v41  ;;  %4177 = vrcp.f32 %v1076_v42 }
 0x387   : > { %v743_v43 = vpop.permute.xlu1 %742  ;;  %v715_v44 = vpop.permute.xlu0 %714 }
 0x388   : > { %746 = vst.msk [vmem:[#allocation5 + $0xc] sm:$0xf] %vm697_vm4, %v743_v43  ;;  %718 = vst.msk [vmem:[#allocation5 + $0x4] sm:$0xf] %vm697_vm4, %v715_v44  ;;  %v1418_v43 = vld [vmem:[%s5088_s10 + $0x80] sm:$0xff] }
 0x389   : > { %v1426_v44 = vld [vmem:[%s5088_s10 + $0xc0] sm:$0xff] }
 0x38a   : > { %v4174_v45 = vpop.eup %4173 }
 0x38b   : > { %v4176_v46 = vpop.eup %4175  ;;  %v1083_v47 = vmul.f32 %v4174_v45, %v4168_v28  ;;  %v854_v48 = vld [vmem:[#allocation5 + $0x8] sm:$0xf]  ;;  %v1419_v45 = vld [vmem:[%s5088_s10 + $0x88] sm:$0xff] }
 0x38c   : > { %v1186_v49 = vsel %vm1092_vm6, %v854_v48, 0  ;;  %v1082_v51 = vmul.f32 %v4176_v46, %v4166_v26  ;;  %v3560_v46 = vcombine.high %v1418_v43, %v1426_v44  ;;  %v3559_v48 = vcombine.low %v1418_v43, %v1426_v44 }
 0x38d   : > { %3973 = vmatpush3.bf16.msra.mxu0 %v1186_v49  ;;  %v1087_v50 = vpack.c.bf16 %v1083_v47, %v1083_v47  ;;  %v1427_v47 = vld [vmem:[%s5088_s10 + $0xc8] sm:$0xff] }
 0x38e   : > { %3984 = vmatprep.subr.bf16.mxu0 %v4207_v1  ;;  %v1086_v55 = vpack.c.bf16 %v1082_v51, %v1082_v51  ;;  %v4178_v56 = vpop.eup %4177  ;;  %v3561_v49 = vcombine.low %v1419_v45, %v1427_v47  ;;  %v1404_v51 = vld [vmem:[%s5088_s10 + $0x10] sm:$0xff] }
 0x38f   : > { %v853_v52 = vld [vmem:[#allocation5 + $0x4] sm:$0xf]  ;;  %v855_v54 = vld [vmem:[#allocation5 + $0xc] sm:$0xf]  ;;  %v1084_v58 = vmul.f32 %v4178_v56, %v4170_v30 }
 0x390   : > { %3975 = vmatmul.mubr.msk.bf16.vlgmr.msra.gmra.mrb[16].mxu0 %vm856_vm5, %v1087_v50  ;;  %v1140_v53 = vsel %vm1092_vm6, %v853_v52, 0  ;;  %v1232_v57 = vsel %vm1092_vm6, %v855_v54, 0  ;;  %v3562_v50 = vcombine.high %v1419_v45, %v1427_v47  ;;  %v1412_v52 = vld [vmem:[%s5088_s10 + $0x50] sm:$0xff]  ;;  %v4219_v54 = vmov 0   ;;  %v4036_v47 = vld [vmem:[%s5090_s12 + $0xc0] sm:$0xff]  }
 0x391   : > { %3967 = vmatpush3.bf16.msra.mxu1 %v1140_v53  ;;  %3988 = vmatprep.mubr.msk.bf16.mxu0 %vm4208_vm0, %v4207_v1  ;;  %v1088_v59 = vpack.c.bf16 %v1084_v58, %v1084_v58  ;;  %v1405_v53 = vld [vmem:[%s5088_s10 + $0x18] sm:$0xff]  ;;  %v3548_v56 = vcombine.high %v1404_v51, %v1412_v52 }
 0x392   : > { %3978 = vmatprep.subr.bf16.mxu1 %v4207_v1  ;;  %3985 = vmatpush3.bf16.msra.mxu0 %v4033_v6  ;;  %v1428_v6 = vld [vmem:[%s5088_s10 + $0xd0] sm:$0xff] }
 0x393   : > { %3986 = vmatprep.subr.bf16.mxu0 %v4207_v1 }
 0x394   : > { %3969 = vmatmul.mubr.msk.bf16.vlgmr.msra.gmra.mrb[12].mxu1 %vm856_vm5, %v1086_v55  ;;  %v3547_v55 = vcombine.low %v1404_v51, %v1412_v52  ;;  %v4040_v51 = vld [vmem:[%s5090_s12 + $0xc8] sm:$0xff]  }
 0x395   : > { %3979 = vmatpush3.bf16.msra.mxu1 %v1232_v57  ;;  %3980 = vmatprep.mubr.msk.bf16.mxu1 %vm4208_vm0, %v4207_v1  ;;  %v1413_v57 = vld [vmem:[%s5088_s10 + $0x58] sm:$0xff]  ;;  %v4041_v52 = vld [vmem:[%s5090_s12 + $0x8] sm:$0xff]  }
 0x396   : > { %3987 = vmatpush3.bf16.msra.mxu0 %v4034_v10  ;;  %1681 = vmatprep.subr.bf16.mxu1 %v3544_v38  ;;  %v3549_v58 = vcombine.low %v1405_v53, %v1413_v57  ;;  %v1425_v38 = vld [vmem:[%s5088_s10 + $0xb8] sm:$0xff] }
 0x39c   : > { %3981 = vmatmul.mubr.msk.bf16.vlgmr.msra.gmra.mrb[16].mxu1 %vm856_vm5, %v1088_v59  ;;  %v3550_v59 = vcombine.high %v1405_v53, %v1413_v57  ;;  %v4042_v53 = vld [vmem:[%s5090_s12 + $0x88] sm:$0xff]   ;;  %v4046_v57 = vld [vmem:[%s5090_s12 + $0x90] sm:$0xff]  }
 0x39d   : > { %1682 = vmatpush1.bf16.msra.mxu1 %v3543_v40  ;;  %1713 = vmatprep.mubr.bf16.mxu1 %v4219_v54 }
 0x39e   : > { %1683 = vmatprep.subr.bf16.mxu1 %v3560_v46  ;;  %v4035_v46 = vld [vmem:[%s5090_s12 + $0x40] sm:$0xff]  }
 0x3a1   : > { %1684 = vmatpush1.bf16.msra.mxu1 %v3559_v48  ;;  %v4037_v48 = vld [vmem:[%s5090_s12] sm:$0xff]  }
 0x3a2   : > { %1763 = vmatprep.subr.bf16.mxu1 %v3548_v56  ;;  %v4045_v56 = vld [vmem:[%s5090_s12 + $0x10] sm:$0xff]  }
 0x3f5   : > { %v1130_v60 = vpop.f32.mrb[12].mxu0 }
 0x3f6   : > { %v1274_v61 = vpack.c.bf16 %v1130_v60, %v1130_v60  ;;  %v3964_v62 = vpop.f32.mrb[13].mxu0 }
 0x3f7   : > { %v1133_v63 = vpop.f32.mrb[14].mxu0 }
 0x3f8   : > { %1275 = vst.msk [vmem:[#allocation7] sm:$0xf] %vm697_vm4, %v1274_v61  ;;  %v3965_v0 = vpop.f32.mrb[15].mxu0 }
 0x3f9   : > { %v3541_v0 = vld [vmem:[%s5086_s8] ss:$0 sm:$0xff] }
 0x463   : > { %v1222_v2 = vpop.f32.mrb[16].mxu0 }
 0x464   : > { %v3717_v3 = vpack.c.bf16 %v1222_v2, %v1222_v2  ;;  %v3976_v4 = vpop.f32.mrb[17].mxu0 }
 0x465   : > { %v1225_v5 = vpop.f32.mrb[18].mxu0 }
 0x466   : > { %1289 = vrot.lane.b32.xlu1 %v3717_v3, %s4216_s22  ;;  %v3977_v8 = vpop.f32.mrb[19].mxu0  ;;  %v3542_v3 = vld [vmem:[%s5087_s9] ss:$0 sm:$0xff]  ;;  %v1420_v5 = vld [vmem:[%s5088_s10 + $0x90] sm:$0xff] }
 0x467   : > { %v1176_v9 = vpop.f32.mrb[12].mxu1  ;;  %v1421_v8 = vld [vmem:[%s5088_s10 + $0x98] sm:$0xff] }
 0x468   : > { %v3716_v11 = vpack.c.bf16 %v1176_v9, %v1176_v9  ;;  %v3970_v12 = vpop.f32.mrb[13].mxu1  ;;  %v1429_v9 = vld [vmem:[%s5088_s10 + $0xd8] sm:$0xff] }
 0x469   : > { %v1179_v13 = vpop.f32.mrb[14].mxu1  ;;  %v3564_v12 = vcombine.high %v1420_v5, %v1428_v6 }
 0x46a   : > { %1280 = vrot.lane.b32.xlu0 %v3716_v11, %s4217_s24  ;;  %v3971_v14 = vpop.f32.mrb[15].mxu1  ;;  %v3566_v13 = vcombine.high %v1421_v8, %v1429_v9 }
 0x46b   : > { %v1406_v14 = vld [vmem:[%s5088_s10 + $0x20] sm:$0xff] }
 0x46f   : > { %v1268_v15 = vpop.f32.mrb[16].mxu1 }
 0x470   : > { %v3718_v16 = vpack.c.bf16 %v1268_v15, %v1268_v15  ;;  %v3982_v17 = vpop.f32.mrb[17].mxu1  ;;  %v1414_v15 = vld [vmem:[%s5088_s10 + $0x60] sm:$0xff] }
 0x471   : > { %v1271_v18 = vpop.f32.mrb[18].mxu1  ;;  %v1415_v17 = vld [vmem:[%s5088_s10 + $0x68] sm:$0xff] }
 0x472   : > { %1298 = vrot.lane.b32.xlu0 %v3718_v16, %s4218_s25  ;;  %v3983_v19 = vpop.f32.mrb[19].mxu1  ;;  %v1407_v16 = vld [vmem:[%s5088_s10 + $0x28] sm:$0xff]  ;;  %v3563_v18 = vcombine.low %v1420_v5, %v1428_v6 }
 0x473   : > { %v3565_v19 = vcombine.low %v1421_v8, %v1429_v9  ;;  %v4057_v5 = vld [vmem:[%s5090_s12 + $0x28] sm:$0xff]   ;;  %v4059_v8 = vld [vmem:[%s5090_s12 + $0x70] sm:$0xff]  }
 0x474   : > { %v4058_v6 = vld [vmem:[%s5090_s12 + $0xa8] sm:$0xff]   ;;  %v4060_v9 = vld [vmem:[%s5090_s12 + $0xf0] sm:$0xff]  }
 0x4d8   : > { %v1290_v21 = vpop.permute.xlu1 %1289 }
 0x4dc   : > { %v1281_v20 = vpop.permute.xlu0 %1280 }
 0x4dd   : > { %1284 = vst.msk [vmem:[#allocation7] sm:$0xf] %vm1283_vm7, %v1281_v20  ;;  %v3552_v20 = vcombine.high %v1406_v14, %v1414_v15 }
 0x4de   : > { %1293 = vst.msk [vmem:[#allocation7] sm:$0xf] %vm1292_vm8, %v1290_v21  ;;  %v3554_v21 = vcombine.high %v1407_v16, %v1415_v17 }
 0x4e4   : > { %v1299_v1 = vpop.permute.xlu0 %1298 }
 0x4e5   : > { %1302 = vst.msk [vmem:[#allocation7] sm:$0xf] %vm1301_vm9, %v1299_v1  ;;  %v1422_v1 = vld [vmem:[%s5088_s10 + $0xa0] sm:$0xff] }
 0x4ec   : > { %v1303_v22 = vld [vmem:[#allocation7] sm:$0xf] }
 0x4ed   : > { %3989 = vmatmul.mubr.msk.bf16.vlgmr.msra.gmra.mrb[20].mxu0 %vm649_vm1, %v1303_v22  ;;  %v1430_v22 = vld [vmem:[%s5088_s10 + $0xe0] sm:$0xff] }
 0x4ee   : > { %1754 = vmatprep.mubr.bf16.mxu0 %v4219_v54 }
 0x5c0   : > { %v1364_v24 = vpop.f32.mrb[20].mxu0 }
 0x5c1   : > { %v1365_v25 = vadd.f32 %v3537_v23, %v1364_v24  ;;  %v3990_v26 = vpop.f32.mrb[21].mxu0  ;;  %v1423_v23 = vld [vmem:[%s5088_s10 + $0xa8] sm:$0xff] }
 0x5c2   : > { %v1367_v27 = vpop.f32.mrb[22].mxu0  ;;  %v1431_v24 = vld [vmem:[%s5088_s10 + $0xe8] sm:$0xff]  ;;  %v3553_v26 = vcombine.low %v1407_v16, %v1415_v17  ;;  %v4066_v16 = vld [vmem:[%s5090_s12 + $0xb8] sm:$0xff]   ;;  %v4067_v17 = vld [vmem:[%s5090_s12 + $0x140] sm:$0xff]  }
 0x5c3   : > { %v3991_v28 = vpop.f32.mrb[23].mxu0  ;;  %v1370_v29 = vadd.f32 %v1365_v25, %v4364_v7  ;;  %v1403_v7 = vld [vmem:[%s5088_s10 + $0x8] sm:$0xff]  ;;  %v3551_v25 = vcombine.low %v1406_v14, %v1414_v15  ;;  %v3568_v27 = vcombine.high %v1422_v1, %v1430_v22  ;;  %v4064_v14 = vld [vmem:[%s5090_s12 + $0xf8] sm:$0xff]  }
 0x5c4   : > { %v3545_v41 = vcombine.low %v1403_v7, %v1411_v39  ;;  %v3546_v42 = vcombine.high %v1403_v7, %v1411_v39  ;;  %v3570_v28 = vcombine.high %v1423_v23, %v1431_v24  ;;  %v1432_v7 = vld [vmem:[%s5088_s10 + $0xf0] sm:$0xff]  ;;  %v1433_v39 = vld [vmem:[%s5088_s10 + $0xf8] sm:$0xff] }
 0x5c5   : > { %v1373_v30 = vsel %vm649_vm1, %v1370_v29, 0.0  ;;  %v3574_v43 = vcombine.high %v1425_v38, %v1433_v39  ;;  %v3571_v44 = vcombine.low %v1424_v37, %v1432_v7  ;;  %v3573_v45 = vcombine.low %v1425_v38, %v1433_v39  ;;  %v4065_v15 = vld [vmem:[%s5090_s12 + $0x38] sm:$0xff]  }
 0x5c6   : > { %1374 = vadd.xlane.f32.xlu1 %v1373_v30  ;;  %1722 = vmatprep.subr.bf16.mxu0 %v3546_v42  ;;  %v1416_v30 = vld [vmem:[%s5088_s10 + $0x70] sm:$0xff]  ;;  %v3572_v42 = vcombine.high %v1424_v37, %v1432_v7 }
 0x5c7   : > { %1723 = vmatpush1.bf16.msra.mxu0 %v3545_v41 }
 0x5c8   : > { %1724 = vmatprep.subr.bf16.mxu0 %v3562_v50  ;;  %v4039_v50 = vld [vmem:[%s5090_s12 + $0x48] sm:$0xff]  }
 0x5cb   : > { %1725 = vmatpush1.bf16.msra.mxu0 %v3561_v49  ;;  %v4038_v49 = vld [vmem:[%s5090_s12 + $0x80] sm:$0xff]  }
 0x5cc   : > { %1804 = vmatprep.subr.bf16.mxu0 %v3550_v59  ;;  %v4048_v59 = vld [vmem:[%s5090_s12 + $0xd8] sm:$0xff]  }
 0x653   : > { %v1375_v31 = vpop.xlane.xlu1 %1374 }
 0x654   : > { %v1377_v32 = vmul.f32 0.03125, %v1375_v31  ;;  %v1409_v31 = vld [vmem:[%s5088_s10 + $0x38] sm:$0xff] }
 0x656   : > { %v1378_v33 = vsub.f32 %v1370_v29, %v1377_v32  ;;  %v1408_v29 = vld [vmem:[%s5088_s10 + $0x30] sm:$0xff]  ;;  %v1417_v32 = vld [vmem:[%s5088_s10 + $0x78] sm:$0xff] }
 0x657   : > { %v3558_v36 = vcombine.high %v1409_v31, %v1417_v32  ;;  %v3555_v40 = vcombine.low %v1408_v29, %v1416_v30  ;;  %v3557_v41 = vcombine.low %v1409_v31, %v1417_v32 }
 0x658   : > { %v1379_v34 = vmul.f32 %v1378_v33, %v1378_v33 }
 0x65a   : > { %v1380_v35 = vsel %vm649_vm1, %v1379_v34, 0.0  ;;  %v3569_v34 = vcombine.low %v1423_v23, %v1431_v24 }
 0x65b   : > { %1381 = vadd.xlane.f32.xlu0 %v1380_v35  ;;  %v3556_v35 = vcombine.high %v1408_v29, %v1416_v30 }
 0x6e8   : > { %v1382_v60 = vpop.xlane.xlu0 %1381 }
 0x6e9   : > { %v1383_v61 = vmul.f32 0.03125, %v1382_v60  ;;  %v4049_v60 = vld [vmem:[%s5090_s12 + $0x18] sm:$0xff]  }
 0x6eb   : > { %v1384_v62 = vadd.f32 1e-05, %v1383_v61  ;;  %v4050_v61 = vld [vmem:[%s5090_s12 + $0x98] sm:$0xff]  }
 0x6ed   : > { %4179 = vrsqrt.f32 %v1384_v62  ;;  %v4051_v62 = vld [vmem:[%s5090_s12 + $0x60] sm:$0xff]  }
 0x6f7   : > { %v4180_v63 = vpop.eup %4179 }
 0x6f8   : > { %v1386_v2 = vmul.f32 %v4180_v63, %v1378_v33  ;;  %v3567_v33 = vcombine.low %v1422_v1, %v1430_v22  ;;  %v4052_v63 = vld [vmem:[%s5090_s12 + $0xe0] sm:$0xff]   ;;  %v4693_v1 = vld [vmem:[%s5089_s11 + $0x8] sm:$0xff] }
 0x6fa   : > { %v1393_v4 = vmul.f32 %v3541_v0, %v1386_v2  ;;  %v4053_v0 = vld [vmem:[%s5090_s12 + $0x20] sm:$0xff]  }
 0x6fb   : > { %v4054_v2 = vld [vmem:[%s5090_s12 + $0xa0] sm:$0xff]  }
 0x6fc   : > { %v4509_v10 = vadd.f32 %v3542_v3, %v1393_v4  ;;  %v4055_v3 = vld [vmem:[%s5090_s12 + $0x68] sm:$0xff]  }
 0x6fd   : > { %v4056_v4 = vld [vmem:[%s5090_s12 + $0xe8] sm:$0xff]  }
 0x6fe   : > { %v4513_v11 = vpack.c.bf16 %v4509_v10, %v4509_v10 }
 0x700   : > { %3575 = vmatmul.mubr.msk.bf16.vlgmr.msra.gmra.mrb[20].mxu1 %vm649_vm1, %v4513_v11  ;;  %3576 = vmatmul.mubr.msk.bf16.vlgmr.msra.gmra.mrb[24].mxu0 %vm649_vm1, %v4513_v11 }
 0x701   : > { %1764 = vmatpush1.bf16.msra.mxu1 %v3547_v55  ;;  %1805 = vmatpush1.bf16.msra.mxu0 %v3549_v58  ;;  %v4044_v55 = vld [vmem:[%s5090_s12 + $0xd0] sm:$0xff]   ;;  %v4047_v58 = vld [vmem:[%s5090_s12 + $0x58] sm:$0xff]  }
 0x702   : > { %1765 = vmatprep.subr.bf16.mxu1 %v3564_v12  ;;  %1806 = vmatprep.subr.bf16.mxu0 %v3566_v13  ;;  %v4062_v12 = vld [vmem:[%s5090_s12 + $0xb0] sm:$0xff]   ;;  %v4063_v13 = vld [vmem:[%s5090_s12 + $0x78] sm:$0xff]  }
 0x703   : > { %1795 = vmatprep.mubr.bf16.mxu1 %v4219_v54  ;;  %1836 = vmatprep.mubr.bf16.mxu0 %v4219_v54 }
 0x705   : > { %1766 = vmatpush1.bf16.msra.mxu1 %v3563_v18  ;;  %1807 = vmatpush1.bf16.msra.mxu0 %v3565_v19  ;;  %v4068_v18 = vld [vmem:[%s5090_s12 + $0x1c0] sm:$0xff]   ;;  %v1438_v19 = vlaneseq }
 0x706   : > { %1845 = vmatprep.subr.bf16.mxu1 %v3552_v20  ;;  %1886 = vmatprep.subr.bf16.mxu0 %v3554_v21 }
 0x707   : > { %v4687_v20 = vshrl.u32 %v1438_v19, 7  ;;  %v4078_v19 = vld [vmem:[%s5090_s12 + $0x190] sm:$0xff]  }
 0x708   : > { %3577 = vmatmul.mubr.msk.bf16.vlgmr.msra.gmra.mrb[24].mxu1 %vm649_vm1, %v4513_v11  ;;  %3578 = vmatmul.mubr.msk.bf16.vlgmr.msra.gmra.mrb[28].mxu0 %vm649_vm1, %v4513_v11 }
 0x709   : > { %1846 = vmatpush1.bf16.msra.mxu1 %v3551_v25  ;;  %1887 = vmatpush1.bf16.msra.mxu0 %v3553_v26  ;;  %v1464_v21 = vsub.s32 6, %v4687_v20  ;;  %v1440_v23 = vsub.s32 0, %v4687_v20  ;;  %v1448_v24 = vsub.s32 2, %v4687_v20  ;;  %v4705_v25 = vld [vmem:[%s5089_s11] sm:$0xff]  ;;  %v1444_v26 = vsub.s32 1, %v4687_v20 }
 0x70a   : > { %1847 = vmatprep.subr.bf16.mxu1 %v3568_v27  ;;  %1888 = vmatprep.subr.bf16.mxu0 %v3570_v28  ;;  %v1452_v27 = vsub.s32 3, %v4687_v20 }
 0x70b   : > { %1877 = vmatprep.mubr.bf16.mxu1 %v4219_v54  ;;  %1918 = vmatprep.mubr.bf16.mxu0 %v4219_v54  ;;  %v4698_v22 = vrot.slane %v4693_v1, %v1464_v21  ;;  %v1441_v28 = vrot.slane %v4705_v25, %v1440_v23  ;;  %v1449_v29 = vrot.slane %v4705_v25, %v1448_v24 }
 0x70c   : > { %v1445_v30 = vrot.slane %v4705_v25, %v1444_v26  ;;  %v1453_v31 = vrot.slane %v4705_v25, %v1452_v27 }
 0x70d   : > { %1848 = vmatpush1.bf16.msra.mxu1 %v3567_v33  ;;  %1889 = vmatpush1.bf16.msra.mxu0 %v3569_v34 }
 0x70e   : > { %1927 = vmatprep.subr.bf16.mxu1 %v3556_v35  ;;  %1968 = vmatprep.subr.bf16.mxu0 %v3558_v36 }
 0x710   : > { %3579 = vmatmul.mubr.msk.bf16.vlgmr.msra.gmra.mrb[28].mxu1 %vm649_vm1, %v4513_v11  ;;  %3580 = vmatmul.mubr.msk.bf16.vlgmr.msra.gmra.mrb[32].mxu0 %vm649_vm1, %v4513_v11 }
 0x711   : > { %1928 = vmatpush1.bf16.msra.mxu1 %v3555_v40  ;;  %1969 = vmatpush1.bf16.msra.mxu0 %v3557_v41  ;;  %v1460_v41 = vsub.s32 5, %v4687_v20 }
 0x712   : > { %1929 = vmatprep.subr.bf16.mxu1 %v3572_v42  ;;  %1970 = vmatprep.subr.bf16.mxu0 %v3574_v43  ;;  %v1468_v42 = vsub.s32 7, %v4687_v20 }
 0x713   : > { %1959 = vmatprep.mubr.bf16.mxu1 %v4219_v54  ;;  %2000 = vmatprep.mubr.bf16.mxu0 %v4219_v54  ;;  %v4043_v54 = vld [vmem:[%s5090_s12 + $0x50] sm:$0xff]  }
 0x715   : > { %1930 = vmatpush1.bf16.msra.mxu1 %v3571_v44  ;;  %1971 = vmatpush1.bf16.msra.mxu0 %v3573_v45 }
 0x716   : > { %3744 = vmatprep.subr.bf16.mxu1 %v4035_v46  ;;  %3766 = vmatprep.subr.bf16.mxu0 %v4036_v47 }
 0x718   : > { %3581 = vmatmul.mubr.msk.bf16.vlgmr.msra.gmra.mrb[32].mxu1 %vm649_vm1, %v4513_v11  ;;  %3582 = vmatmul.mubr.msk.bf16.vlgmr.msra.gmra.mrb[36].mxu0 %vm649_vm1, %v4513_v11  ;;  %v4061_v11 = vld [vmem:[%s5090_s12 + $0x30] sm:$0xff]  }
 0x719   : > { %3745 = vmatpush3.bf16.msra.mxu1 %v4037_v48  ;;  %3767 = vmatpush3.bf16.msra.mxu0 %v4038_v49 }
 0x71a   : > { %3746 = vmatprep.subr.bf16.mxu1 %v4039_v50  ;;  %3768 = vmatprep.subr.bf16.mxu0 %v4040_v51  ;;  %v1461_v51 = vrot.slane %v4705_v25, %v1460_v41 }
 0x71d   : > { %3747 = vmatpush3.bf16.msra.mxu1 %v4041_v52  ;;  %3769 = vmatpush3.bf16.msra.mxu0 %v4042_v53  ;;  %v1469_v52 = vrot.slane %v4705_v25, %v1468_v42  ;;  %v4069_v53 = vld [vmem:[%s5090_s12 + $0x100] sm:$0xff]  }
 0x71e   : > { %3748 = vmatprep.subr.bf16.mxu1 %v4043_v54  ;;  %3770 = vmatprep.subr.bf16.mxu0 %v4044_v55  ;;  %v4070_v54 = vld [vmem:[%s5090_s12 + $0x180] sm:$0xff]  }
 0x721   : > { %3749 = vmatpush3.bf16.msra.mxu1 %v4045_v56  ;;  %3771 = vmatpush3.bf16.msra.mxu0 %v4046_v57  ;;  %v4071_v57 = vld [vmem:[%s5090_s12 + $0x148] sm:$0xff]  }
 0x722   : > { %3750 = vmatprep.subr.bf16.mxu1 %v4047_v58  ;;  %3772 = vmatprep.subr.bf16.mxu0 %v4048_v59  ;;  %v4072_v58 = vld [vmem:[%s5090_s12 + $0x1c8] sm:$0xff]  }
 0x725   : > { %3751 = vmatpush3.bf16.msra.mxu1 %v4049_v60  ;;  %3773 = vmatpush3.bf16.msra.mxu0 %v4050_v61 }
 0x726   : > { %3752 = vmatprep.subr.bf16.mxu1 %v4051_v62  ;;  %3774 = vmatprep.subr.bf16.mxu0 %v4052_v63 }
 0x729   : > { %3753 = vmatpush3.bf16.msra.mxu1 %v4053_v0  ;;  %3775 = vmatpush3.bf16.msra.mxu0 %v4054_v2 }
 0x72a   : > { %3754 = vmatprep.subr.bf16.mxu1 %v4055_v3  ;;  %3776 = vmatprep.subr.bf16.mxu0 %v4056_v4  ;;  %v4073_v4 = vld [vmem:[%s5090_s12 + $0x108] sm:$0xff]  }
 0x72d   : > { %3755 = vmatpush3.bf16.msra.mxu1 %v4057_v5  ;;  %3777 = vmatpush3.bf16.msra.mxu0 %v4058_v6  ;;  %v4074_v5 = vld [vmem:[%s5090_s12 + $0x188] sm:$0xff]  }
 0x72e   : > { %3756 = vmatprep.subr.bf16.mxu1 %v4059_v8  ;;  %3778 = vmatprep.subr.bf16.mxu0 %v4060_v9  ;;  %v4075_v9 = vld [vmem:[%s5090_s12 + $0x150] sm:$0xff]  }
 0x731   : > { %3757 = vmatpush3.bf16.msra.mxu1 %v4061_v11  ;;  %3779 = vmatpush3.bf16.msra.mxu0 %v4062_v12  ;;  %v4076_v11 = vld [vmem:[%s5090_s12 + $0x1d0] sm:$0xff]  }
 0x732   : > { %3758 = vmatprep.subr.bf16.mxu1 %v4063_v13  ;;  %3780 = vmatprep.subr.bf16.mxu0 %v4064_v14  ;;  %v1473_v14 = vrot.slane %v4693_v1, %v1440_v23  ;;  %v4079_v23 = vld [vmem:[%s5090_s12 + $0x158] sm:$0xff]  }
 0x735   : > { %3759 = vmatpush3.bf16.msra.mxu1 %v4065_v15  ;;  %3781 = vmatpush3.bf16.msra.mxu0 %v4066_v16  ;;  %v1481_v15 = vrot.slane %v4693_v1, %v1448_v24  ;;  %v4080_v24 = vld [vmem:[%s5090_s12 + $0x1d8] sm:$0xff]  }
 0x736   : > { %3788 = vmatprep.subr.bf16.mxu1 %v4067_v17  ;;  %3810 = vmatprep.subr.bf16.mxu0 %v4068_v18  ;;  %v4077_v18 = vld [vmem:[%s5090_s12 + $0x110] sm:$0xff]  }
 0x7d3   : > { %v1715_v32 = vpop.f32.mrb[20].mxu1  ;;  %v1756_v33 = vpop.f32.mrb[24].mxu0 }
 0x7d4   : > { %v1716_v34 = vadd.f32 %v1715_v32, %v1441_v28  ;;  %v1757_v35 = vadd.f32 %v1756_v33, %v1449_v29  ;;  %v1717_v36 = vpop.f32.mrb[21].mxu1  ;;  %v1758_v37 = vpop.f32.mrb[25].mxu0 }
 0x7d5   : > { %v1718_v7 = vadd.f32 %v1717_v36, %v1445_v30  ;;  %v1759_v38 = vadd.f32 %v1758_v37, %v1453_v31  ;;  %v1719_v39 = vpop.f32.mrb[22].mxu1  ;;  %v1760_v40 = vpop.f32.mrb[26].mxu0  ;;  %v4081_v36 = vld [vmem:[%s5090_s12 + $0x118] sm:$0xff]  }
 0x7d6   : > { %v2009_v43 = vmax.f32 %v1716_v34, 0.0  ;;  %v2011_v44 = vmax.f32 %v1757_v35, 0.0  ;;  %v1720_v45 = vpop.f32.mrb[23].mxu1  ;;  %v1761_v46 = vpop.f32.mrb[27].mxu0  ;;  %v4082_v37 = vld [vmem:[%s5090_s12 + $0x198] sm:$0xff]   ;;  %v4083_v40 = vld [vmem:[%s5090_s12 + $0x160] sm:$0xff]  }
 0x7d7   : > { %v2010_v47 = vmax.f32 %v1718_v7, 0.0  ;;  %v2012_v48 = vmax.f32 %v1759_v38, 0.0  ;;  %v1456_v7 = vsub.s32 4, %v4687_v20  ;;  %v4085_v45 = vld [vmem:[%s5090_s12 + $0x120] sm:$0xff]   ;;  %v4128_v20 = vld [vmem:[%s5090_s12 + $0x2f8] sm:$0xff]  }
 0x7d8   : > { %v2025_v55 = vpack.c.bf16 %v2009_v43, %v2009_v43  ;;  %v2027_v56 = vpack.c.bf16 %v2011_v44, %v2011_v44  ;;  %v4084_v43 = vld [vmem:[%s5090_s12 + $0x1e0] sm:$0xff]  }
 0x7d9   : > { %v2026_v49 = vpack.c.bf16 %v2010_v47, %v2010_v47  ;;  %v2028_v50 = vpack.c.bf16 %v2012_v48, %v2012_v48  ;;  %v1489_v44 = vrot.slane %v4693_v1, %v1456_v7  ;;  %v4086_v46 = vld [vmem:[%s5090_s12 + $0x1a0] sm:$0xff]   ;;  %v4087_v47 = vld [vmem:[%s5090_s12 + $0x168] sm:$0xff]  }
 0x7da   : > { %v4088_v48 = vld [vmem:[%s5090_s12 + $0x1e8] sm:$0xff]  }
 0x7db   : > { %v4737_v59 = vpop.f32.mrb[24].mxu1  ;;  %v4739_v60 = vpop.f32.mrb[28].mxu0  ;;  %3104 = vmatprep.mubr.bf16.mxu1 %v2026_v49  ;;  %3144 = vmatprep.mubr.bf16.mxu0 %v2028_v50 }
 0x7dc   : > { %v1799_v61 = vpop.f32.mrb[25].mxu1  ;;  %v1840_v62 = vpop.f32.mrb[29].mxu0  ;;  %3105 = vmatmul.mubr.bf16.vlgmr.msra.gmra.mrb[36].mxu1 %v2025_v55  ;;  %3145 = vmatmul.mubr.bf16.vlgmr.msra.gmra.mrb[40].mxu0 %v2027_v56 }
 0x7dd   : > { %v1800_v63 = vadd.f32 %v1799_v61, %v1461_v51  ;;  %v1841_v0 = vadd.f32 %v1840_v62, %v1469_v52  ;;  %3789 = vmatpush3.bf16.msra.mxu1 %v4069_v53  ;;  %3811 = vmatpush3.bf16.msra.mxu0 %v4070_v54  ;;  %v1801_v2 = vpop.f32.mrb[26].mxu1  ;;  %v1842_v3 = vpop.f32.mrb[30].mxu0  ;;  %v1457_v61 = vrot.slane %v4705_v25, %v1456_v7  ;;  %v4110_v7 = vld [vmem:[%s5090_s12 + $0x290] sm:$0xff]  }
 0x7de   : > { %v1802_v6 = vpop.f32.mrb[27].mxu1  ;;  %v1843_v8 = vpop.f32.mrb[31].mxu0  ;;  %3790 = vmatprep.subr.bf16.mxu1 %v4071_v57  ;;  %3812 = vmatprep.subr.bf16.mxu0 %v4072_v58  ;;  %v4089_v57 = vld [vmem:[%s5090_s12 + $0x128] sm:$0xff]   ;;  %v4092_v2 = vld [vmem:[%s5090_s12 + $0x1f0] sm:$0xff]   ;;  %v1477_v3 = vrot.slane %v4693_v1, %v1444_v26  ;;  %v4095_v26 = vld [vmem:[%s5090_s12 + $0x178] sm:$0xff]  }
 0x7df   : > { %v2014_v12 = vmax.f32 %v1800_v63, 0.0  ;;  %v2016_v13 = vmax.f32 %v1841_v0, 0.0  ;;  %v4090_v58 = vld [vmem:[%s5090_s12 + $0x1a8] sm:$0xff]   ;;  %v4091_v0 = vld [vmem:[%s5090_s12 + $0x170] sm:$0xff]  }
 0x7e1   : > { %v2030_v16 = vpack.c.bf16 %v2014_v12, %v2014_v12  ;;  %v2032_v17 = vpack.c.bf16 %v2016_v13, %v2016_v13  ;;  %3791 = vmatpush3.bf16.msra.mxu1 %v4073_v4  ;;  %3813 = vmatpush3.bf16.msra.mxu0 %v4074_v5  ;;  %v4094_v4 = vld [vmem:[%s5090_s12 + $0x1b0] sm:$0xff]   ;;  %v1798_v5 = vadd.f32 %v4737_v59, %v1457_v61  ;;  %v4097_v59 = vld [vmem:[%s5090_s12 + $0x138] sm:$0xff]   ;;  %v4099_v13 = vld [vmem:[%s5090_s12 + $0x240] sm:$0xff]  }
 0x7e2   : > { %3792 = vmatprep.subr.bf16.mxu1 %v4075_v9  ;;  %3814 = vmatprep.subr.bf16.mxu0 %v4076_v11  ;;  %v1501_v61 = vrot.slane %v4693_v1, %v1468_v42  ;;  %v4129_v42 = vld [vmem:[%s5090_s12 + $0x238] sm:$0xff]  }
 0x7e3   : > { %v1879_v28 = vpop.f32.mrb[28].mxu1  ;;  %v1920_v29 = vpop.f32.mrb[32].mxu0  ;;  %3184 = vmatprep.mubr.bf16.mxu1 %v2030_v16  ;;  %3224 = vmatprep.mubr.bf16.mxu0 %v2032_v17  ;;  %v2013_v11 = vmax.f32 %v1798_v5, 0.0  ;;  %v4101_v17 = vld [vmem:[%s5090_s12 + $0x200] sm:$0xff]  }
 0x7e4   : > { %v4767_v30 = vadd.f32 %v1879_v28, %v1473_v14  ;;  %v4769_v31 = vadd.f32 %v1920_v29, %v1481_v15  ;;  %v1881_v32 = vpop.f32.mrb[29].mxu1  ;;  %v1922_v33 = vpop.f32.mrb[33].mxu0  ;;  %v4100_v14 = vld [vmem:[%s5090_s12 + $0x2c0] sm:$0xff]   ;;  %v4103_v28 = vld [vmem:[%s5090_s12 + $0x248] sm:$0xff]  }
 0x7e5   : > { %3793 = vmatpush3.bf16.msra.mxu1 %v4077_v18  ;;  %3815 = vmatpush3.bf16.msra.mxu0 %v4078_v19  ;;  %v1883_v34 = vpop.f32.mrb[30].mxu1  ;;  %v1924_v35 = vpop.f32.mrb[34].mxu0  ;;  %v1882_v8 = vadd.f32 %v1881_v32, %v1477_v3  ;;  %v2029_v18 = vpack.c.bf16 %v2013_v11, %v2013_v11  ;;  %v4104_v29 = vld [vmem:[%s5090_s12 + $0x2c8] sm:$0xff]   ;;  %v4131_v3 = vld [vmem:[%s5090_s12 + $0x340] sm:$0xff]   ;;  %v4140_v11 = vld [vmem:[%s5090_s12 + $0x3d0] sm:$0xff]  }
 0x7e6   : > { %v1884_v38 = vpop.f32.mrb[31].mxu1  ;;  %v1925_v39 = vpop.f32.mrb[35].mxu0  ;;  %3794 = vmatprep.subr.bf16.mxu1 %v4079_v23  ;;  %3816 = vmatprep.subr.bf16.mxu0 %v4080_v24  ;;  %v4102_v23 = vld [vmem:[%s5090_s12 + $0x280] sm:$0xff]   ;;  %v4106_v34 = vld [vmem:[%s5090_s12 + $0x288] sm:$0xff]   ;;  %v4107_v35 = vld [vmem:[%s5090_s12 + $0x250] sm:$0xff]  }
 0x7e7   : > { %v2018_v15 = vmax.f32 %v1882_v8, 0.0  ;;  %v4111_v38 = vld [vmem:[%s5090_s12 + $0x258] sm:$0xff]   ;;  %v4134_v5 = vld [vmem:[%s5090_s12 + $0x380] sm:$0xff]  }
 0x7e8   : > { %v4112_v39 = vld [vmem:[%s5090_s12 + $0x2d8] sm:$0xff]  }
 0x7e9   : > { %3795 = vmatpush3.bf16.msra.mxu1 %v4081_v36  ;;  %3817 = vmatpush3.bf16.msra.mxu0 %v4082_v37  ;;  %v2034_v24 = vpack.c.bf16 %v2018_v15, %v2018_v15  ;;  %v4108_v36 = vld [vmem:[%s5090_s12 + $0x2d0] sm:$0xff]   ;;  %v4144_v15 = vld [vmem:[%s5090_s12 + $0x3d8] sm:$0xff]  }
 0x7ea   : > { %3796 = vmatprep.subr.bf16.mxu1 %v4083_v40  ;;  %3818 = vmatprep.subr.bf16.mxu0 %v4084_v43  ;;  %v4109_v37 = vld [vmem:[%s5090_s12 + $0x210] sm:$0xff]   ;;  %v4113_v40 = vld [vmem:[%s5090_s12 + $0x218] sm:$0xff]  }
 0x7eb   : > { %v1961_v49 = vpop.f32.mrb[32].mxu1  ;;  %v2002_v50 = vpop.f32.mrb[36].mxu0  ;;  %v4114_v43 = vld [vmem:[%s5090_s12 + $0x298] sm:$0xff]  }
 0x7ec   : > { %v4797_v51 = vadd.f32 %v1961_v49, %v1489_v44  ;;  %v4800_v52 = vadd.f32 %v2002_v50, %v4698_v22  ;;  %v4802_v53 = vpop.f32.mrb[33].mxu1  ;;  %v4804_v54 = vpop.f32.mrb[37].mxu0  ;;  %v1465_v22 = vrot.slane %v4705_v25, %v1464_v21  ;;  %v1485_v21 = vrot.slane %v4693_v1, %v1452_v27  ;;  %v4093_v25 = vld [vmem:[%s5090_s12 + $0x130] sm:$0xff]   ;;  %v4096_v27 = vld [vmem:[%s5090_s12 + $0x1f8] sm:$0xff]   ;;  %v4115_v44 = vld [vmem:[%s5090_s12 + $0x260] sm:$0xff]  }
 0x7ed   : > { %3797 = vmatpush3.bf16.msra.mxu1 %v4085_v45  ;;  %3819 = vmatpush3.bf16.msra.mxu0 %v4086_v46  ;;  %v1965_v55 = vpop.f32.mrb[34].mxu1  ;;  %v2006_v56 = vpop.f32.mrb[38].mxu0  ;;  %v4116_v45 = vld [vmem:[%s5090_s12 + $0x2e0] sm:$0xff]   ;;  %v4120_v49 = vld [vmem:[%s5090_s12 + $0x2e8] sm:$0xff]  }
 0x7ee   : > { %v1966_v62 = vpop.f32.mrb[35].mxu1  ;;  %v2007_v63 = vpop.f32.mrb[39].mxu0  ;;  %3798 = vmatprep.subr.bf16.mxu1 %v4087_v47  ;;  %3820 = vmatprep.subr.bf16.mxu0 %v4088_v48  ;;  %v1839_v6 = vadd.f32 %v4739_v60, %v1465_v22  ;;  %v1923_v9 = vadd.f32 %v1922_v33, %v1485_v21  ;;  %v4098_v60 = vld [vmem:[%s5090_s12 + $0x1b8] sm:$0xff]   ;;  %v4105_v33 = vld [vmem:[%s5090_s12 + $0x208] sm:$0xff]   ;;  %v4117_v46 = vld [vmem:[%s5090_s12 + $0x220] sm:$0xff]  }
 0x7ef   : > { %v4118_v47 = vld [vmem:[%s5090_s12 + $0x2a0] sm:$0xff]   ;;  %v4119_v48 = vld [vmem:[%s5090_s12 + $0x268] sm:$0xff]   ;;  %v4123_v56 = vld [vmem:[%s5090_s12 + $0x270] sm:$0xff]  }
 0x7f0   : > { %v2015_v12 = vmax.f32 %v1839_v6, 0.0  ;;  %v2020_v16 = vmax.f32 %v1923_v9, 0.0  ;;  %v4121_v50 = vld [vmem:[%s5090_s12 + $0x228] sm:$0xff]   ;;  %v4125_v22 = vld [vmem:[%s5090_s12 + $0x230] sm:$0xff]   ;;  %v4127_v63 = vld [vmem:[%s5090_s12 + $0x278] sm:$0xff]  }
 0x7f1   : > { %3799 = vmatpush3.bf16.msra.mxu1 %v4089_v57  ;;  %3821 = vmatpush3.bf16.msra.mxu0 %v4090_v58  ;;  %v4122_v55 = vld [vmem:[%s5090_s12 + $0x2a8] sm:$0xff]   ;;  %v4124_v57 = vld [vmem:[%s5090_s12 + $0x2f0] sm:$0xff]   ;;  %v1493_v58 = vrot.slane %v4693_v1, %v1460_v41  ;;  %v2005_v41 = vadd.f32 %v4804_v54, %v1501_v61  ;;  %v4132_v54 = vld [vmem:[%s5090_s12 + $0x3c0] sm:$0xff]  }
 0x7f2   : > { %3800 = vmatprep.subr.bf16.mxu1 %v4091_v0  ;;  %3822 = vmatprep.subr.bf16.mxu0 %v4092_v2  ;;  %v2031_v19 = vpack.c.bf16 %v2015_v12, %v2015_v12  ;;  %v2036_v32 = vpack.c.bf16 %v2020_v16, %v2020_v16  ;;  %v4126_v62 = vld [vmem:[%s5090_s12 + $0x2b0] sm:$0xff]   ;;  %v2017_v0 = vmax.f32 %v4767_v30, 0.0  ;;  %v4130_v2 = vld [vmem:[%s5090_s12 + $0x2b8] sm:$0xff]   ;;  %v4133_v30 = vld [vmem:[%s5090_s12 + $0x300] sm:$0xff]  }
 0x7f3   : > { %v1964_v1 = vadd.f32 %v4802_v53, %v1493_v58  ;;  %v2019_v53 = vmax.f32 %v4769_v31, 0.0  ;;  %v4135_v6 = vld [vmem:[%s5090_s12 + $0x348] sm:$0xff]   ;;  %v4141_v12 = vld [vmem:[%s5090_s12 + $0x310] sm:$0xff]   ;;  %v4145_v16 = vld [vmem:[%s5090_s12 + $0x318] sm:$0xff]  }
 0x7f4   : > { %v4137_v9 = vld [vmem:[%s5090_s12 + $0x308] sm:$0xff]  }
 0x7f5   : > { %3801 = vmatpush3.bf16.msra.mxu1 %v4093_v25  ;;  %3823 = vmatpush3.bf16.msra.mxu0 %v4094_v4  ;;  %v2022_v21 = vmax.f32 %v1964_v1, 0.0  ;;  %v2024_v25 = vmax.f32 %v2005_v41, 0.0  ;;  %v2033_v4 = vpack.c.bf16 %v2017_v0, %v2017_v0  ;;  %v2035_v31 = vpack.c.bf16 %v2019_v53, %v2019_v53 }
 0x7f6   : > { %3802 = vmatprep.subr.bf16.mxu1 %v4095_v26  ;;  %3824 = vmatprep.subr.bf16.mxu0 %v4096_v27  ;;  %v4136_v27 = vld [vmem:[%s5090_s12 + $0x3c8] sm:$0xff]  }
 0x7f7   : > { %v2038_v26 = vpack.c.bf16 %v2022_v21, %v2022_v21  ;;  %v2040_v8 = vpack.c.bf16 %v2024_v25, %v2024_v25 }
 0x7f9   : > { %3803 = vmatpush3.bf16.msra.mxu1 %v4097_v59  ;;  %3825 = vmatpush3.bf16.msra.mxu0 %v4098_v60  ;;  %v4138_v59 = vld [vmem:[%s5090_s12 + $0x388] sm:$0xff]   ;;  %v4139_v60 = vld [vmem:[%s5090_s12 + $0x350] sm:$0xff]  }
 0x7fa   : > { %3832 = vmatprep.subr.bf16.mxu1 %v4099_v13  ;;  %3854 = vmatprep.subr.bf16.mxu0 %v4100_v14  ;;  %v4142_v13 = vld [vmem:[%s5090_s12 + $0x390] sm:$0xff]   ;;  %v4143_v14 = vld [vmem:[%s5090_s12 + $0x358] sm:$0xff]  }
 0x7fc   : > { %3185 = vmatmul.mubr.bf16.vlgmr.msra.gmra.mrb[40].mxu1 %v2029_v18  ;;  %3225 = vmatmul.mubr.bf16.vlgmr.msra.gmra.mrb[44].mxu0 %v2031_v19  ;;  %v4147_v18 = vld [vmem:[%s5090_s12 + $0x360] sm:$0xff]  }
 0x7fd   : > { %3833 = vmatpush3.bf16.msra.mxu1 %v4101_v17  ;;  %3264 = vmatprep.mubr.bf16.mxu1 %v2034_v24  ;;  %v4146_v17 = vld [vmem:[%s5090_s12 + $0x398] sm:$0xff]   ;;  %v4148_v19 = vld [vmem:[%s5090_s12 + $0x3e0] sm:$0xff]  }
 0x7fe   : > { %3855 = vmatpush3.bf16.msra.mxu0 %v4102_v23  ;;  %3304 = vmatprep.mubr.bf16.mxu0 %v2036_v32  ;;  %v4149_v23 = vld [vmem:[%s5090_s12 + $0x320] sm:$0xff]   ;;  %v4153_v32 = vld [vmem:[%s5090_s12 + $0x328] sm:$0xff]  }
 0x7ff   : > { %3834 = vmatprep.subr.bf16.mxu1 %v4103_v28  ;;  %3856 = vmatprep.subr.bf16.mxu0 %v4104_v29  ;;  %v4150_v24 = vld [vmem:[%s5090_s12 + $0x3a0] sm:$0xff]   ;;  %v4151_v28 = vld [vmem:[%s5090_s12 + $0x368] sm:$0xff]  }
 0x800   : > { %v4152_v29 = vld [vmem:[%s5090_s12 + $0x3e8] sm:$0xff]  }
 0x801   : > { %3835 = vmatpush3.bf16.msra.mxu1 %v4105_v33  ;;  %v4154_v33 = vld [vmem:[%s5090_s12 + $0x3a8] sm:$0xff]  }
 0x802   : > { %3857 = vmatpush3.bf16.msra.mxu0 %v4106_v34  ;;  %3836 = vmatprep.subr.bf16.mxu1 %v4107_v35  ;;  %v4155_v34 = vld [vmem:[%s5090_s12 + $0x370] sm:$0xff]  }
 0x803   : > { %3858 = vmatprep.subr.bf16.mxu0 %v4108_v36  ;;  %v4156_v35 = vld [vmem:[%s5090_s12 + $0x3f0] sm:$0xff]  }
 0x804   : > { %v4157_v36 = vld [vmem:[%s5090_s12 + $0x330] sm:$0xff]  }
 0x805   : > { %3837 = vmatpush3.bf16.msra.mxu1 %v4109_v37  ;;  %v4158_v37 = vld [vmem:[%s5090_s12 + $0x3b0] sm:$0xff]  }
 0x806   : > { %3859 = vmatpush3.bf16.msra.mxu0 %v4110_v7  ;;  %3838 = vmatprep.subr.bf16.mxu1 %v4111_v38  ;;  %v4159_v7 = vld [vmem:[%s5090_s12 + $0x378] sm:$0xff]  }
 0x807   : > { %3860 = vmatprep.subr.bf16.mxu0 %v4112_v39  ;;  %v4160_v38 = vld [vmem:[%s5090_s12 + $0x3f8] sm:$0xff]  }
 0x808   : > { %v4161_v39 = vld [vmem:[%s5090_s12 + $0x338] sm:$0xff]  }
 0x809   : > { %3839 = vmatpush3.bf16.msra.mxu1 %v4113_v40  ;;  %v2021_v40 = vmax.f32 %v4797_v51, 0.0  ;;  %v3583_v51 = vld [vmem:[%s5091_s13] ss:$0 sm:$0xff] }
 0x80a   : > { %3861 = vmatpush3.bf16.msra.mxu0 %v4114_v43  ;;  %3840 = vmatprep.subr.bf16.mxu1 %v4115_v44  ;;  %v4162_v43 = vld [vmem:[%s5090_s12 + $0x3b8] sm:$0xff]   ;;  %v2023_v44 = vmax.f32 %v4800_v52, 0.0 }
 0x80b   : > { %3862 = vmatprep.subr.bf16.mxu0 %v4116_v45  ;;  %v2037_v45 = vpack.c.bf16 %v2021_v40, %v2021_v40 }
 0x80d   : > { %3841 = vmatpush3.bf16.msra.mxu1 %v4117_v46  ;;  %v2039_v46 = vpack.c.bf16 %v2023_v44, %v2023_v44 }
 0x80e   : > { %3863 = vmatpush3.bf16.msra.mxu0 %v4118_v47  ;;  %3842 = vmatprep.subr.bf16.mxu1 %v4119_v48 }
 0x80f   : > { %3864 = vmatprep.subr.bf16.mxu0 %v4120_v49 }
 0x811   : > { %3843 = vmatpush3.bf16.msra.mxu1 %v4121_v50 }
 0x812   : > { %3865 = vmatpush3.bf16.msra.mxu0 %v4122_v55  ;;  %3844 = vmatprep.subr.bf16.mxu1 %v4123_v56 }
 0x813   : > { %3866 = vmatprep.subr.bf16.mxu0 %v4124_v57 }
 0x815   : > { %3845 = vmatpush3.bf16.msra.mxu1 %v4125_v22 }
 0x816   : > { %3867 = vmatpush3.bf16.msra.mxu0 %v4126_v62  ;;  %3846 = vmatprep.subr.bf16.mxu1 %v4127_v63 }
 0x817   : > { %3868 = vmatprep.subr.bf16.mxu0 %v4128_v20 }
 0x819   : > { %3847 = vmatpush3.bf16.msra.mxu1 %v4129_v42 }
 0x81a   : > { %3869 = vmatpush3.bf16.msra.mxu0 %v4130_v2  ;;  %3876 = vmatprep.subr.bf16.mxu1 %v4131_v3 }
 0x81b   : > { %3898 = vmatprep.subr.bf16.mxu0 %v4132_v54 }
 0x81c   : > { %3265 = vmatmul.mubr.bf16.vlgmr.msra.gmra.mrb[44].mxu1 %v2033_v4 }
 0x81d   : > { %3305 = vmatmul.mubr.bf16.vlgmr.msra.gmra.mrb[48].mxu0 %v2035_v31  ;;  %3877 = vmatpush3.bf16.msra.mxu1 %v4133_v30 }
 0x81e   : > { %3344 = vmatprep.mubr.bf16.mxu1 %v2038_v26  ;;  %3899 = vmatpush3.bf16.msra.mxu0 %v4134_v5 }
 0x81f   : > { %3384 = vmatprep.mubr.bf16.mxu0 %v2040_v8  ;;  %3878 = vmatprep.subr.bf16.mxu1 %v4135_v6 }
 0x820   : > { %3900 = vmatprep.subr.bf16.mxu0 %v4136_v27 }
 0x821   : > { %3879 = vmatpush3.bf16.msra.mxu1 %v4137_v9 }
 0x822   : > { %3901 = vmatpush3.bf16.msra.mxu0 %v4138_v59  ;;  %3880 = vmatprep.subr.bf16.mxu1 %v4139_v60 }
 0x823   : > { %3902 = vmatprep.subr.bf16.mxu0 %v4140_v11 }
 0x825   : > { %3881 = vmatpush3.bf16.msra.mxu1 %v4141_v12 }
 0x826   : > { %3903 = vmatpush3.bf16.msra.mxu0 %v4142_v13  ;;  %3882 = vmatprep.subr.bf16.mxu1 %v4143_v14 }
 0x827   : > { %3904 = vmatprep.subr.bf16.mxu0 %v4144_v15 }
 0x829   : > { %3883 = vmatpush3.bf16.msra.mxu1 %v4145_v16 }
 0x82a   : > { %3905 = vmatpush3.bf16.msra.mxu0 %v4146_v17  ;;  %3884 = vmatprep.subr.bf16.mxu1 %v4147_v18 }
 0x82b   : > { %3906 = vmatprep.subr.bf16.mxu0 %v4148_v19 }
 0x82d   : > { %3885 = vmatpush3.bf16.msra.mxu1 %v4149_v23 }
 0x82e   : > { %3907 = vmatpush3.bf16.msra.mxu0 %v4150_v24  ;;  %3886 = vmatprep.subr.bf16.mxu1 %v4151_v28 }
 0x82f   : > { %3908 = vmatprep.subr.bf16.mxu0 %v4152_v29 }
 0x831   : > { %3887 = vmatpush3.bf16.msra.mxu1 %v4153_v32 }
 0x832   : > { %3909 = vmatpush3.bf16.msra.mxu0 %v4154_v33  ;;  %3888 = vmatprep.subr.bf16.mxu1 %v4155_v34 }
 0x833   : > { %3910 = vmatprep.subr.bf16.mxu0 %v4156_v35 }
 0x835   : > { %3889 = vmatpush3.bf16.msra.mxu1 %v4157_v36 }
 0x836   : > { %3911 = vmatpush3.bf16.msra.mxu0 %v4158_v37  ;;  %3890 = vmatprep.subr.bf16.mxu1 %v4159_v7 }
 0x837   : > { %3912 = vmatprep.subr.bf16.mxu0 %v4160_v38 }
 0x839   : > { %3891 = vmatpush3.bf16.msra.mxu1 %v4161_v39 }
 0x83a   : > { %3913 = vmatpush3.bf16.msra.mxu0 %v4162_v43 }
 0x83c   : > { %3345 = vmatmul.mubr.bf16.vlgmr.msra.gmra.mrb[48].mxu1 %v2037_v45  ;;  %v3713_v45 = vld [vmem:[%s5093_s15] ss:$0 sm:$0xff] }
 0x83d   : > { %3385 = vmatmul.mubr.bf16.vlgmr.msra.gmra.mrb[52].mxu0 %v2039_v46 }
 0x8af   : > { %v3760_v47 = vpop.f32.mrb[36].mxu1  ;;  %v3782_v48 = vpop.f32.mrb[40].mxu0 }
 0x8b0   : > { %v3761_v49 = vpop.f32.mrb[37].mxu1  ;;  %v3783_v50 = vpop.f32.mrb[41].mxu0 }
 0x8b1   : > { %v3762_v55 = vadd.f32 %v3761_v49, %v3760_v47  ;;  %v3784_v56 = vadd.f32 %v3783_v50, %v3782_v48  ;;  %v3763_v57 = vpop.f32.mrb[38].mxu1  ;;  %v3785_v58 = vpop.f32.mrb[42].mxu0 }
 0x8b2   : > { %v3764_v52 = vpop.f32.mrb[39].mxu1  ;;  %v3786_v61 = vpop.f32.mrb[43].mxu0 }
 0x8b3   : > { %v3107_v22 = vadd.f32 %v3762_v55, %v3583_v51 }
 0x8b5   : > { %v3147_v62 = vadd.f32 %v3784_v56, %v3107_v22 }
 0x8cf   : > { %v3804_v63 = vpop.f32.mrb[40].mxu1  ;;  %v3826_v20 = vpop.f32.mrb[44].mxu0 }
 0x8d0   : > { %v3805_v1 = vpop.f32.mrb[41].mxu1  ;;  %v3827_v41 = vpop.f32.mrb[45].mxu0 }
 0x8d1   : > { %v3806_v42 = vadd.f32 %v3805_v1, %v3804_v63  ;;  %v3828_v0 = vadd.f32 %v3827_v41, %v3826_v20  ;;  %v3807_v2 = vpop.f32.mrb[42].mxu1  ;;  %v3829_v3 = vpop.f32.mrb[46].mxu0 }
 0x8d2   : > { %v3808_v53 = vpop.f32.mrb[43].mxu1  ;;  %v3830_v54 = vpop.f32.mrb[47].mxu0 }
 0x8d3   : > { %v3187_v21 = vadd.f32 %v3806_v42, %v3147_v62 }
 0x8d5   : > { %v3227_v25 = vadd.f32 %v3828_v0, %v3187_v21 }
 0x8ef   : > { %v3848_v30 = vpop.f32.mrb[44].mxu1 }
 0x8f0   : > { %v3870_v4 = vpop.f32.mrb[48].mxu0  ;;  %v3849_v5 = vpop.f32.mrb[45].mxu1 }
 0x8f1   : > { %v3850_v31 = vadd.f32 %v3849_v5, %v3848_v30  ;;  %v3871_v6 = vpop.f32.mrb[49].mxu0  ;;  %v3851_v26 = vpop.f32.mrb[46].mxu1 }
 0x8f2   : > { %v3872_v27 = vadd.f32 %v3871_v6, %v3870_v4  ;;  %v3873_v8 = vpop.f32.mrb[50].mxu0  ;;  %v3852_v9 = vpop.f32.mrb[47].mxu1 }
 0x8f3   : > { %v3267_v59 = vadd.f32 %v3850_v31, %v3227_v25  ;;  %v3874_v60 = vpop.f32.mrb[51].mxu0 }
 0x8f5   : > { %v3307_v11 = vadd.f32 %v3872_v27, %v3267_v59 }
 0x90f   : > { %v3892_v12 = vpop.f32.mrb[48].mxu1 }
 0x910   : > { %v3914_v13 = vpop.f32.mrb[52].mxu0  ;;  %v3893_v14 = vpop.f32.mrb[49].mxu1 }
 0x911   : > { %v3894_v15 = vadd.f32 %v3893_v14, %v3892_v12  ;;  %v3915_v16 = vpop.f32.mrb[53].mxu0  ;;  %v3895_v17 = vpop.f32.mrb[50].mxu1 }
 0x912   : > { %v3916_v18 = vadd.f32 %v3915_v16, %v3914_v13  ;;  %v3917_v19 = vpop.f32.mrb[54].mxu0  ;;  %v3896_v23 = vpop.f32.mrb[51].mxu1 }
 0x913   : > { %v3347_v24 = vadd.f32 %v3894_v15, %v3307_v11  ;;  %v3918_v28 = vpop.f32.mrb[55].mxu0 }
 0x915   : > { %v3387_v29 = vadd.f32 %v3916_v18, %v3347_v24 }
 0x917   : > { %v3392_v32 = vadd.f32 %v3387_v29, %v4509_v10  ;;  %v3712_v10 = vld [vmem:[%s5092_s14] ss:$0 sm:$0xff] }
 0x919   : > { %v3395_v33 = vsel %vm649_vm1, %v3392_v32, 0.0 }
 0x91a   : > { %3396 = vadd.xlane.f32.xlu0 %v3395_v33 }
 0x9a7   : > { %v3397_v34 = vpop.xlane.xlu0 %3396 }
 0x9a8   : > { %v3398_v35 = vmul.f32 0.03125, %v3397_v34 }
 0x9aa   : > { %v3399_v36 = vsub.f32 %v3392_v32, %v3398_v35 }
 0x9ac   : > { %v3400_v37 = vmul.f32 %v3399_v36, %v3399_v36 }
 0x9ae   : > { %v3401_v7 = vsel %vm649_vm1, %v3400_v37, 0.0 }
 0x9af   : > { %3402 = vadd.xlane.f32.xlu1 %v3401_v7 }
 0xa3c   : > { %v3403_v38 = vpop.xlane.xlu1 %3402 }
 0xa3d   : > { %v3404_v39 = vmul.f32 0.03125, %v3403_v38 }
 0xa3f   : > { %v3405_v40 = vadd.f32 1e-05, %v3404_v39 }
 0xa41   : > { %4181 = vrsqrt.f32 %v3405_v40 }
 0xa4b   : > { %v4182_v43 = vpop.eup %4181 }
 0xa4c   : > { %v3407_v44 = vmul.f32 %v4182_v43, %v3399_v36 }
 0xa4e   : > { %v3414_v46 = vmul.f32 %v3712_v10, %v3407_v44 }
 0xa50   : > { %v3421_v47 = vadd.f32 %v3713_v45, %v3414_v46 }
 0xa52   : > { %v3422_v48 = vpack.c.bf16 %v3421_v47, %v3421_v47 }
 0xa54   : > { %3423 = vst.msk [vmem:[%s618_s0] sm:$0xf] %vm818_vm3, %v3422_v48 }
 0xa55 PF: > { %s28_s29 = sadd.s32 1, %s4205_s29   ;;  %s5104_s27 = smov %s4201_s28 }
 0xa56   : > { %p25_p5 = scmp.ge.s32.totalorder %s28_s29, 4   ;;  %s5105_s28 = smov %s5107_s16 }
 0xa58   :  { %27 = sbr.rel (!%p25_p5) target bundleno = 4 (0x4), region = 138 }

// kernel: _encoder_forward.3
= control target key start
LH: loop header
LB: loop body
LE: loop exit
PB: predicated region body
PF: predicated region fallthrough
CT: control target
= control target key end

     0   :  { %s4346_s27 = smov 0   ;;  %s4348_s28 = smov 0   ;;  %s5115_s0 = inlined_call_operand.vmem [shape: bf16[2,8,32], index: 0, kind: input, shape index: {}, may-alias: {0,1}]   ;;  %s5116_s1 = inlined_call_operand.vmem [shape: bf16[2,8,32], index: 1, kind: input, shape index: {}, may-alias: {0,1}]   ;;  %s5117_s2 = inlined_call_operand.vmem [shape: bf16[32,32], index: 2, kind: input, shape index: {}]   ;;  %s5118_s3 = inlined_call_operand.vmem [shape: f32[1,32], index: 3, kind: input, shape index: {}]   ;;  %s5119_s4 = inlined_call_operand.vmem [shape: bf16[32,64], index: 4, kind: input, shape index: {}]   ;;  %s5120_s5 = inlined_call_operand.vmem [shape: f32[1,64], index: 5, kind: input, shape index: {}]   ;;  %s5121_s6 = inlined_call_operand.vmem [shape: bf16[32,32], index: 6, kind: input, shape index: {}]   ;;  %s5122_s7 = inlined_call_operand.vmem [shape: f32[1,32], index: 7, kind: input, shape index: {}]   ;;  %s5123_s8 = inlined_call_operand.vmem [shape: f32[1,32], index: 8, kind: input, shape index: {}]   ;;  %s5124_s9 = inlined_call_operand.vmem [shape: f32[1,32], index: 9, kind: input, shape index: {}]   ;;  %s5125_s10 = inlined_call_operand.vmem [shape: bf16[32,2048], index: 10, kind: input, shape index: {}]   ;;  %s5126_s11 = inlined_call_operand.vmem [shape: f32[1,2048], index: 11, kind: input, shape index: {}]   ;;  %s5127_s12 = inlined_call_operand.vmem [shape: bf16[2048,32], index: 12, kind: input, shape index: {}]   ;;  %s5128_s13 = inlined_call_operand.vmem [shape: f32[1,32], index: 13, kind: input, shape index: {}]   ;;  %s5129_s14 = inlined_call_operand.vmem [shape: f32[1,32], index: 14, kind: input, shape index: {}]   ;;  %s5130_s15 = inlined_call_operand.vmem [shape: f32[1,32], index: 15, kind: input, shape index: {}]   ;;  %s5131_s16 = inlined_call_operand.vmem [shape: f32[1,32], index: 16, kind: input, shape index: {}]   ;;  %s5132_s17 = inlined_call_operand.vmem [shape: f32[1,32], index: 17, kind: input, shape index: {}]   ;;  %s5133_s18 = inlined_call_operand.vmem [shape: f32[2,8,32], index: 18, kind: output, shape index: {}]  }
   0x1   :  { %5135 = sst [smem:[#allocation8_spill]] %s5115_s0  ;;  %s4350_s29 = smov 0  }
   0x2   :  { %5136 = sst [smem:[#allocation9_spill]] %s5116_s1 }
   0x3   :  { %5137 = sst [smem:[#allocation10_spill]] %s5117_s2 }
   0x4 LB: > { %s40_s30 = sadd.s32 1, %s4232_s28  ;;  %p3541_p0 = scmp.ge.s32.totalorder %s4236_s29, 1  ;;  %s4236_s29 = sphi %s4350_s29, %s28_s29   ;;  %s4232_s28 = sphi %s4348_s28, %s5142_s28   ;;  %s4228_s27 = sphi %s4346_s27, %s5141_s27  }
   0x5   : > { %p42_p1 = scmp.ge.s32.totalorder %s40_s30, 2  ;;  %p539_p2 = scmp.lt.s32.totalorder %s4236_s29, 3 }
   0x7   : > { %s5144_s30 = smov (%p42_p1, %s40_s30), 0  ;;  %p540_p3 = pnand %p3541_p0, %p539_p2 }
   0x8   : > { %v4058_v0 = vld [vmem:[%s5119_s4] sm:$0xff] (!%p540_p3)   ;;  %v4238_v1 = vmov (!%p540_p3), 0.0   ;;  %s5138_s21 = sld [smem:[#allocation10_spill]] (!%p540_p3)  ;;  %v4060_v3 = vld [vmem:[%s5119_s4 + $0x8] sm:$0xff] (!%p540_p3)   ;;  %vm4239_vm0 = vmmov (!%p540_p3), 0   ;;  %p601_p4 = scmp.lt.s32.totalorder (!%p540_p3), %s4228_s27, 1 }
   0x9   : > { %543 = sbr.rel (%p540_p3) target bundleno = 2954 (0xb8a), region = 92  ;;  %3949 = vmatprep.subr.bf16.mxu0 (!%p540_p3), %v4238_v1  ;;  %3957 = vmatprep.subr.bf16.mxu1 (!%p540_p3), %v4238_v1  ;;  %vm648_vm1 = vcmask (!%p540_p3), 261120   ;;  %s5139_s19 = sld [smem:[#allocation8_spill]] (!%p540_p3)  ;;  %v3545_v7 = vld [vmem:[%s5120_s5] ss:$0 sm:$0xff] (!%p540_p3)  ;;  %vm693_vm2 = vcmask (!%p540_p3), 519168  }
   0xa   : > { %3950 = vmatpush3.bf16.msra.mxu0 (!%p540_p3), %v4058_v0  ;;  %3953 = vmatprep.mubr.msk.bf16.mxu0 (!%p540_p3), %vm4239_vm0, %v4238_v1  ;;  %s5140_s2 = sld [smem:[#allocation9_spill]] (!%p540_p3)  ;;  %v3549_v8 = vld [vmem:[%s5118_s3] ss:$0 sm:$0xff] (!%p540_p3)  ;;  %vm817_vm3 = vcmask (!%p540_p3), 257024   ;;  %vm696_vm4 = vcmask (!%p540_p3), 60416   ;;  %s4242_s20 = smov (!%p540_p3), 112  }
   0xb   : > { %3951 = vmatprep.subr.bf16.mxu0 (!%p540_p3), %v4238_v1  ;;  %3961 = vmatprep.mubr.msk.bf16.mxu1 (!%p540_p3), %vm4239_vm0, %v4238_v1  ;;  %vm855_vm5 = vcmask (!%p540_p3), 64512   ;;  %s4243_s22 = smov (!%p540_p3), 96   ;;  %vm1091_vm6 = vcmask (!%p540_p3), 1043456   ;;  %s4246_s24 = smov (!%p540_p3), 88   ;;  %vm1282_vm7 = vcmask (!%p540_p3), 126016   ;;  %vm1291_vm8 = vcmask (!%p540_p3), 191616  }
   0xc   : > { %s4247_s0 = smov (!%p540_p3), 16   ;;  %vm1300_vm9 = vcmask (!%p540_p3), 257216  }
   0xe   : > { %v4059_v2 = vld [vmem:[%s5138_s21] sm:$0xff] (!%p540_p3)   ;;  %v4061_v4 = vld [vmem:[%s5138_s21 + $0x8] sm:$0xff] (!%p540_p3)   ;;  %3952 = vmatpush3.bf16.msra.mxu0 (!%p540_p3), %v4060_v3 }
   0xf   : > { %3958 = vmatpush3.bf16.msra.mxu1 (!%p540_p3), %v4059_v2  ;;  %3965 = vmatprep.subr.bf16.mxu0 (!%p540_p3), %v4238_v1 }
  0x10   : > { %3959 = vmatprep.subr.bf16.mxu1 %v4238_v1  ;;  %s5146_s27 = smov (!%p601_p4, %s4228_s27), 1 }
  0x11   : > { %s3542_s25 = sshll.u32 %s5146_s27, 2 }
  0x12   : > { %s604_s1 = scalar_lea.vmem %s5139_s19, %s3542_s25  ;;  %s611_s23 = scalar_lea.vmem %s5140_s2, %s3542_s25 }
  0x13   : > { %3960 = vmatpush3.bf16.msra.mxu1 %v4061_v4  ;;  %v624_v5 = vld [vmem:[%s604_s1] sm:$0xf]  ;;  %s4240_s19 = smov 104   ;;  %s4241_s1 = smov 120  }
  0x14   : > { %3971 = vmatprep.subr.bf16.mxu1 %v4238_v1  ;;  %3954 = vmatmul.mubr.msk.bf16.vlgmr.msra.gmra.mrb[0].mxu0 %vm648_vm1, %v624_v5  ;;  %v4396_v6 = vld [vmem:[%s611_s23] sm:$0xf]  ;;  %s4244_s2 = smov 80   ;;  %s4245_s23 = smov 72  }
  0x15   : > { %3967 = vmatprep.mubr.msk.bf16.mxu0 %vm4239_vm0, %v4238_v1 }
  0x16   : > { %3962 = vmatmul.mubr.msk.bf16.vlgmr.msra.gmra.mrb[0].mxu1 %vm648_vm1, %v4396_v6 }
  0x17   : > { %3973 = vmatprep.mubr.msk.bf16.mxu1 %vm4239_vm0, %v4238_v1 }
  0xe7   : > { %v686_v9 = vpop.f32.mrb[0].mxu0 }
  0xe8   : > { %v687_v10 = vadd.f32 %v3545_v7, %v686_v9  ;;  %v3955_v11 = vpop.f32.mrb[1].mxu0 }
  0xe9   : > { %v809_v12 = vpop.f32.mrb[0].mxu1  ;;  %v689_v13 = vpop.f32.mrb[2].mxu0 }
  0xea   : > { %v810_v14 = vadd.f32 %v3549_v8, %v809_v12  ;;  %v3963_v15 = vpop.f32.mrb[1].mxu1  ;;  %v692_v16 = vpack.c.bf16 %v687_v10, %v687_v10  ;;  %v3956_v17 = vpop.f32.mrb[3].mxu0 }
  0xeb   : > { %v812_v18 = vpop.f32.mrb[2].mxu1 }
  0xec   : > { %v815_v19 = vmul.f32 0.35355338, %v810_v14  ;;  %v3964_v20 = vpop.f32.mrb[3].mxu1  ;;  %694 = vst.msk [vmem:[#allocation2] sm:$0xf] %vm693_vm2, %v692_v16 }
  0xee   : > { %v816_v21 = vpack.c.bf16 %v815_v19, %v815_v19 }
  0xf0   : > { %818 = vst.msk [vmem:[#allocation3] sm:$0xf] %vm817_vm3, %v816_v21 }
  0xf3   : > { %v695_v22 = vld [vmem:[#allocation2] sm:$0xf] }
  0xf4   : > { %v732_v23 = vld [vmem:[#allocation2] sm:$0xf]  ;;  %697 = vst.msk [vmem:[#allocation4] sm:$0xf] %vm696_vm4, %v695_v22 }
  0xf5   : > { %v704_v24 = vld [vmem:[#allocation2] sm:$0xf]  ;;  %734 = vrot.lane.b32.xlu1 %v732_v23, %s4240_s19 }
  0xf6   : > { %706 = vrot.lane.b32.xlu0 %v704_v24, %s4241_s1  ;;  %v718_v27 = vld [vmem:[#allocation2] sm:$0xf] }
  0xf7   : > { %v819_v25 = vld [vmem:[#allocation3] sm:$0xf]  ;;  %v698_v5 = vld [vmem:[#allocation2] sm:$0xf] }
  0xf8   : > { %v822_v26 = vld [vmem:[#allocation3] sm:$0xf]  ;;  %821 = vst.msk [vmem:[#allocation6] sm:$0xf] %vm696_vm4, %v819_v25 }
  0xf9   : > { %824 = vrot.lane.b32.xlu1 %v822_v26, %s4241_s1  ;;  %v836_v28 = vld [vmem:[#allocation3] sm:$0xf] }
  0xfa   : > { %720 = vrot.lane.b32.xlu0 %v718_v27, %s4242_s20  ;;  %v829_v29 = vld [vmem:[#allocation3] sm:$0xf] }
  0xfb   : > { %v847_v30 = vld [vmem:[#allocation4] sm:$0xf] }
  0xfc   : > { %v860_v31 = vsel %vm855_vm5, %v847_v30, 0  ;;  %v725_v30 = vld [vmem:[#allocation2] sm:$0xf] }
  0xfd   : > { %838 = vrot.lane.b32.xlu1 %v836_v28, %s4240_s19  ;;  %3966 = vmatpush3.bf16.xpose.msra.mxu0 %v860_v31  ;;  %v739_v31 = vld [vmem:[#allocation2] sm:$0xf] }
  0xfe   : > { %831 = vrot.lane.b32.xlu0 %v829_v29, %s4242_s20  ;;  %3977 = vmatprep.subr.bf16.mxu0 %v4238_v1  ;;  %s4248_s20 = smov 8  }
  0xff   : > { %v843_v32 = vld [vmem:[#allocation6] sm:$0xf] }
 0x104   : > { %3968 = vmatmul.mubr.msk.bf16.vlgmr.msra.gmra.mrb[4].mxu0 %vm855_vm5, %v843_v32  ;;  %v711_v32 = vld [vmem:[#allocation2] sm:$0xf] }
 0x105   : > { %3979 = vmatprep.mubr.msk.bf16.mxu0 %vm4239_vm0, %v4238_v1 }
 0x167   : > { %v735_v33 = vpop.permute.xlu1 %734 }
 0x168   : > { %v707_v34 = vpop.permute.xlu0 %706  ;;  %738 = vst.msk [vmem:[#allocation4 + $0xc] sm:$0xf] %vm696_vm4, %v735_v33 }
 0x169   : > { %710 = vst.msk [vmem:[#allocation4 + $0x4] sm:$0xf] %vm696_vm4, %v707_v34 }
 0x16b   : > { %v825_v35 = vpop.permute.xlu1 %824 }
 0x16c   : > { %v721_v36 = vpop.permute.xlu0 %720  ;;  %828 = vst.msk [vmem:[#allocation6 + $0x4] sm:$0xf] %vm696_vm4, %v825_v35 }
 0x16d   : > { %724 = vst.msk [vmem:[#allocation4 + $0x8] sm:$0xf] %vm696_vm4, %v721_v36 }
 0x16f   : > { %v839_v37 = vpop.permute.xlu1 %838  ;;  %v850_v44 = vld [vmem:[#allocation4 + $0xc] sm:$0xf] }
 0x170   : > { %v832_v38 = vpop.permute.xlu0 %831  ;;  %v848_v39 = vld [vmem:[#allocation4 + $0x4] sm:$0xf]  ;;  %842 = vst.msk [vmem:[#allocation6 + $0xc] sm:$0xf] %vm696_vm4, %v839_v37  ;;  %v998_v45 = vsel %vm855_vm5, %v850_v44, 0 }
 0x171   : > { %835 = vst.msk [vmem:[#allocation6 + $0x8] sm:$0xf] %vm696_vm4, %v832_v38  ;;  %v906_v40 = vsel %vm855_vm5, %v848_v39, 0 }
 0x172   : > { %3972 = vmatpush3.bf16.xpose.msra.mxu1 %v906_v40 }
 0x173   : > { %3983 = vmatprep.subr.bf16.mxu1 %v4238_v1  ;;  %v844_v43 = vld [vmem:[#allocation6 + $0x4] sm:$0xf] }
 0x174   : > { %v849_v41 = vld [vmem:[#allocation4 + $0x8] sm:$0xf] }
 0x175   : > { %v952_v42 = vsel %vm855_vm5, %v849_v41, 0 }
 0x176   : > { %3978 = vmatpush3.bf16.xpose.msra.mxu0 %v952_v42 }
 0x177   : > { %3989 = vmatprep.subr.bf16.mxu0 %v4238_v1  ;;  %v846_v47 = vld [vmem:[#allocation6 + $0xc] sm:$0xf] }
 0x178   : > { %v845_v46 = vld [vmem:[#allocation6 + $0x8] sm:$0xf] }
 0x179   : > { %3974 = vmatmul.mubr.msk.bf16.vlgmr.msra.gmra.mrb[4].mxu1 %vm855_vm5, %v844_v43 }
 0x17a   : > { %3984 = vmatpush3.bf16.xpose.msra.mxu1 %v998_v45  ;;  %3985 = vmatprep.mubr.msk.bf16.mxu1 %vm4239_vm0, %v4238_v1 }
 0x17b   : > { %3995 = vmatprep.subr.bf16.mxu1 %v4238_v1 }
 0x17d   : > { %3980 = vmatmul.mubr.msk.bf16.vlgmr.msra.gmra.mrb[8].mxu0 %vm855_vm5, %v845_v46 }
 0x17e   : > { %3991 = vmatprep.mubr.msk.bf16.mxu0 %vm4239_vm0, %v4238_v1 }
 0x181   : > { %3986 = vmatmul.mubr.msk.bf16.vlgmr.msra.gmra.mrb[8].mxu1 %vm855_vm5, %v846_v47 }
 0x182   : > { %3997 = vmatprep.mubr.msk.bf16.mxu1 %vm4239_vm0, %v4238_v1 }
 0x1d7   : > { %v896_v48 = vpop.f32.mrb[4].mxu0 }
 0x1d8   : > { %v3969_v49 = vpop.f32.mrb[5].mxu0  ;;  %v1040_v50 = vsel %vm855_vm5, %v896_v48, -inf }
 0x1d9   : > { %1041 = vmax.xlane.f32.xlu0 %v1040_v50  ;;  %v899_v51 = vpop.f32.mrb[6].mxu0 }
 0x1da   : > { %v3970_v52 = vpop.f32.mrb[7].mxu0 }
 0x24c   : > { %v942_v53 = vpop.f32.mrb[4].mxu1 }
 0x24d   : > { %v3975_v54 = vpop.f32.mrb[5].mxu1  ;;  %v1043_v55 = vsel %vm855_vm5, %v942_v53, -inf }
 0x24e   : > { %1044 = vmax.xlane.f32.xlu1 %v1043_v55  ;;  %v945_v56 = vpop.f32.mrb[6].mxu1 }
 0x24f   : > { %v3976_v57 = vpop.f32.mrb[7].mxu1 }
 0x250   : > { %v988_v58 = vpop.f32.mrb[8].mxu0 }
 0x251   : > { %v3981_v59 = vpop.f32.mrb[9].mxu0  ;;  %v1046_v60 = vsel %vm855_vm5, %v988_v58, -inf }
 0x252   : > { %1047 = vmax.xlane.f32.xlu0 %v1046_v60  ;;  %v991_v61 = vpop.f32.mrb[10].mxu0 }
 0x253   : > { %v3982_v62 = vpop.f32.mrb[11].mxu0 }
 0x254   : > { %v1034_v63 = vpop.f32.mrb[8].mxu1 }
 0x255   : > { %v3987_v0 = vpop.f32.mrb[9].mxu1  ;;  %v1049_v2 = vsel %vm855_vm5, %v1034_v63, -inf }
 0x256   : > { %v1037_v3 = vpop.f32.mrb[10].mxu1  ;;  %1050 = vmax.xlane.f32.xlu0 %v1049_v2 }
 0x257   : > { %v3988_v4 = vpop.f32.mrb[11].mxu1 }
 0x258   : > { %v4062_v4 = vld [vmem:[%s5121_s6] sm:$0xff]  }
 0x25f   : > { %700 = vrot.lane.b32.xlu1 %v698_v5, %s4243_s22  ;;  %s4249_s22 = smov 24  }
 0x266   : > { %v1042_v7 = vpop.xlane.xlu0 %1041 }
 0x267   : > { %v1052_v8 = vsub.f32 %v896_v48, %v1042_v7 }
 0x269   : > { %v1056_v9 = vmul.f32 1.442695, %v1052_v8  ;;  %v4063_v8 = vld [vmem:[%s5121_s6 + $0x8] sm:$0xff]  }
 0x26b   : > { %4192 = vpow2.f32 %v1056_v9 }
 0x275   : > { %v4193_v10 = vpop.eup %4192 }
 0x276   : > { %v1064_v11 = vsel %vm855_vm5, %v4193_v10, 0.0 }
 0x283   : > { %1065 = vadd.xlane.f32.xlu1 %v1064_v11 }
 0x2db   : > { %v1045_v12 = vpop.xlane.xlu1 %1044 }
 0x2dc   : > { %v1053_v13 = vsub.f32 %v942_v53, %v1045_v12 }
 0x2de   : > { %v1058_v14 = vmul.f32 1.442695, %v1053_v13 }
 0x2df   : > { %v701_v15 = vpop.permute.xlu1 %700  ;;  %v1048_v16 = vpop.xlane.xlu0 %1047 }
 0x2e0   : > { %4194 = vpow2.f32 %v1058_v14  ;;  %703 = vst.msk [vmem:[#allocation5] sm:$0xf] %vm696_vm4, %v701_v15  ;;  %v1054_v17 = vsub.f32 %v988_v58, %v1048_v16 }
 0x2e2   : > { %v1060_v18 = vmul.f32 1.442695, %v1054_v17 }
 0x2e3   : > { %v1051_v19 = vpop.xlane.xlu0 %1050 }
 0x2e4   : > { %4196 = vpow2.f32 %v1060_v18  ;;  %v1055_v20 = vsub.f32 %v1034_v63, %v1051_v19 }
 0x2e6   : > { %v1062_v21 = vmul.f32 1.442695, %v1055_v20 }
 0x2e7   : > { %v851_v22 = vld [vmem:[#allocation5] sm:$0xf] }
 0x2e8   : > { %4198 = vpow2.f32 %v1062_v21  ;;  %v1093_v23 = vsel %vm1091_vm6, %v851_v22, 0  ;;  %v3564_v21 = vld [vmem:[%s5122_s7] ss:$0 sm:$0xff]  ;;  %v747_v22 = vunpack.c.l.bf16 %v4396_v6 }
 0x2e9   : > { %3990 = vmatpush3.bf16.msra.mxu0 %v1093_v23  ;;  %v1401_v6 = vld [vmem:[%s5125_s10] sm:$0xff] }
 0x2ea   : > { %v4195_v24 = vpop.eup %4194  ;;  %4001 = vmatprep.subr.bf16.mxu0 %v4238_v1 }
 0x2eb   : > { %v1067_v25 = vsel %vm855_vm5, %v4195_v24, 0.0 }
 0x2ec   : > { %1068 = vadd.xlane.f32.xlu0 %v1067_v25 }
 0x2ee   : > { %v4197_v26 = vpop.eup %4196 }
 0x2ef   : > { %v1070_v27 = vsel %vm855_vm5, %v4197_v26, 0.0 }
 0x2f0   : > { %1071 = vadd.xlane.f32.xlu1 %v1070_v27 }
 0x2f2   : > { %v4199_v28 = vpop.eup %4198 }
 0x2f3   : > { %v1073_v29 = vsel %vm855_vm5, %v4199_v28, 0.0 }
 0x2f4   : > { %1074 = vadd.xlane.f32.xlu0 %v1073_v29 }
 0x301   : > { %727 = vrot.lane.b32.xlu1 %v725_v30, %s4244_s2 }
 0x305   : > { %741 = vrot.lane.b32.xlu1 %v739_v31, %s4245_s23 }
 0x30a   : > { %713 = vrot.lane.b32.xlu0 %v711_v32, %s4246_s24 }
 0x310   : > { %v1066_v33 = vpop.xlane.xlu1 %1065 }
 0x311   : > { %4200 = vrcp.f32 %v1066_v33 }
 0x31b   : > { %v4201_v34 = vpop.eup %4200 }
 0x31c   : > { %v1080_v35 = vmul.f32 %v4201_v34, %v4193_v10 }
 0x31e   : > { %v1084_v36 = vpack.c.bf16 %v1080_v35, %v1080_v35  ;;  %v1409_v35 = vld [vmem:[%s5125_s10 + $0x40] sm:$0xff] }
 0x320   : > { %3992 = vmatmul.mubr.msk.bf16.vlgmr.msra.gmra.mrb[12].mxu0 %vm855_vm5, %v1084_v36  ;;  %v1402_v36 = vld [vmem:[%s5125_s10 + $0x8] sm:$0xff] }
 0x321   : > { %4003 = vmatprep.mubr.msk.bf16.mxu0 %vm4239_vm0, %v4238_v1 }
 0x379   : > { %v1069_v37 = vpop.xlane.xlu0 %1068 }
 0x37d   : > { %v1072_v38 = vpop.xlane.xlu1 %1071 }
 0x37e   : > { %4202 = vrcp.f32 %v1072_v38  ;;  %v1410_v38 = vld [vmem:[%s5125_s10 + $0x48] sm:$0xff] }
 0x37f   : > { %4204 = vrcp.f32 %v1069_v37  ;;  %v3571_v37 = vcombine.high %v1401_v6, %v1409_v35 }
 0x381   : > { %v728_v39 = vpop.permute.xlu1 %727  ;;  %v1075_v40 = vpop.xlane.xlu0 %1074 }
 0x382   : > { %731 = vst.msk [vmem:[#allocation5 + $0x8] sm:$0xf] %vm696_vm4, %v728_v39  ;;  %4206 = vrcp.f32 %v1075_v40  ;;  %v3570_v39 = vcombine.low %v1401_v6, %v1409_v35  ;;  %v3572_v40 = vcombine.low %v1402_v36, %v1410_v38  ;;  %v1423_v35 = vld [vmem:[%s5125_s10 + $0xb0] sm:$0xff] }
 0x385   : > { %v742_v41 = vpop.permute.xlu1 %741  ;;  %v714_v42 = vpop.permute.xlu0 %713 }
 0x386   : > { %745 = vst.msk [vmem:[#allocation5 + $0xc] sm:$0xf] %vm696_vm4, %v742_v41  ;;  %717 = vst.msk [vmem:[#allocation5 + $0x4] sm:$0xf] %vm696_vm4, %v714_v42  ;;  %v3573_v41 = vcombine.high %v1402_v36, %v1410_v38  ;;  %v1417_v42 = vld [vmem:[%s5125_s10 + $0x80] sm:$0xff]  ;;  %v1431_v36 = vld [vmem:[%s5125_s10 + $0xf0] sm:$0xff] }
 0x387   : > { %v1432_v38 = vld [vmem:[%s5125_s10 + $0xf8] sm:$0xff] }
 0x388   : > { %v4203_v43 = vpop.eup %4202 }
 0x389   : > { %v4205_v44 = vpop.eup %4204  ;;  %v1082_v45 = vmul.f32 %v4203_v43, %v4197_v26  ;;  %v853_v46 = vld [vmem:[#allocation5 + $0x8] sm:$0xf] }
 0x38a   : > { %v1185_v47 = vsel %vm1091_vm6, %v853_v46, 0  ;;  %v1081_v49 = vmul.f32 %v4205_v44, %v4195_v24  ;;  %v1425_v43 = vld [vmem:[%s5125_s10 + $0xc0] sm:$0xff]  ;;  %v1418_v44 = vld [vmem:[%s5125_s10 + $0x88] sm:$0xff] }
 0x38b   : > { %4002 = vmatpush3.bf16.msra.mxu0 %v1185_v47  ;;  %v1086_v48 = vpack.c.bf16 %v1082_v45, %v1082_v45  ;;  %v3587_v45 = vcombine.high %v1417_v42, %v1425_v43  ;;  %v1426_v46 = vld [vmem:[%s5125_s10 + $0xc8] sm:$0xff]  ;;  %v3586_v47 = vcombine.low %v1417_v42, %v1425_v43  ;;  %v3598_v43 = vcombine.low %v1423_v35, %v1431_v36 }
 0x38c   : > { %4013 = vmatprep.subr.bf16.mxu0 %v4238_v1  ;;  %v1085_v53 = vpack.c.bf16 %v1081_v49, %v1081_v49  ;;  %v4207_v54 = vpop.eup %4206  ;;  %v3589_v49 = vcombine.high %v1418_v44, %v1426_v46 }
 0x38d   : > { %v852_v50 = vld [vmem:[#allocation5 + $0x4] sm:$0xf]  ;;  %v854_v52 = vld [vmem:[#allocation5 + $0xc] sm:$0xf]  ;;  %v1083_v56 = vmul.f32 %v4207_v54, %v4199_v28 }
 0x38e   : > { %4004 = vmatmul.mubr.msk.bf16.vlgmr.msra.gmra.mrb[16].mxu0 %vm855_vm5, %v1086_v48  ;;  %v1139_v51 = vsel %vm1091_vm6, %v852_v50, 0  ;;  %v1231_v55 = vsel %vm1091_vm6, %v854_v52, 0  ;;  %v3588_v48 = vcombine.low %v1418_v44, %v1426_v46  ;;  %v1403_v50 = vld [vmem:[%s5125_s10 + $0x10] sm:$0xff]  ;;  %v1404_v52 = vld [vmem:[%s5125_s10 + $0x18] sm:$0xff]  ;;  %v4065_v46 = vld [vmem:[%s5127_s12 + $0xc0] sm:$0xff]  }
 0x38f   : > { %3996 = vmatpush3.bf16.msra.mxu1 %v1139_v51  ;;  %4017 = vmatprep.mubr.msk.bf16.mxu0 %vm4239_vm0, %v4238_v1  ;;  %v1087_v57 = vpack.c.bf16 %v1083_v56, %v1083_v56  ;;  %v1411_v51 = vld [vmem:[%s5125_s10 + $0x50] sm:$0xff]  ;;  %v1412_v56 = vld [vmem:[%s5125_s10 + $0x58] sm:$0xff] }
 0x390   : > { %4007 = vmatprep.subr.bf16.mxu1 %v4238_v1  ;;  %4014 = vmatpush3.bf16.msra.mxu0 %v4062_v4  ;;  %v3574_v54 = vcombine.low %v1403_v50, %v1411_v51  ;;  %v1419_v4 = vld [vmem:[%s5125_s10 + $0x90] sm:$0xff] }
 0x391   : > { %4015 = vmatprep.subr.bf16.mxu0 %v4238_v1 }
 0x392   : > { %3998 = vmatmul.mubr.msk.bf16.vlgmr.msra.gmra.mrb[12].mxu1 %vm855_vm5, %v1085_v53  ;;  %v4250_v53 = vmov 0  }
 0x393   : > { %4008 = vmatpush3.bf16.msra.mxu1 %v1231_v55  ;;  %4009 = vmatprep.mubr.msk.bf16.mxu1 %vm4239_vm0, %v4238_v1  ;;  %v3575_v55 = vcombine.high %v1403_v50, %v1411_v51  ;;  %v4069_v50 = vld [vmem:[%s5127_s12 + $0xc8] sm:$0xff]  }
 0x394   : > { %4016 = vmatpush3.bf16.msra.mxu0 %v4063_v8  ;;  %1680 = vmatprep.subr.bf16.mxu1 %v3571_v37  ;;  %v1428_v8 = vld [vmem:[%s5125_s10 + $0xd8] sm:$0xff]  ;;  %v4070_v51 = vld [vmem:[%s5127_s12 + $0x8] sm:$0xff]  }
 0x395   : > { %1721 = vmatprep.subr.bf16.mxu0 %v3573_v41  ;;  %v1424_v37 = vld [vmem:[%s5125_s10 + $0xb8] sm:$0xff]  ;;  %v3599_v41 = vcombine.high %v1423_v35, %v1431_v36 }
 0x396   : > { %v3601_v42 = vcombine.high %v1424_v37, %v1432_v38  ;;  %v3600_v44 = vcombine.low %v1424_v37, %v1432_v38 }
 0x39a   : > { %4010 = vmatmul.mubr.msk.bf16.vlgmr.msra.gmra.mrb[16].mxu1 %vm855_vm5, %v1087_v57  ;;  %v3576_v57 = vcombine.low %v1404_v52, %v1412_v56 }
 0x39b   : > { %1681 = vmatpush1.bf16.msra.mxu1 %v3570_v39  ;;  %1712 = vmatprep.mubr.bf16.mxu1 %v4250_v53 }
 0x39c   : > { %1682 = vmatprep.subr.bf16.mxu1 %v3587_v45  ;;  %v4064_v45 = vld [vmem:[%s5127_s12 + $0x40] sm:$0xff]  }
 0x39f   : > { %1683 = vmatpush1.bf16.msra.mxu1 %v3586_v47  ;;  %v4066_v47 = vld [vmem:[%s5127_s12] sm:$0xff]  }
 0x3a0   : > { %1762 = vmatprep.subr.bf16.mxu1 %v3575_v55  ;;  %v4074_v55 = vld [vmem:[%s5127_s12 + $0x10] sm:$0xff]  }
 0x3f3   : > { %v1129_v58 = vpop.f32.mrb[12].mxu0 }
 0x3f4   : > { %v1273_v59 = vpack.c.bf16 %v1129_v58, %v1129_v58  ;;  %v3993_v60 = vpop.f32.mrb[13].mxu0  ;;  %v3577_v58 = vcombine.high %v1404_v52, %v1412_v56  ;;  %v4071_v52 = vld [vmem:[%s5127_s12 + $0x88] sm:$0xff]   ;;  %v4075_v56 = vld [vmem:[%s5127_s12 + $0x90] sm:$0xff]  }
 0x3f5   : > { %v1132_v61 = vpop.f32.mrb[14].mxu0 }
 0x3f6   : > { %1274 = vst.msk [vmem:[#allocation7] sm:$0xf] %vm696_vm4, %v1273_v59  ;;  %v3994_v62 = vpop.f32.mrb[15].mxu0 }
 0x461   : > { %v1221_v63 = vpop.f32.mrb[16].mxu0 }
 0x462   : > { %v3746_v0 = vpack.c.bf16 %v1221_v63, %v1221_v63  ;;  %v4005_v2 = vpop.f32.mrb[17].mxu0  ;;  %v3568_v63 = vld [vmem:[%s5123_s8] ss:$0 sm:$0xff] }
 0x463   : > { %v1224_v3 = vpop.f32.mrb[18].mxu0  ;;  %v3569_v2 = vld [vmem:[%s5124_s9] ss:$0 sm:$0xff] }
 0x464   : > { %1288 = vrot.lane.b32.xlu1 %v3746_v0, %s4247_s0  ;;  %v4006_v5 = vpop.f32.mrb[19].mxu0 }
 0x465   : > { %v1175_v7 = vpop.f32.mrb[12].mxu1  ;;  %v1427_v5 = vld [vmem:[%s5125_s10 + $0xd0] sm:$0xff] }
 0x466   : > { %v3745_v9 = vpack.c.bf16 %v1175_v7, %v1175_v7  ;;  %v3999_v10 = vpop.f32.mrb[13].mxu1  ;;  %v1420_v7 = vld [vmem:[%s5125_s10 + $0x98] sm:$0xff] }
 0x467   : > { %v1178_v11 = vpop.f32.mrb[14].mxu1 }
 0x468   : > { %1279 = vrot.lane.b32.xlu0 %v3745_v9, %s4248_s20  ;;  %v4000_v12 = vpop.f32.mrb[15].mxu1  ;;  %v3591_v11 = vcombine.high %v1419_v4, %v1427_v5  ;;  %s3544_s20 = sshll.u32 %s5146_s27, 3 }
 0x469   : > { %v3593_v12 = vcombine.high %v1420_v7, %v1428_v8  ;;  %s618_s26 = scalar_lea.vmem %s5133_s18, %s3544_s20 }
 0x46d   : > { %v1267_v13 = vpop.f32.mrb[16].mxu1 }
 0x46e   : > { %v3747_v14 = vpack.c.bf16 %v1267_v13, %v1267_v13  ;;  %v4011_v15 = vpop.f32.mrb[17].mxu1  ;;  %v1405_v13 = vld [vmem:[%s5125_s10 + $0x20] sm:$0xff] }
 0x46f   : > { %v1270_v16 = vpop.f32.mrb[18].mxu1  ;;  %v1406_v15 = vld [vmem:[%s5125_s10 + $0x28] sm:$0xff] }
 0x470   : > { %1297 = vrot.lane.b32.xlu0 %v3747_v14, %s4249_s22  ;;  %v4012_v17 = vpop.f32.mrb[19].mxu1  ;;  %v1413_v14 = vld [vmem:[%s5125_s10 + $0x60] sm:$0xff]  ;;  %v1414_v16 = vld [vmem:[%s5125_s10 + $0x68] sm:$0xff] }
 0x471   : > { %v3590_v17 = vcombine.low %v1419_v4, %v1427_v5  ;;  %v4086_v4 = vld [vmem:[%s5127_s12 + $0x28] sm:$0xff]  }
 0x472   : > { %v4087_v5 = vld [vmem:[%s5127_s12 + $0xa8] sm:$0xff]  }
 0x4d6   : > { %v1289_v19 = vpop.permute.xlu1 %1288 }
 0x4da   : > { %v1280_v18 = vpop.permute.xlu0 %1279 }
 0x4db   : > { %1283 = vst.msk [vmem:[#allocation7] sm:$0xf] %vm1282_vm7, %v1280_v18  ;;  %v3592_v18 = vcombine.low %v1420_v7, %v1428_v8  ;;  %v4088_v7 = vld [vmem:[%s5127_s12 + $0x70] sm:$0xff]  }
 0x4dc   : > { %1292 = vst.msk [vmem:[#allocation7] sm:$0xf] %vm1291_vm8, %v1289_v19  ;;  %v3579_v19 = vcombine.high %v1405_v13, %v1413_v14  ;;  %v4089_v8 = vld [vmem:[%s5127_s12 + $0xf0] sm:$0xff]  }
 0x4e2   : > { %v1298_v1 = vpop.permute.xlu0 %1297 }
 0x4e3   : > { %1301 = vst.msk [vmem:[#allocation7] sm:$0xf] %vm1300_vm9, %v1298_v1  ;;  %v3581_v1 = vcombine.high %v1406_v15, %v1414_v16 }
 0x4ea   : > { %v1302_v20 = vld [vmem:[#allocation7] sm:$0xf] }
 0x4eb   : > { %4018 = vmatmul.mubr.msk.bf16.vlgmr.msra.gmra.mrb[20].mxu0 %vm648_vm1, %v1302_v20  ;;  %v1421_v20 = vld [vmem:[%s5125_s10 + $0xa0] sm:$0xff] }
 0x4ec   : > { %1722 = vmatpush1.bf16.msra.mxu0 %v3572_v40  ;;  %1753 = vmatprep.mubr.bf16.mxu0 %v4250_v53 }
 0x4ed   : > { %1723 = vmatprep.subr.bf16.mxu0 %v3589_v49  ;;  %v4068_v49 = vld [vmem:[%s5127_s12 + $0x48] sm:$0xff]  }
 0x4f0   : > { %1724 = vmatpush1.bf16.msra.mxu0 %v3588_v48  ;;  %v4067_v48 = vld [vmem:[%s5127_s12 + $0x80] sm:$0xff]  }
 0x4f1   : > { %1803 = vmatprep.subr.bf16.mxu0 %v3577_v58  ;;  %v4077_v58 = vld [vmem:[%s5127_s12 + $0xd8] sm:$0xff]  }
 0x5be   : > { %v1363_v23 = vpop.f32.mrb[20].mxu0 }
 0x5bf   : > { %v1364_v24 = vadd.f32 %v3564_v21, %v1363_v23  ;;  %v4019_v25 = vpop.f32.mrb[21].mxu0  ;;  %v1429_v21 = vld [vmem:[%s5125_s10 + $0xe0] sm:$0xff]  ;;  %v1430_v23 = vld [vmem:[%s5125_s10 + $0xe8] sm:$0xff] }
 0x5c0   : > { %v1366_v26 = vpop.f32.mrb[22].mxu0  ;;  %v3580_v25 = vcombine.low %v1406_v15, %v1414_v16  ;;  %v4095_v15 = vld [vmem:[%s5127_s12 + $0xb8] sm:$0xff]   ;;  %v4096_v16 = vld [vmem:[%s5127_s12 + $0x140] sm:$0xff]  }
 0x5c1   : > { %v4020_v27 = vpop.f32.mrb[23].mxu0  ;;  %v1369_v28 = vadd.f32 %v1364_v24, %v747_v22  ;;  %v1422_v22 = vld [vmem:[%s5125_s10 + $0xa8] sm:$0xff]  ;;  %v3578_v24 = vcombine.low %v1405_v13, %v1413_v14  ;;  %v3595_v26 = vcombine.high %v1421_v20, %v1429_v21  ;;  %v4093_v13 = vld [vmem:[%s5127_s12 + $0xf8] sm:$0xff]  }
 0x5c2   : > { %v3597_v27 = vcombine.high %v1422_v22, %v1430_v23  ;;  %v4094_v14 = vld [vmem:[%s5127_s12 + $0x38] sm:$0xff]  }
 0x5c3   : > { %v1372_v29 = vsel %vm648_vm1, %v1369_v28, 0.0 }
 0x5c4   : > { %1373 = vadd.xlane.f32.xlu1 %v1372_v29  ;;  %v1415_v29 = vld [vmem:[%s5125_s10 + $0x70] sm:$0xff] }
 0x651   : > { %v1374_v30 = vpop.xlane.xlu1 %1373 }
 0x652   : > { %v1376_v31 = vmul.f32 0.03125, %v1374_v30  ;;  %v1408_v30 = vld [vmem:[%s5125_s10 + $0x38] sm:$0xff] }
 0x654   : > { %v1377_v32 = vsub.f32 %v1369_v28, %v1376_v31  ;;  %v1407_v28 = vld [vmem:[%s5125_s10 + $0x30] sm:$0xff]  ;;  %v1416_v31 = vld [vmem:[%s5125_s10 + $0x78] sm:$0xff] }
 0x655   : > { %v3585_v6 = vcombine.high %v1408_v30, %v1416_v31  ;;  %v3582_v39 = vcombine.low %v1407_v28, %v1415_v29  ;;  %v3584_v40 = vcombine.low %v1408_v30, %v1416_v31 }
 0x656   : > { %v1378_v33 = vmul.f32 %v1377_v32, %v1377_v32 }
 0x658   : > { %v1379_v34 = vsel %vm648_vm1, %v1378_v33, 0.0  ;;  %v3596_v33 = vcombine.low %v1422_v22, %v1430_v23 }
 0x659   : > { %1380 = vadd.xlane.f32.xlu0 %v1379_v34  ;;  %v3583_v34 = vcombine.high %v1407_v28, %v1415_v29 }
 0x6e6   : > { %v1381_v59 = vpop.xlane.xlu0 %1380 }
 0x6e7   : > { %v1382_v60 = vmul.f32 0.03125, %v1381_v59  ;;  %v4078_v59 = vld [vmem:[%s5127_s12 + $0x18] sm:$0xff]  }
 0x6e9   : > { %v1383_v61 = vadd.f32 1e-05, %v1382_v60  ;;  %v4079_v60 = vld [vmem:[%s5127_s12 + $0x98] sm:$0xff]  }
 0x6eb   : > { %4208 = vrsqrt.f32 %v1383_v61  ;;  %v4080_v61 = vld [vmem:[%s5127_s12 + $0x60] sm:$0xff]  }
 0x6f5   : > { %v4209_v62 = vpop.eup %4208 }
 0x6f6   : > { %v1385_v0 = vmul.f32 %v4209_v62, %v1377_v32  ;;  %v3594_v32 = vcombine.low %v1421_v20, %v1429_v21  ;;  %v4081_v62 = vld [vmem:[%s5127_s12 + $0xe0] sm:$0xff]   ;;  %v4722_v20 = vld [vmem:[%s5126_s11 + $0x8] sm:$0xff] }
 0x6f8   : > { %v1392_v3 = vmul.f32 %v3568_v63, %v1385_v0  ;;  %v4082_v63 = vld [vmem:[%s5127_s12 + $0x20] sm:$0xff]  }
 0x6f9   : > { %v4083_v0 = vld [vmem:[%s5127_s12 + $0xa0] sm:$0xff]  }
 0x6fa   : > { %v4538_v9 = vadd.f32 %v3569_v2, %v1392_v3  ;;  %v4084_v2 = vld [vmem:[%s5127_s12 + $0x68] sm:$0xff]  }
 0x6fb   : > { %v4085_v3 = vld [vmem:[%s5127_s12 + $0xe8] sm:$0xff]  }
 0x6fc   : > { %v4542_v10 = vpack.c.bf16 %v4538_v9, %v4538_v9 }
 0x6fe   : > { %3602 = vmatmul.mubr.msk.bf16.vlgmr.msra.gmra.mrb[20].mxu1 %vm648_vm1, %v4542_v10  ;;  %3603 = vmatmul.mubr.msk.bf16.vlgmr.msra.gmra.mrb[24].mxu0 %vm648_vm1, %v4542_v10 }
 0x6ff   : > { %1763 = vmatpush1.bf16.msra.mxu1 %v3574_v54  ;;  %1804 = vmatpush1.bf16.msra.mxu0 %v3576_v57  ;;  %v4073_v54 = vld [vmem:[%s5127_s12 + $0xd0] sm:$0xff]   ;;  %v4076_v57 = vld [vmem:[%s5127_s12 + $0x58] sm:$0xff]  }
 0x700   : > { %1764 = vmatprep.subr.bf16.mxu1 %v3591_v11  ;;  %1805 = vmatprep.subr.bf16.mxu0 %v3593_v12  ;;  %v4091_v11 = vld [vmem:[%s5127_s12 + $0xb0] sm:$0xff]   ;;  %v4092_v12 = vld [vmem:[%s5127_s12 + $0x78] sm:$0xff]  }
 0x701   : > { %1794 = vmatprep.mubr.bf16.mxu1 %v4250_v53  ;;  %1835 = vmatprep.mubr.bf16.mxu0 %v4250_v53 }
 0x703   : > { %1765 = vmatpush1.bf16.msra.mxu1 %v3590_v17  ;;  %1806 = vmatpush1.bf16.msra.mxu0 %v3592_v18  ;;  %v4097_v17 = vld [vmem:[%s5127_s12 + $0x1c0] sm:$0xff]   ;;  %v1437_v18 = vlaneseq }
 0x704   : > { %1844 = vmatprep.subr.bf16.mxu1 %v3579_v19  ;;  %1885 = vmatprep.subr.bf16.mxu0 %v3581_v1 }
 0x705   : > { %v4716_v19 = vshrl.u32 %v1437_v18, 7  ;;  %v4107_v18 = vld [vmem:[%s5127_s12 + $0x190] sm:$0xff]  }
 0x706   : > { %3604 = vmatmul.mubr.msk.bf16.vlgmr.msra.gmra.mrb[24].mxu1 %vm648_vm1, %v4542_v10  ;;  %3605 = vmatmul.mubr.msk.bf16.vlgmr.msra.gmra.mrb[28].mxu0 %vm648_vm1, %v4542_v10 }
 0x707   : > { %1845 = vmatpush1.bf16.msra.mxu1 %v3578_v24  ;;  %1886 = vmatpush1.bf16.msra.mxu0 %v3580_v25  ;;  %v1463_v1 = vsub.s32 6, %v4716_v19  ;;  %v1439_v22 = vsub.s32 0, %v4716_v19  ;;  %v1447_v23 = vsub.s32 2, %v4716_v19  ;;  %v4734_v24 = vld [vmem:[%s5126_s11] sm:$0xff]  ;;  %v1443_v25 = vsub.s32 1, %v4716_v19 }
 0x708   : > { %1846 = vmatprep.subr.bf16.mxu1 %v3595_v26  ;;  %1887 = vmatprep.subr.bf16.mxu0 %v3597_v27  ;;  %v1451_v26 = vsub.s32 3, %v4716_v19 }
 0x709   : > { %1876 = vmatprep.mubr.bf16.mxu1 %v4250_v53  ;;  %1917 = vmatprep.mubr.bf16.mxu0 %v4250_v53  ;;  %v4727_v21 = vrot.slane %v4722_v20, %v1463_v1  ;;  %v1440_v27 = vrot.slane %v4734_v24, %v1439_v22  ;;  %v1448_v28 = vrot.slane %v4734_v24, %v1447_v23 }
 0x70a   : > { %v1444_v29 = vrot.slane %v4734_v24, %v1443_v25  ;;  %v1452_v30 = vrot.slane %v4734_v24, %v1451_v26 }
 0x70b   : > { %1847 = vmatpush1.bf16.msra.mxu1 %v3594_v32  ;;  %1888 = vmatpush1.bf16.msra.mxu0 %v3596_v33 }
 0x70c   : > { %1926 = vmatprep.subr.bf16.mxu1 %v3583_v34  ;;  %1967 = vmatprep.subr.bf16.mxu0 %v3585_v6 }
 0x70e   : > { %3606 = vmatmul.mubr.msk.bf16.vlgmr.msra.gmra.mrb[28].mxu1 %vm648_vm1, %v4542_v10  ;;  %3607 = vmatmul.mubr.msk.bf16.vlgmr.msra.gmra.mrb[32].mxu0 %vm648_vm1, %v4542_v10 }
 0x70f   : > { %1927 = vmatpush1.bf16.msra.mxu1 %v3582_v39  ;;  %1968 = vmatpush1.bf16.msra.mxu0 %v3584_v40  ;;  %v1459_v40 = vsub.s32 5, %v4716_v19 }
 0x710   : > { %1928 = vmatprep.subr.bf16.mxu1 %v3599_v41  ;;  %1969 = vmatprep.subr.bf16.mxu0 %v3601_v42  ;;  %v1467_v41 = vsub.s32 7, %v4716_v19 }
 0x711   : > { %1958 = vmatprep.mubr.bf16.mxu1 %v4250_v53  ;;  %1999 = vmatprep.mubr.bf16.mxu0 %v4250_v53  ;;  %v4072_v53 = vld [vmem:[%s5127_s12 + $0x50] sm:$0xff]  }
 0x713   : > { %1929 = vmatpush1.bf16.msra.mxu1 %v3598_v43  ;;  %1970 = vmatpush1.bf16.msra.mxu0 %v3600_v44 }
 0x714   : > { %3773 = vmatprep.subr.bf16.mxu1 %v4064_v45  ;;  %3795 = vmatprep.subr.bf16.mxu0 %v4065_v46 }
 0x716   : > { %3608 = vmatmul.mubr.msk.bf16.vlgmr.msra.gmra.mrb[32].mxu1 %vm648_vm1, %v4542_v10  ;;  %3609 = vmatmul.mubr.msk.bf16.vlgmr.msra.gmra.mrb[36].mxu0 %vm648_vm1, %v4542_v10  ;;  %v4090_v10 = vld [vmem:[%s5127_s12 + $0x30] sm:$0xff]  }
 0x717   : > { %3774 = vmatpush3.bf16.msra.mxu1 %v4066_v47  ;;  %3796 = vmatpush3.bf16.msra.mxu0 %v4067_v48 }
 0x718   : > { %3775 = vmatprep.subr.bf16.mxu1 %v4068_v49  ;;  %3797 = vmatprep.subr.bf16.mxu0 %v4069_v50  ;;  %v1460_v50 = vrot.slane %v4734_v24, %v1459_v40 }
 0x71b   : > { %3776 = vmatpush3.bf16.msra.mxu1 %v4070_v51  ;;  %3798 = vmatpush3.bf16.msra.mxu0 %v4071_v52  ;;  %v1468_v51 = vrot.slane %v4734_v24, %v1467_v41  ;;  %v4098_v52 = vld [vmem:[%s5127_s12 + $0x100] sm:$0xff]  }
 0x71c   : > { %3777 = vmatprep.subr.bf16.mxu1 %v4072_v53  ;;  %3799 = vmatprep.subr.bf16.mxu0 %v4073_v54  ;;  %v4099_v53 = vld [vmem:[%s5127_s12 + $0x180] sm:$0xff]  }
 0x71f   : > { %3778 = vmatpush3.bf16.msra.mxu1 %v4074_v55  ;;  %3800 = vmatpush3.bf16.msra.mxu0 %v4075_v56  ;;  %v4100_v56 = vld [vmem:[%s5127_s12 + $0x148] sm:$0xff]  }
 0x720   : > { %3779 = vmatprep.subr.bf16.mxu1 %v4076_v57  ;;  %3801 = vmatprep.subr.bf16.mxu0 %v4077_v58  ;;  %v4101_v57 = vld [vmem:[%s5127_s12 + $0x1c8] sm:$0xff]  }
 0x723   : > { %3780 = vmatpush3.bf16.msra.mxu1 %v4078_v59  ;;  %3802 = vmatpush3.bf16.msra.mxu0 %v4079_v60 }
 0x724   : > { %3781 = vmatprep.subr.bf16.mxu1 %v4080_v61  ;;  %3803 = vmatprep.subr.bf16.mxu0 %v4081_v62 }
 0x727   : > { %3782 = vmatpush3.bf16.msra.mxu1 %v4082_v63  ;;  %3804 = vmatpush3.bf16.msra.mxu0 %v4083_v0 }
 0x728   : > { %3783 = vmatprep.subr.bf16.mxu1 %v4084_v2  ;;  %3805 = vmatprep.subr.bf16.mxu0 %v4085_v3  ;;  %v4102_v3 = vld [vmem:[%s5127_s12 + $0x108] sm:$0xff]  }
 0x72b   : > { %3784 = vmatpush3.bf16.msra.mxu1 %v4086_v4  ;;  %3806 = vmatpush3.bf16.msra.mxu0 %v4087_v5  ;;  %v4103_v4 = vld [vmem:[%s5127_s12 + $0x188] sm:$0xff]  }
 0x72c   : > { %3785 = vmatprep.subr.bf16.mxu1 %v4088_v7  ;;  %3807 = vmatprep.subr.bf16.mxu0 %v4089_v8  ;;  %v4104_v8 = vld [vmem:[%s5127_s12 + $0x150] sm:$0xff]  }
 0x72f   : > { %3786 = vmatpush3.bf16.msra.mxu1 %v4090_v10  ;;  %3808 = vmatpush3.bf16.msra.mxu0 %v4091_v11  ;;  %v4105_v10 = vld [vmem:[%s5127_s12 + $0x1d0] sm:$0xff]  }
 0x730   : > { %3787 = vmatprep.subr.bf16.mxu1 %v4092_v12  ;;  %3809 = vmatprep.subr.bf16.mxu0 %v4093_v13  ;;  %v1472_v13 = vrot.slane %v4722_v20, %v1439_v22  ;;  %v4108_v22 = vld [vmem:[%s5127_s12 + $0x158] sm:$0xff]  }
 0x733   : > { %3788 = vmatpush3.bf16.msra.mxu1 %v4094_v14  ;;  %3810 = vmatpush3.bf16.msra.mxu0 %v4095_v15  ;;  %v1480_v14 = vrot.slane %v4722_v20, %v1447_v23  ;;  %v4109_v23 = vld [vmem:[%s5127_s12 + $0x1d8] sm:$0xff]  }
 0x734   : > { %3817 = vmatprep.subr.bf16.mxu1 %v4096_v16  ;;  %3839 = vmatprep.subr.bf16.mxu0 %v4097_v17  ;;  %v4106_v17 = vld [vmem:[%s5127_s12 + $0x110] sm:$0xff]  }
 0x7d1   : > { %v1714_v31 = vpop.f32.mrb[20].mxu1  ;;  %v1755_v32 = vpop.f32.mrb[24].mxu0 }
 0x7d2   : > { %v1715_v33 = vadd.f32 %v1714_v31, %v1440_v27  ;;  %v1756_v34 = vadd.f32 %v1755_v32, %v1448_v28  ;;  %v1716_v6 = vpop.f32.mrb[21].mxu1  ;;  %v1757_v35 = vpop.f32.mrb[25].mxu0 }
 0x7d3   : > { %v1717_v36 = vadd.f32 %v1716_v6, %v1444_v29  ;;  %v1758_v37 = vadd.f32 %v1757_v35, %v1452_v30  ;;  %v1718_v38 = vpop.f32.mrb[22].mxu1  ;;  %v1759_v39 = vpop.f32.mrb[26].mxu0  ;;  %v4110_v6 = vld [vmem:[%s5127_s12 + $0x118] sm:$0xff]  }
 0x7d4   : > { %v2008_v42 = vmax.f32 %v1715_v33, 0.0  ;;  %v2010_v43 = vmax.f32 %v1756_v34, 0.0  ;;  %v1719_v44 = vpop.f32.mrb[23].mxu1  ;;  %v1760_v45 = vpop.f32.mrb[27].mxu0  ;;  %v4111_v35 = vld [vmem:[%s5127_s12 + $0x198] sm:$0xff]   ;;  %v4112_v39 = vld [vmem:[%s5127_s12 + $0x160] sm:$0xff]  }
 0x7d5   : > { %v2009_v46 = vmax.f32 %v1717_v36, 0.0  ;;  %v2011_v47 = vmax.f32 %v1758_v37, 0.0  ;;  %v1455_v36 = vsub.s32 4, %v4716_v19  ;;  %v4114_v44 = vld [vmem:[%s5127_s12 + $0x120] sm:$0xff]   ;;  %v4157_v19 = vld [vmem:[%s5127_s12 + $0x2f8] sm:$0xff]  }
 0x7d6   : > { %v2024_v54 = vpack.c.bf16 %v2008_v42, %v2008_v42  ;;  %v2026_v55 = vpack.c.bf16 %v2010_v43, %v2010_v43  ;;  %v4113_v42 = vld [vmem:[%s5127_s12 + $0x1e0] sm:$0xff]  }
 0x7d7   : > { %v2025_v48 = vpack.c.bf16 %v2009_v46, %v2009_v46  ;;  %v2027_v49 = vpack.c.bf16 %v2011_v47, %v2011_v47  ;;  %v1488_v43 = vrot.slane %v4722_v20, %v1455_v36  ;;  %v4115_v45 = vld [vmem:[%s5127_s12 + $0x1a0] sm:$0xff]   ;;  %v4116_v46 = vld [vmem:[%s5127_s12 + $0x168] sm:$0xff]  }
 0x7d8   : > { %v4117_v47 = vld [vmem:[%s5127_s12 + $0x1e8] sm:$0xff]  }
 0x7d9   : > { %v4766_v58 = vpop.f32.mrb[24].mxu1  ;;  %v4768_v59 = vpop.f32.mrb[28].mxu0  ;;  %3103 = vmatprep.mubr.bf16.mxu1 %v2025_v48  ;;  %3143 = vmatprep.mubr.bf16.mxu0 %v2027_v49 }
 0x7da   : > { %v1798_v60 = vpop.f32.mrb[25].mxu1  ;;  %v1839_v61 = vpop.f32.mrb[29].mxu0  ;;  %3104 = vmatmul.mubr.bf16.vlgmr.msra.gmra.mrb[36].mxu1 %v2024_v54  ;;  %3144 = vmatmul.mubr.bf16.vlgmr.msra.gmra.mrb[40].mxu0 %v2026_v55 }
 0x7db   : > { %v1799_v62 = vadd.f32 %v1798_v60, %v1460_v50  ;;  %v1840_v63 = vadd.f32 %v1839_v61, %v1468_v51  ;;  %3818 = vmatpush3.bf16.msra.mxu1 %v4098_v52  ;;  %3840 = vmatpush3.bf16.msra.mxu0 %v4099_v53  ;;  %v1800_v0 = vpop.f32.mrb[26].mxu1  ;;  %v1841_v2 = vpop.f32.mrb[30].mxu0  ;;  %v1456_v60 = vrot.slane %v4734_v24, %v1455_v36  ;;  %v4139_v36 = vld [vmem:[%s5127_s12 + $0x290] sm:$0xff]  }
 0x7dc   : > { %v1801_v5 = vpop.f32.mrb[27].mxu1  ;;  %v1842_v7 = vpop.f32.mrb[31].mxu0  ;;  %3819 = vmatprep.subr.bf16.mxu1 %v4100_v56  ;;  %3841 = vmatprep.subr.bf16.mxu0 %v4101_v57  ;;  %v4118_v56 = vld [vmem:[%s5127_s12 + $0x128] sm:$0xff]   ;;  %v4121_v0 = vld [vmem:[%s5127_s12 + $0x1f0] sm:$0xff]   ;;  %v1476_v2 = vrot.slane %v4722_v20, %v1443_v25  ;;  %v4124_v25 = vld [vmem:[%s5127_s12 + $0x178] sm:$0xff]  }
 0x7dd   : > { %v2013_v11 = vmax.f32 %v1799_v62, 0.0  ;;  %v2015_v12 = vmax.f32 %v1840_v63, 0.0  ;;  %v4119_v57 = vld [vmem:[%s5127_s12 + $0x1a8] sm:$0xff]   ;;  %v4120_v63 = vld [vmem:[%s5127_s12 + $0x170] sm:$0xff]  }
 0x7df   : > { %v2029_v15 = vpack.c.bf16 %v2013_v11, %v2013_v11  ;;  %v2031_v16 = vpack.c.bf16 %v2015_v12, %v2015_v12  ;;  %3820 = vmatpush3.bf16.msra.mxu1 %v4102_v3  ;;  %3842 = vmatpush3.bf16.msra.mxu0 %v4103_v4  ;;  %v4123_v3 = vld [vmem:[%s5127_s12 + $0x1b0] sm:$0xff]   ;;  %v1797_v4 = vadd.f32 %v4766_v58, %v1456_v60  ;;  %v4126_v58 = vld [vmem:[%s5127_s12 + $0x138] sm:$0xff]   ;;  %v4128_v12 = vld [vmem:[%s5127_s12 + $0x240] sm:$0xff]  }
 0x7e0   : > { %3821 = vmatprep.subr.bf16.mxu1 %v4104_v8  ;;  %3843 = vmatprep.subr.bf16.mxu0 %v4105_v10  ;;  %v1500_v60 = vrot.slane %v4722_v20, %v1467_v41  ;;  %v4158_v41 = vld [vmem:[%s5127_s12 + $0x238] sm:$0xff]  }
 0x7e1   : > { %v1878_v27 = vpop.f32.mrb[28].mxu1  ;;  %v1919_v28 = vpop.f32.mrb[32].mxu0  ;;  %3183 = vmatprep.mubr.bf16.mxu1 %v2029_v15  ;;  %3223 = vmatprep.mubr.bf16.mxu0 %v2031_v16  ;;  %v2012_v10 = vmax.f32 %v1797_v4, 0.0  ;;  %v4130_v16 = vld [vmem:[%s5127_s12 + $0x200] sm:$0xff]  }
 0x7e2   : > { %v4796_v29 = vadd.f32 %v1878_v27, %v1472_v13  ;;  %v4798_v30 = vadd.f32 %v1919_v28, %v1480_v14  ;;  %v1880_v31 = vpop.f32.mrb[29].mxu1  ;;  %v1921_v32 = vpop.f32.mrb[33].mxu0  ;;  %v4129_v13 = vld [vmem:[%s5127_s12 + $0x2c0] sm:$0xff]   ;;  %v4132_v27 = vld [vmem:[%s5127_s12 + $0x248] sm:$0xff]  }
 0x7e3   : > { %3822 = vmatpush3.bf16.msra.mxu1 %v4106_v17  ;;  %3844 = vmatpush3.bf16.msra.mxu0 %v4107_v18  ;;  %v1882_v33 = vpop.f32.mrb[30].mxu1  ;;  %v1923_v34 = vpop.f32.mrb[34].mxu0  ;;  %v1881_v7 = vadd.f32 %v1880_v31, %v1476_v2  ;;  %v2028_v17 = vpack.c.bf16 %v2012_v10, %v2012_v10  ;;  %v4133_v28 = vld [vmem:[%s5127_s12 + $0x2c8] sm:$0xff]   ;;  %v4160_v2 = vld [vmem:[%s5127_s12 + $0x340] sm:$0xff]   ;;  %v4169_v10 = vld [vmem:[%s5127_s12 + $0x3d0] sm:$0xff]  }
 0x7e4   : > { %v1883_v37 = vpop.f32.mrb[31].mxu1  ;;  %v1924_v38 = vpop.f32.mrb[35].mxu0  ;;  %3823 = vmatprep.subr.bf16.mxu1 %v4108_v22  ;;  %3845 = vmatprep.subr.bf16.mxu0 %v4109_v23  ;;  %v4131_v22 = vld [vmem:[%s5127_s12 + $0x280] sm:$0xff]   ;;  %v4135_v33 = vld [vmem:[%s5127_s12 + $0x288] sm:$0xff]   ;;  %v4136_v34 = vld [vmem:[%s5127_s12 + $0x250] sm:$0xff]  }
 0x7e5   : > { %v2017_v14 = vmax.f32 %v1881_v7, 0.0  ;;  %v4140_v37 = vld [vmem:[%s5127_s12 + $0x258] sm:$0xff]   ;;  %v4163_v4 = vld [vmem:[%s5127_s12 + $0x380] sm:$0xff]  }
 0x7e6   : > { %v4141_v38 = vld [vmem:[%s5127_s12 + $0x2d8] sm:$0xff]  }
 0x7e7   : > { %3824 = vmatpush3.bf16.msra.mxu1 %v4110_v6  ;;  %3846 = vmatpush3.bf16.msra.mxu0 %v4111_v35  ;;  %v2033_v23 = vpack.c.bf16 %v2017_v14, %v2017_v14  ;;  %v4137_v6 = vld [vmem:[%s5127_s12 + $0x2d0] sm:$0xff]   ;;  %v4173_v14 = vld [vmem:[%s5127_s12 + $0x3d8] sm:$0xff]  }
 0x7e8   : > { %3825 = vmatprep.subr.bf16.mxu1 %v4112_v39  ;;  %3847 = vmatprep.subr.bf16.mxu0 %v4113_v42  ;;  %v4138_v35 = vld [vmem:[%s5127_s12 + $0x210] sm:$0xff]   ;;  %v4142_v39 = vld [vmem:[%s5127_s12 + $0x218] sm:$0xff]  }
 0x7e9   : > { %v1960_v48 = vpop.f32.mrb[32].mxu1  ;;  %v2001_v49 = vpop.f32.mrb[36].mxu0  ;;  %v4143_v42 = vld [vmem:[%s5127_s12 + $0x298] sm:$0xff]  }
 0x7ea   : > { %v4826_v50 = vadd.f32 %v1960_v48, %v1488_v43  ;;  %v4829_v51 = vadd.f32 %v2001_v49, %v4727_v21  ;;  %v4831_v52 = vpop.f32.mrb[33].mxu1  ;;  %v4833_v53 = vpop.f32.mrb[37].mxu0  ;;  %v1464_v21 = vrot.slane %v4734_v24, %v1463_v1  ;;  %v1484_v1 = vrot.slane %v4722_v20, %v1451_v26  ;;  %v4122_v24 = vld [vmem:[%s5127_s12 + $0x130] sm:$0xff]   ;;  %v4125_v26 = vld [vmem:[%s5127_s12 + $0x1f8] sm:$0xff]   ;;  %v4144_v43 = vld [vmem:[%s5127_s12 + $0x260] sm:$0xff]  }
 0x7eb   : > { %3826 = vmatpush3.bf16.msra.mxu1 %v4114_v44  ;;  %3848 = vmatpush3.bf16.msra.mxu0 %v4115_v45  ;;  %v1964_v54 = vpop.f32.mrb[34].mxu1  ;;  %v2005_v55 = vpop.f32.mrb[38].mxu0  ;;  %v4145_v44 = vld [vmem:[%s5127_s12 + $0x2e0] sm:$0xff]   ;;  %v4149_v48 = vld [vmem:[%s5127_s12 + $0x2e8] sm:$0xff]  }
 0x7ec   : > { %v1965_v61 = vpop.f32.mrb[35].mxu1  ;;  %v2006_v62 = vpop.f32.mrb[39].mxu0  ;;  %3827 = vmatprep.subr.bf16.mxu1 %v4116_v46  ;;  %3849 = vmatprep.subr.bf16.mxu0 %v4117_v47  ;;  %v1838_v5 = vadd.f32 %v4768_v59, %v1464_v21  ;;  %v1922_v8 = vadd.f32 %v1921_v32, %v1484_v1  ;;  %v4127_v59 = vld [vmem:[%s5127_s12 + $0x1b8] sm:$0xff]   ;;  %v4134_v32 = vld [vmem:[%s5127_s12 + $0x208] sm:$0xff]   ;;  %v4146_v45 = vld [vmem:[%s5127_s12 + $0x220] sm:$0xff]  }
 0x7ed   : > { %v4147_v46 = vld [vmem:[%s5127_s12 + $0x2a0] sm:$0xff]   ;;  %v4148_v47 = vld [vmem:[%s5127_s12 + $0x268] sm:$0xff]   ;;  %v4152_v55 = vld [vmem:[%s5127_s12 + $0x270] sm:$0xff]  }
 0x7ee   : > { %v2014_v11 = vmax.f32 %v1838_v5, 0.0  ;;  %v2019_v15 = vmax.f32 %v1922_v8, 0.0  ;;  %v4150_v49 = vld [vmem:[%s5127_s12 + $0x228] sm:$0xff]   ;;  %v4154_v21 = vld [vmem:[%s5127_s12 + $0x230] sm:$0xff]   ;;  %v4156_v62 = vld [vmem:[%s5127_s12 + $0x278] sm:$0xff]  }
 0x7ef   : > { %3828 = vmatpush3.bf16.msra.mxu1 %v4118_v56  ;;  %3850 = vmatpush3.bf16.msra.mxu0 %v4119_v57  ;;  %v4151_v54 = vld [vmem:[%s5127_s12 + $0x2a8] sm:$0xff]   ;;  %v4153_v56 = vld [vmem:[%s5127_s12 + $0x2f0] sm:$0xff]   ;;  %v1492_v57 = vrot.slane %v4722_v20, %v1459_v40  ;;  %v2004_v40 = vadd.f32 %v4833_v53, %v1500_v60  ;;  %v4161_v53 = vld [vmem:[%s5127_s12 + $0x3c0] sm:$0xff]  }
 0x7f0   : > { %3829 = vmatprep.subr.bf16.mxu1 %v4120_v63  ;;  %3851 = vmatprep.subr.bf16.mxu0 %v4121_v0  ;;  %v2030_v18 = vpack.c.bf16 %v2014_v11, %v2014_v11  ;;  %v2035_v31 = vpack.c.bf16 %v2019_v15, %v2019_v15  ;;  %v4155_v61 = vld [vmem:[%s5127_s12 + $0x2b0] sm:$0xff]   ;;  %v2016_v63 = vmax.f32 %v4796_v29, 0.0  ;;  %v4159_v0 = vld [vmem:[%s5127_s12 + $0x2b8] sm:$0xff]   ;;  %v4162_v29 = vld [vmem:[%s5127_s12 + $0x300] sm:$0xff]  }
 0x7f1   : > { %v1963_v20 = vadd.f32 %v4831_v52, %v1492_v57  ;;  %v2018_v52 = vmax.f32 %v4798_v30, 0.0  ;;  %v4164_v5 = vld [vmem:[%s5127_s12 + $0x348] sm:$0xff]   ;;  %v4170_v11 = vld [vmem:[%s5127_s12 + $0x310] sm:$0xff]   ;;  %v4174_v15 = vld [vmem:[%s5127_s12 + $0x318] sm:$0xff]  }
 0x7f2   : > { %v4166_v8 = vld [vmem:[%s5127_s12 + $0x308] sm:$0xff]  }
 0x7f3   : > { %3830 = vmatpush3.bf16.msra.mxu1 %v4122_v24  ;;  %3852 = vmatpush3.bf16.msra.mxu0 %v4123_v3  ;;  %v2021_v1 = vmax.f32 %v1963_v20, 0.0  ;;  %v2023_v24 = vmax.f32 %v2004_v40, 0.0  ;;  %v2032_v3 = vpack.c.bf16 %v2016_v63, %v2016_v63  ;;  %v2034_v30 = vpack.c.bf16 %v2018_v52, %v2018_v52 }
 0x7f4   : > { %3831 = vmatprep.subr.bf16.mxu1 %v4124_v25  ;;  %3853 = vmatprep.subr.bf16.mxu0 %v4125_v26  ;;  %v4165_v26 = vld [vmem:[%s5127_s12 + $0x3c8] sm:$0xff]  }
 0x7f5   : > { %v2037_v25 = vpack.c.bf16 %v2021_v1, %v2021_v1  ;;  %v2039_v7 = vpack.c.bf16 %v2023_v24, %v2023_v24 }
 0x7f7   : > { %3832 = vmatpush3.bf16.msra.mxu1 %v4126_v58  ;;  %3854 = vmatpush3.bf16.msra.mxu0 %v4127_v59  ;;  %v4167_v58 = vld [vmem:[%s5127_s12 + $0x388] sm:$0xff]   ;;  %v4168_v59 = vld [vmem:[%s5127_s12 + $0x350] sm:$0xff]  }
 0x7f8   : > { %3861 = vmatprep.subr.bf16.mxu1 %v4128_v12  ;;  %3883 = vmatprep.subr.bf16.mxu0 %v4129_v13  ;;  %v4171_v12 = vld [vmem:[%s5127_s12 + $0x390] sm:$0xff]   ;;  %v4172_v13 = vld [vmem:[%s5127_s12 + $0x358] sm:$0xff]  }
 0x7fa   : > { %3184 = vmatmul.mubr.bf16.vlgmr.msra.gmra.mrb[40].mxu1 %v2028_v17  ;;  %3224 = vmatmul.mubr.bf16.vlgmr.msra.gmra.mrb[44].mxu0 %v2030_v18  ;;  %v4176_v17 = vld [vmem:[%s5127_s12 + $0x360] sm:$0xff]  }
 0x7fb   : > { %3862 = vmatpush3.bf16.msra.mxu1 %v4130_v16  ;;  %3263 = vmatprep.mubr.bf16.mxu1 %v2033_v23  ;;  %v4175_v16 = vld [vmem:[%s5127_s12 + $0x398] sm:$0xff]   ;;  %v4177_v18 = vld [vmem:[%s5127_s12 + $0x3e0] sm:$0xff]  }
 0x7fc   : > { %3884 = vmatpush3.bf16.msra.mxu0 %v4131_v22  ;;  %3303 = vmatprep.mubr.bf16.mxu0 %v2035_v31  ;;  %v4178_v22 = vld [vmem:[%s5127_s12 + $0x320] sm:$0xff]   ;;  %v4182_v31 = vld [vmem:[%s5127_s12 + $0x328] sm:$0xff]  }
 0x7fd   : > { %3863 = vmatprep.subr.bf16.mxu1 %v4132_v27  ;;  %3885 = vmatprep.subr.bf16.mxu0 %v4133_v28  ;;  %v4179_v23 = vld [vmem:[%s5127_s12 + $0x3a0] sm:$0xff]   ;;  %v4180_v27 = vld [vmem:[%s5127_s12 + $0x368] sm:$0xff]  }
 0x7fe   : > { %v4181_v28 = vld [vmem:[%s5127_s12 + $0x3e8] sm:$0xff]  }
 0x7ff   : > { %3864 = vmatpush3.bf16.msra.mxu1 %v4134_v32  ;;  %v4183_v32 = vld [vmem:[%s5127_s12 + $0x3a8] sm:$0xff]  }
 0x800   : > { %3886 = vmatpush3.bf16.msra.mxu0 %v4135_v33  ;;  %3865 = vmatprep.subr.bf16.mxu1 %v4136_v34  ;;  %v4184_v33 = vld [vmem:[%s5127_s12 + $0x370] sm:$0xff]  }
 0x801   : > { %3887 = vmatprep.subr.bf16.mxu0 %v4137_v6  ;;  %v4185_v34 = vld [vmem:[%s5127_s12 + $0x3f0] sm:$0xff]  }
 0x802   : > { %v4186_v6 = vld [vmem:[%s5127_s12 + $0x330] sm:$0xff]  }
 0x803   : > { %3866 = vmatpush3.bf16.msra.mxu1 %v4138_v35  ;;  %v4187_v35 = vld [vmem:[%s5127_s12 + $0x3b0] sm:$0xff]  }
 0x804   : > { %3888 = vmatpush3.bf16.msra.mxu0 %v4139_v36  ;;  %3867 = vmatprep.subr.bf16.mxu1 %v4140_v37  ;;  %v4188_v36 = vld [vmem:[%s5127_s12 + $0x378] sm:$0xff]  }
 0x805   : > { %3889 = vmatprep.subr.bf16.mxu0 %v4141_v38  ;;  %v4189_v37 = vld [vmem:[%s5127_s12 + $0x3f8] sm:$0xff]  }
 0x806   : > { %v4190_v38 = vld [vmem:[%s5127_s12 + $0x338] sm:$0xff]  }
 0x807   : > { %3868 = vmatpush3.bf16.msra.mxu1 %v4142_v39  ;;  %v2020_v39 = vmax.f32 %v4826_v50, 0.0  ;;  %v3610_v50 = vld [vmem:[%s5128_s13] ss:$0 sm:$0xff] }
 0x808   : > { %3890 = vmatpush3.bf16.msra.mxu0 %v4143_v42  ;;  %3869 = vmatprep.subr.bf16.mxu1 %v4144_v43  ;;  %v4191_v42 = vld [vmem:[%s5127_s12 + $0x3b8] sm:$0xff]   ;;  %v2022_v43 = vmax.f32 %v4829_v51, 0.0 }
 0x809   : > { %3891 = vmatprep.subr.bf16.mxu0 %v4145_v44  ;;  %v2036_v44 = vpack.c.bf16 %v2020_v39, %v2020_v39 }
 0x80b   : > { %3870 = vmatpush3.bf16.msra.mxu1 %v4146_v45  ;;  %v2038_v45 = vpack.c.bf16 %v2022_v43, %v2022_v43  ;;  %v3739_v43 = vld [vmem:[%s5129_s14] ss:$0 sm:$0xff] }
 0x80c   : > { %3892 = vmatpush3.bf16.msra.mxu0 %v4147_v46  ;;  %3871 = vmatprep.subr.bf16.mxu1 %v4148_v47 }
 0x80d   : > { %3893 = vmatprep.subr.bf16.mxu0 %v4149_v48 }
 0x80f   : > { %3872 = vmatpush3.bf16.msra.mxu1 %v4150_v49 }
 0x810   : > { %3894 = vmatpush3.bf16.msra.mxu0 %v4151_v54  ;;  %3873 = vmatprep.subr.bf16.mxu1 %v4152_v55 }
 0x811   : > { %3895 = vmatprep.subr.bf16.mxu0 %v4153_v56 }
 0x813   : > { %3874 = vmatpush3.bf16.msra.mxu1 %v4154_v21 }
 0x814   : > { %3896 = vmatpush3.bf16.msra.mxu0 %v4155_v61  ;;  %3875 = vmatprep.subr.bf16.mxu1 %v4156_v62 }
 0x815   : > { %3897 = vmatprep.subr.bf16.mxu0 %v4157_v19 }
 0x817   : > { %3876 = vmatpush3.bf16.msra.mxu1 %v4158_v41 }
 0x818   : > { %3898 = vmatpush3.bf16.msra.mxu0 %v4159_v0  ;;  %3905 = vmatprep.subr.bf16.mxu1 %v4160_v2 }
 0x819   : > { %3927 = vmatprep.subr.bf16.mxu0 %v4161_v53 }
 0x81a   : > { %3264 = vmatmul.mubr.bf16.vlgmr.msra.gmra.mrb[44].mxu1 %v2032_v3 }
 0x81b   : > { %3304 = vmatmul.mubr.bf16.vlgmr.msra.gmra.mrb[48].mxu0 %v2034_v30  ;;  %3906 = vmatpush3.bf16.msra.mxu1 %v4162_v29 }
 0x81c   : > { %3343 = vmatprep.mubr.bf16.mxu1 %v2037_v25  ;;  %3928 = vmatpush3.bf16.msra.mxu0 %v4163_v4 }
 0x81d   : > { %3383 = vmatprep.mubr.bf16.mxu0 %v2039_v7  ;;  %3907 = vmatprep.subr.bf16.mxu1 %v4164_v5 }
 0x81e   : > { %3929 = vmatprep.subr.bf16.mxu0 %v4165_v26 }
 0x81f   : > { %3908 = vmatpush3.bf16.msra.mxu1 %v4166_v8 }
 0x820   : > { %3930 = vmatpush3.bf16.msra.mxu0 %v4167_v58  ;;  %3909 = vmatprep.subr.bf16.mxu1 %v4168_v59 }
 0x821   : > { %3931 = vmatprep.subr.bf16.mxu0 %v4169_v10 }
 0x823   : > { %3910 = vmatpush3.bf16.msra.mxu1 %v4170_v11 }
 0x824   : > { %3932 = vmatpush3.bf16.msra.mxu0 %v4171_v12  ;;  %3911 = vmatprep.subr.bf16.mxu1 %v4172_v13 }
 0x825   : > { %3933 = vmatprep.subr.bf16.mxu0 %v4173_v14 }
 0x827   : > { %3912 = vmatpush3.bf16.msra.mxu1 %v4174_v15 }
 0x828   : > { %3934 = vmatpush3.bf16.msra.mxu0 %v4175_v16  ;;  %3913 = vmatprep.subr.bf16.mxu1 %v4176_v17 }
 0x829   : > { %3935 = vmatprep.subr.bf16.mxu0 %v4177_v18 }
 0x82b   : > { %3914 = vmatpush3.bf16.msra.mxu1 %v4178_v22 }
 0x82c   : > { %3936 = vmatpush3.bf16.msra.mxu0 %v4179_v23  ;;  %3915 = vmatprep.subr.bf16.mxu1 %v4180_v27 }
 0x82d   : > { %3937 = vmatprep.subr.bf16.mxu0 %v4181_v28 }
 0x82f   : > { %3916 = vmatpush3.bf16.msra.mxu1 %v4182_v31 }
 0x830   : > { %3938 = vmatpush3.bf16.msra.mxu0 %v4183_v32  ;;  %3917 = vmatprep.subr.bf16.mxu1 %v4184_v33 }
 0x831   : > { %3939 = vmatprep.subr.bf16.mxu0 %v4185_v34 }
 0x833   : > { %3918 = vmatpush3.bf16.msra.mxu1 %v4186_v6 }
 0x834   : > { %3940 = vmatpush3.bf16.msra.mxu0 %v4187_v35  ;;  %3919 = vmatprep.subr.bf16.mxu1 %v4188_v36 }
 0x835   : > { %3941 = vmatprep.subr.bf16.mxu0 %v4189_v37 }
 0x837   : > { %3920 = vmatpush3.bf16.msra.mxu1 %v4190_v38 }
 0x838   : > { %3942 = vmatpush3.bf16.msra.mxu0 %v4191_v42 }
 0x83a   : > { %3344 = vmatmul.mubr.bf16.vlgmr.msra.gmra.mrb[48].mxu1 %v2036_v44  ;;  %v3740_v44 = vld [vmem:[%s5130_s15] ss:$0 sm:$0xff] }
 0x83b   : > { %3384 = vmatmul.mubr.bf16.vlgmr.msra.gmra.mrb[52].mxu0 %v2038_v45 }
 0x8ad   : > { %v3789_v46 = vpop.f32.mrb[36].mxu1  ;;  %v3811_v47 = vpop.f32.mrb[40].mxu0 }
 0x8ae   : > { %v3790_v48 = vpop.f32.mrb[37].mxu1  ;;  %v3812_v49 = vpop.f32.mrb[41].mxu0 }
 0x8af   : > { %v3791_v54 = vadd.f32 %v3790_v48, %v3789_v46  ;;  %v3813_v55 = vadd.f32 %v3812_v49, %v3811_v47  ;;  %v3792_v56 = vpop.f32.mrb[38].mxu1  ;;  %v3814_v57 = vpop.f32.mrb[42].mxu0 }
 0x8b0   : > { %v3793_v51 = vpop.f32.mrb[39].mxu1  ;;  %v3815_v60 = vpop.f32.mrb[43].mxu0 }
 0x8b1   : > { %v3106_v21 = vadd.f32 %v3791_v54, %v3610_v50 }
 0x8b3   : > { %v3146_v61 = vadd.f32 %v3813_v55, %v3106_v21  ;;  %v3741_v21 = vld [vmem:[%s5131_s16] ss:$0 sm:$0xff] }
 0x8cd   : > { %v3833_v62 = vpop.f32.mrb[40].mxu1  ;;  %v3855_v19 = vpop.f32.mrb[44].mxu0 }
 0x8ce   : > { %v3834_v20 = vpop.f32.mrb[41].mxu1  ;;  %v3856_v40 = vpop.f32.mrb[45].mxu0 }
 0x8cf   : > { %v3835_v41 = vadd.f32 %v3834_v20, %v3833_v62  ;;  %v3857_v63 = vadd.f32 %v3856_v40, %v3855_v19  ;;  %v3836_v0 = vpop.f32.mrb[42].mxu1  ;;  %v3858_v2 = vpop.f32.mrb[46].mxu0  ;;  %v3742_v62 = vld [vmem:[%s5132_s17] ss:$0 sm:$0xff] }
 0x8d0   : > { %v3837_v52 = vpop.f32.mrb[43].mxu1  ;;  %v3859_v53 = vpop.f32.mrb[47].mxu0 }
 0x8d1   : > { %v3186_v1 = vadd.f32 %v3835_v41, %v3146_v61 }
 0x8d3   : > { %v3226_v24 = vadd.f32 %v3857_v63, %v3186_v1 }
 0x8ed   : > { %v3877_v29 = vpop.f32.mrb[44].mxu1 }
 0x8ee   : > { %v3899_v3 = vpop.f32.mrb[48].mxu0  ;;  %v3878_v4 = vpop.f32.mrb[45].mxu1 }
 0x8ef   : > { %v3879_v30 = vadd.f32 %v3878_v4, %v3877_v29  ;;  %v3900_v5 = vpop.f32.mrb[49].mxu0  ;;  %v3880_v25 = vpop.f32.mrb[46].mxu1 }
 0x8f0   : > { %v3901_v26 = vadd.f32 %v3900_v5, %v3899_v3  ;;  %v3902_v7 = vpop.f32.mrb[50].mxu0  ;;  %v3881_v8 = vpop.f32.mrb[47].mxu1 }
 0x8f1   : > { %v3266_v58 = vadd.f32 %v3879_v30, %v3226_v24  ;;  %v3903_v59 = vpop.f32.mrb[51].mxu0 }
 0x8f3   : > { %v3306_v10 = vadd.f32 %v3901_v26, %v3266_v58 }
 0x90d   : > { %v3921_v11 = vpop.f32.mrb[48].mxu1 }
 0x90e   : > { %v3943_v12 = vpop.f32.mrb[52].mxu0  ;;  %v3922_v13 = vpop.f32.mrb[49].mxu1 }
 0x90f   : > { %v3923_v14 = vadd.f32 %v3922_v13, %v3921_v11  ;;  %v3944_v15 = vpop.f32.mrb[53].mxu0  ;;  %v3924_v16 = vpop.f32.mrb[50].mxu1 }
 0x910   : > { %v3945_v17 = vadd.f32 %v3944_v15, %v3943_v12  ;;  %v3946_v18 = vpop.f32.mrb[54].mxu0  ;;  %v3925_v22 = vpop.f32.mrb[51].mxu1 }
 0x911   : > { %v3346_v23 = vadd.f32 %v3923_v14, %v3306_v10  ;;  %v3947_v27 = vpop.f32.mrb[55].mxu0 }
 0x913   : > { %v3386_v28 = vadd.f32 %v3945_v17, %v3346_v23 }
 0x915   : > { %v3391_v31 = vadd.f32 %v3386_v28, %v4538_v9 }
 0x917   : > { %v3394_v32 = vsel %vm648_vm1, %v3391_v31, 0.0 }
 0x918   : > { %3395 = vadd.xlane.f32.xlu0 %v3394_v32 }
 0x9a5   : > { %v3396_v33 = vpop.xlane.xlu0 %3395 }
 0x9a6   : > { %v3397_v34 = vmul.f32 0.03125, %v3396_v33 }
 0x9a8   : > { %v3398_v6 = vsub.f32 %v3391_v31, %v3397_v34 }
 0x9aa   : > { %v3399_v35 = vmul.f32 %v3398_v6, %v3398_v6 }
 0x9ac   : > { %v3400_v36 = vsel %vm648_vm1, %v3399_v35, 0.0 }
 0x9ad   : > { %3401 = vadd.xlane.f32.xlu1 %v3400_v36 }
 0xa3a   : > { %v3402_v37 = vpop.xlane.xlu1 %3401 }
 0xa3b   : > { %v3403_v38 = vmul.f32 0.03125, %v3402_v37 }
 0xa3d   : > { %v3404_v39 = vadd.f32 1e-05, %v3403_v38 }
 0xa3f   : > { %4210 = vrsqrt.f32 %v3404_v39 }
 0xa49   : > { %v4211_v42 = vpop.eup %4210 }
 0xa4a   : > { %v3406_v9 = vmul.f32 %v4211_v42, %v3398_v6 }
 0xa4c   : > { %v3413_v45 = vmul.f32 %v3739_v43, %v3406_v9 }
 0xa4e   : > { %v3420_v46 = vadd.f32 %v3740_v44, %v3413_v45 }
 0xa50   : > { %v3423_v47 = vsel %vm648_vm1, %v3420_v46, 0.0 }
 0xa51   : > { %3424 = vadd.xlane.f32.xlu0 %v3423_v47 }
 0xade   : > { %v3425_v50 = vpop.xlane.xlu0 %3424 }
 0xadf   : > { %v3426_v48 = vmul.f32 0.03125, %v3425_v50 }
 0xae1   : > { %v3427_v49 = vsub.f32 %v3420_v46, %v3426_v48 }
 0xae3   : > { %v3428_v54 = vmul.f32 %v3427_v49, %v3427_v49 }
 0xae5   : > { %v3429_v55 = vsel %vm648_vm1, %v3428_v54, 0.0 }
 0xae6   : > { %3430 = vadd.xlane.f32.xlu1 %v3429_v55 }
 0xb73   : > { %v3431_v56 = vpop.xlane.xlu1 %3430 }
 0xb74   : > { %v3432_v57 = vmul.f32 0.03125, %v3431_v56 }
 0xb76   : > { %v3433_v51 = vadd.f32 1e-05, %v3432_v57 }
 0xb78   : > { %4212 = vrsqrt.f32 %v3433_v51 }
 0xb82   : > { %v4213_v60 = vpop.eup %4212 }
 0xb83   : > { %v3435_v61 = vmul.f32 %v4213_v60, %v3427_v49 }
 0xb85   : > { %v3442_v19 = vmul.f32 %v3741_v21, %v3435_v61 }
 0xb87   : > { %v3449_v20 = vadd.f32 %v3742_v62, %v3442_v19 }
 0xb89   : > { %3450 = vst.msk [vmem:[%s618_s26] sm:$0xff] %vm648_vm1, %v3449_v20 }
 0xb8a PF: > { %s28_s29 = sadd.s32 1, %s4236_s29   ;;  %s5141_s27 = smov %s4232_s28 }
 0xb8b   : > { %p25_p5 = scmp.ge.s32.totalorder %s28_s29, 4   ;;  %s5142_s28 = smov %s5144_s30 }
 0xb8d   :  { %27 = sbr.rel (!%p25_p5) target bundleno = 4 (0x4), region = 138 }

</bundles_post_ra>
